<compile_context>
chip_gen: v7x
topology: tpu7x:2x2x1
jax: 0.10.0
libtpu: 0.0.40
codegen_flags: <defaults>
</compile_context>

<pallas_src>
import functools

import jax
import jax.numpy as jnp
from jax.experimental import pallas as pl
from jax.experimental.pallas import tpu as pltpu

EPS = 1e-5
K_PAD = 32      # input features padded 20 -> 32 (sublane aligned)
OUT_PAD = 128   # fc3 output columns padded 2 -> 128 (one full lane tile)


# ---------------------------------------------------------------------------
# Kernel
# ---------------------------------------------------------------------------
def recnet_kernel(x_ref, w1_ref, b1_ref, w2_ref, b2_ref, w3_ref, b3_ref, out_ref):
    # fc1 -> relu            (bn1 folded into fc2; dropout = identity in eval)
    x = x_ref[...]                                                  # (T, 32) bf16
    h1 = jnp.dot(x, w1_ref[...], preferred_element_type=jnp.float32) + b1_ref[...]
    h1 = jnp.maximum(h1, 0.0).astype(jnp.bfloat16)                  # (T, 512)

    # fc2' -> relu           (bn2 folded into fc3; dropout = identity in eval)
    h2 = jnp.dot(h1, w2_ref[...], preferred_element_type=jnp.float32) + b2_ref[...]
    h2 = jnp.maximum(h2, 0.0).astype(jnp.bfloat16)                  # (T, 1024)

    # fc3'' (BN + 2-class softmax both folded into the weights host-side):
    # logits columns are [l0-l1, l1-l0, 0...], so softmax == elementwise sigmoid.
    logits = jnp.dot(h2, w3_ref[...], preferred_element_type=jnp.float32) + b3_ref[...]
    probs = 1.0 / (1.0 + jnp.exp(-logits))                          # (T, 128), EUP
    out_ref[...] = probs[:, :2]                                     # (T, 2)


# ---------------------------------------------------------------------------
# Host-side parameter preparation: fold BN + softmax, pad, cast weights to bf16
# ---------------------------------------------------------------------------
def prepare_params(p):
    a1 = p["g1"] * jax.lax.rsqrt(p["v1"] + EPS)        # (1, 512)
    c1 = p["be1"] - p["m1"] * a1
    a2 = p["g2"] * jax.lax.rsqrt(p["v2"] + EPS)        # (1, 1024)
    c2 = p["be2"] - p["m2"] * a2

    # Fold bn1 into fc2 and bn2 into fc3 (weights stored (in, out)).
    w2f = p["w2"] * a1.reshape(-1, 1)                  # scale rows of W2
    b2f = c1 @ p["w2"] + p["b2"]
    w3f = p["w3"] * a2.reshape(-1, 1)                  # scale rows of W3
    b3f = c2 @ p["w3"] + p["b3"]

    # Fold the 2-class softmax: softmax([l0, l1]) == sigmoid([l0 - l1, l1 - l0]).
    dw = w3f[:, 1:2] - w3f[:, 0:1]                     # (1024, 1)
    db = b3f[:, 1:2] - b3f[:, 0:1]                     # (1, 1)
    w3s = jnp.concatenate([-dw, dw], axis=1)           # (1024, 2)
    b3s = jnp.concatenate([-db, db], axis=1)           # (1, 2)

    # Pad input features (20 -> 32) and fc3 output (2 -> 128) with zeros.
    w1p = jnp.pad(p["w1"], ((0, K_PAD - p["w1"].shape[0]), (0, 0)))
    w3p = jnp.pad(w3s, ((0, 0), (0, OUT_PAD - w3s.shape[1])))
    b3p = jnp.pad(b3s, ((0, 0), (0, OUT_PAD - b3s.shape[1])))

    return dict(
        w1=w1p.astype(jnp.bfloat16), b1=p["b1"],
        w2=w2f.astype(jnp.bfloat16), b2=b2f,
        w3=w3p.astype(jnp.bfloat16), b3=b3p,
    )


# ---------------------------------------------------------------------------
# Generation-aware VMEM budgeting and batch-tile sizing
# ---------------------------------------------------------------------------
def _round_up(n, m):
    return pl.cdiv(n, m) * m


def _vmem_capacity_bytes():
    try:
        info = pltpu.get_tpu_info()
        return int(getattr(info, "vmem_capacity_bytes", 64 << 20))
    except Exception:
        return 64 << 20                                # conservative fallback


def _vmem_limit_bytes(cap_bytes):
    # 75% of physical, never above 100 MiB: ~96 MiB on v5e/v6e, ~48 MiB on v7x.
    return int(min(cap_bytes * 3 // 4, 100 << 20))


def _pick_tile(n, cap_rows):
    """Batch-tile rows: full 128-row tiles; >=2 grid steps when n > 128."""
    cap_rows = max(128, _round_up(cap_rows, 128))
    if n <= 128:
        return 128                                     # single tile, padded to 128
    two_way = _round_up(pl.cdiv(n, 2), 128)            # both megacore TCs get work
    return min(cap_rows, two_way)


# ---------------------------------------------------------------------------
# Wrapper
# ---------------------------------------------------------------------------
@functools.partial(jax.jit, static_argnames=("tile_n",))
def recnet_forward(x, prep, tile_n=None):
    n = x.shape[0]
    vmem_cap = _vmem_capacity_bytes()
    if tile_n is None:
        # ~21 MiB of temps at 2048 rows, ~42 MiB at 4096 — pick per generation.
        tile_n = 4096 if vmem_cap >= (100 << 20) else 2048
    tile = _pick_tile(n, tile_n)
    n_pad = _round_up(n, tile)

    # Batch pad + feature pad (20 -> 32) + f32->bf16 cast in one fused host op.
    xp = jnp.pad(x, ((0, n_pad - n), (0, K_PAD - x.shape[1]))).astype(jnp.bfloat16)

    flops = 2 * n_pad * (K_PAD * 512 + 512 * 1024 + 1024 * OUT_PAD)
    param_bytes = sum(int(v.size) * v.dtype.itemsize for v in prep.values())
    bytes_accessed = int(xp.size) * xp.dtype.itemsize + param_bytes + n_pad * 2 * 4

    const = lambda i: (0, 0)
    out = pl.pallas_call(
        recnet_kernel,
        out_shape=jax.ShapeDtypeStruct((n_pad, 2), jnp.float32),
        grid=(n_pad // tile,),
        in_specs=[
            pl.BlockSpec((tile, K_PAD), lambda i: (i, 0)),   # x tile (bf16)
            pl.BlockSpec((K_PAD, 512), const),               # w1 (VMEM resident)
            pl.BlockSpec((1, 512), const),                   # b1
            pl.BlockSpec((512, 1024), const),                # w2' (bn1 folded)
            pl.BlockSpec((1, 1024), const),                  # b2'
            pl.BlockSpec((1024, OUT_PAD), const),            # w3'' (bn2+softmax folded)
            pl.BlockSpec((1, OUT_PAD), const),               # b3''
        ],
        out_specs=pl.BlockSpec((tile, 2), lambda i: (i, 0)),
        compiler_params=pltpu.CompilerParams(
            dimension_semantics=("parallel",),
            vmem_limit_bytes=_vmem_limit_bytes(vmem_cap)),
        cost_estimate=pl.CostEstimate(
            flops=flops,
            transcendentals=n_pad * OUT_PAD,
            bytes_accessed=bytes_accessed),
    )(xp, prep["w1"], prep["b1"], prep["w2"], prep["b2"], prep["w3"], prep["b3"])
    return out[:n]


# ---------------------------------------------------------------------------
# Deterministic synthetic parameters (shapes from RecNet.__init__)
# ---------------------------------------------------------------------------
def init_params(key):
    ks = jax.random.split(key, 16)

    def linear(kw, kb, fan_in, fan_out):
        bound = 1.0 / jnp.sqrt(fan_in)
        w = jax.random.uniform(kw, (fan_in, fan_out), jnp.float32, -bound, bound)
        b = jax.random.uniform(kb, (1, fan_out), jnp.float32, -bound, bound)
        return w, b

    def bn(kg, kb, km, kv, f):
        g = jax.random.uniform(kg, (1, f), jnp.float32, 0.5, 1.5)
        be = 0.1 * jax.random.normal(kb, (1, f), jnp.float32)
        m = 0.1 * jax.random.normal(km, (1, f), jnp.float32)
        v = jax.random.uniform(kv, (1, f), jnp.float32, 0.5, 1.5)
        return g, be, m, v

    w1, b1 = linear(ks[0], ks[1], 20, 512)
    w2, b2 = linear(ks[2], ks[3], 512, 1024)
    w3, b3 = linear(ks[4], ks[5], 1024, 2)
    g1, be1, m1, v1 = bn(ks[6], ks[7], ks[8], ks[9], 512)
    g2, be2, m2, v2 = bn(ks[10], ks[11], ks[12], ks[13], 1024)
    return dict(
        w1=w1, b1=b1, g1=g1, be1=be1, m1=m1, v1=v1,
        w2=w2, b2=b2, g2=g2, be2=be2, m2=m2, v2=v2,
        w3=w3, b3=b3,
    )


# ---------------------------------------------------------------------------
# References
# ---------------------------------------------------------------------------
def recnet_reference_f32(x, p):
    """Pure-JAX f32 reference of the original eval-mode forward (unfolded)."""
    h1 = jnp.maximum(x @ p["w1"] + p["b1"], 0.0)
    h1 = (h1 - p["m1"]) * jax.lax.rsqrt(p["v1"] + EPS) * p["g1"] + p["be1"]
    h2 = jnp.maximum(h1 @ p["w2"] + p["b2"], 0.0)
    h2 = (h2 - p["m2"]) * jax.lax.rsqrt(p["v2"] + EPS) * p["g2"] + p["be2"]
    logits = h2 @ p["w3"] + p["b3"]
    return jax.nn.softmax(logits, axis=1)


def recnet_reference_prepared(x, prep):
    """Pure-JAX emulation of the kernel math (folded BN+softmax, bf16 dots)."""
    xp = jnp.pad(x, ((0, 0), (0, K_PAD - x.shape[1]))).astype(jnp.bfloat16)
    h1 = jnp.dot(xp, prep["w1"], preferred_element_type=jnp.float32) + prep["b1"]
    h1 = jnp.maximum(h1, 0.0).astype(jnp.bfloat16)
    h2 = jnp.dot(h1, prep["w2"], preferred_element_type=jnp.float32) + prep["b2"]
    h2 = jnp.maximum(h2, 0.0).astype(jnp.bfloat16)
    logits = jnp.dot(h2, prep["w3"], preferred_element_type=jnp.float32) + prep["b3"]
    probs = 1.0 / (1.0 + jnp.exp(-logits))
    return probs[:, :2]


# ---------------------------------------------------------------------------
if __name__ == "__main__":
    key = jax.random.PRNGKey(0)
    kx, kp, kx2, kx3 = jax.random.split(key, 4)

    params = init_params(kp)
    prep = prepare_params(params)

    # Small-batch check (single 128-row tile, batch-padding path).
    N = 8
    x = jax.random.normal(kx, (N, 20), jnp.float32)
    out = jax.block_until_ready(recnet_forward(x, prep))
    assert out.shape == (N, 2)
    assert jnp.allclose(out, recnet_reference_prepared(x, prep), atol=1e-3), \
        "mismatch vs folded/bf16 reference"
    assert jnp.allclose(out, recnet_reference_f32(x, params), atol=2e-2), \
        "mismatch vs f32 eval-mode reference"
    assert jnp.allclose(jnp.sum(out, axis=1), 1.0, atol=1e-5), \
        "softmax rows must sum to 1"

    # Multi-tile check (grid == 2, both megacore TensorCores get a tile).
    N2 = 200
    x2 = jax.random.normal(kx2, (N2, 20), jnp.float32)
    out2 = jax.block_until_ready(recnet_forward(x2, prep))
    assert out2.shape == (N2, 2)
    assert jnp.allclose(out2, recnet_reference_prepared(x2, prep), atol=1e-3), \
        "mismatch vs folded/bf16 reference (tiled)"
    assert jnp.allclose(out2, recnet_reference_f32(x2, params), atol=2e-2), \
        "mismatch vs f32 eval-mode reference (tiled)"
    assert jnp.allclose(jnp.sum(out2, axis=1), 1.0, atol=1e-5), \
        "softmax rows must sum to 1 (tiled)"

    # Larger batch exercising the two-way tile split and ragged padding.
    N3 = 2500
    x3 = jax.random.normal(kx3, (N3, 20), jnp.float32)
    out3 = jax.block_until_ready(recnet_forward(x3, prep))
    assert out3.shape == (N3, 2)
    assert jnp.allclose(out3, recnet_reference_prepared(x3, prep), atol=1e-3), \
        "mismatch vs folded/bf16 reference (large batch)"
    assert jnp.allclose(out3, recnet_reference_f32(x3, params), atol=2e-2), \
        "mismatch vs f32 eval-mode reference (large batch)"

    print("KERNEL_OK")
</pallas_src>

<mosaic_0001>
module attributes {stable_mosaic.version = 11 : i64} {
  func.func @recnet_kernel(%arg0: i32, %arg1: memref<128x32xbf16, #tpu.memory_space<vmem>>, %arg2: memref<32x512xbf16, #tpu.memory_space<vmem>>, %arg3: memref<1x512xf32, #tpu.memory_space<vmem>>, %arg4: memref<512x1024xbf16, #tpu.memory_space<vmem>>, %arg5: memref<1x1024xf32, #tpu.memory_space<vmem>>, %arg6: memref<1024x128xbf16, #tpu.memory_space<vmem>>, %arg7: memref<1x128xf32, #tpu.memory_space<vmem>>, %arg8: memref<128x2xf32, #tpu.memory_space<vmem>>) attributes {dimension_semantics = [#tpu.dimension_semantics<parallel>], iteration_bounds = array<i64: 1>, scalar_prefetch = 0 : i64, scratch_operands = 0 : i64, tpu.core_type = #tpu.core_type<tc>, window_params = [{transform_indices = @transform_0, window_bounds = array<i64: 128, 32>}, {pipeline_mode = #tpu.pipeline_mode<synchronous>, transform_indices = @transform_1, window_bounds = array<i64: 32, 512>}, {pipeline_mode = #tpu.pipeline_mode<synchronous>, transform_indices = @transform_2, window_bounds = array<i64: 1, 512>}, {pipeline_mode = #tpu.pipeline_mode<synchronous>, transform_indices = @transform_3, window_bounds = array<i64: 512, 1024>}, {pipeline_mode = #tpu.pipeline_mode<synchronous>, transform_indices = @transform_4, window_bounds = array<i64: 1, 1024>}, {pipeline_mode = #tpu.pipeline_mode<synchronous>, transform_indices = @transform_5, window_bounds = array<i64: 1024, 128>}, {pipeline_mode = #tpu.pipeline_mode<synchronous>, transform_indices = @transform_6, window_bounds = array<i64: 1, 128>}, {transform_indices = @transform_7, window_bounds = array<i64: 128, 2>}]} {
    %c0 = arith.constant 0 : index
    %c0_0 = arith.constant 0 : index
    %0 = vector.load %arg1[%c0, %c0_0] : memref<128x32xbf16, #tpu.memory_space<vmem>>, vector<128x32xbf16>
    %c0_1 = arith.constant 0 : index
    %c0_2 = arith.constant 0 : index
    %1 = vector.load %arg2[%c0_1, %c0_2] : memref<32x512xbf16, #tpu.memory_space<vmem>>, vector<32x512xbf16>
    %cst = arith.constant dense<0.000000e+00> : vector<128x512xf32>
    %2 = tpu.matmul %0, %1, %cst {dimension_numbers = #tpu.dot_dimension_numbers<[1], [0], [0], [1], [0, 0, 1, 1], [], []>} : vector<128x32xbf16>, vector<32x512xbf16>, vector<128x512xf32> -> vector<128x512xf32>
    %c0_3 = arith.constant 0 : index
    %c0_4 = arith.constant 0 : index
    %3 = vector.load %arg3[%c0_3, %c0_4] : memref<1x512xf32, #tpu.memory_space<vmem>>, vector<1x512xf32>
    %4 = vector.broadcast %3 : vector<1x512xf32> to vector<128x512xf32>
    %5 = arith.addf %2, %4 : vector<128x512xf32>
    %cst_5 = arith.constant 0.000000e+00 : f32
    %6 = vector.broadcast %cst_5 : f32 to vector<128x512xf32>
    %7 = arith.maximumf %5, %6 : vector<128x512xf32>
    %8 = arith.truncf %7 : vector<128x512xf32> to vector<128x512xbf16>
    %c0_6 = arith.constant 0 : index
    %c0_7 = arith.constant 0 : index
    %9 = vector.load %arg4[%c0_6, %c0_7] : memref<512x1024xbf16, #tpu.memory_space<vmem>>, vector<512x1024xbf16>
    %cst_8 = arith.constant dense<0.000000e+00> : vector<128x1024xf32>
    %10 = tpu.matmul %8, %9, %cst_8 {dimension_numbers = #tpu.dot_dimension_numbers<[1], [0], [0], [1], [0, 0, 1, 1], [], []>} : vector<128x512xbf16>, vector<512x1024xbf16>, vector<128x1024xf32> -> vector<128x1024xf32>
    %c0_9 = arith.constant 0 : index
    %c0_10 = arith.constant 0 : index
    %11 = vector.load %arg5[%c0_9, %c0_10] : memref<1x1024xf32, #tpu.memory_space<vmem>>, vector<1x1024xf32>
    %12 = vector.broadcast %11 : vector<1x1024xf32> to vector<128x1024xf32>
    %13 = arith.addf %10, %12 : vector<128x1024xf32>
    %cst_11 = arith.constant 0.000000e+00 : f32
    %14 = vector.broadcast %cst_11 : f32 to vector<128x1024xf32>
    %15 = arith.maximumf %13, %14 : vector<128x1024xf32>
    %16 = arith.truncf %15 : vector<128x1024xf32> to vector<128x1024xbf16>
    %c0_12 = arith.constant 0 : index
    %c0_13 = arith.constant 0 : index
    %17 = vector.load %arg6[%c0_12, %c0_13] : memref<1024x128xbf16, #tpu.memory_space<vmem>>, vector<1024x128xbf16>
    %cst_14 = arith.constant dense<0.000000e+00> : vector<128x128xf32>
    %18 = tpu.matmul %16, %17, %cst_14 {dimension_numbers = #tpu.dot_dimension_numbers<[1], [0], [0], [1], [0, 0, 1, 1], [], []>} : vector<128x1024xbf16>, vector<1024x128xbf16>, vector<128x128xf32> -> vector<128x128xf32>
    %c0_15 = arith.constant 0 : index
    %c0_16 = arith.constant 0 : index
    %19 = vector.load %arg7[%c0_15, %c0_16] : memref<1x128xf32, #tpu.memory_space<vmem>>, vector<1x128xf32>
    %20 = vector.broadcast %19 : vector<1x128xf32> to vector<128x128xf32>
    %21 = arith.addf %18, %20 : vector<128x128xf32>
    %cst_17 = arith.constant 0.000000e+00 : f32
    %22 = vector.broadcast %cst_17 : f32 to vector<128x128xf32>
    %23 = arith.subf %22, %21 : vector<128x128xf32>
    %24 = math.exp %23 : vector<128x128xf32>
    %cst_18 = arith.constant 1.000000e+00 : f32
    %25 = vector.broadcast %cst_18 : f32 to vector<128x128xf32>
    %26 = arith.addf %25, %24 : vector<128x128xf32>
    %cst_19 = arith.constant 1.000000e+00 : f32
    %27 = vector.broadcast %cst_19 : f32 to vector<128x128xf32>
    %28 = arith.divf %27, %26 : vector<128x128xf32>
    %29 = vector.extract_strided_slice %28 {offsets = [0, 0], sizes = [128, 2], strides = [1, 1]} : vector<128x128xf32> to vector<128x2xf32>
    %c0_20 = arith.constant 0 : index
    %c0_21 = arith.constant 0 : index
    %30 = vector.load %arg8[%c0_20, %c0_21] : memref<128x2xf32, #tpu.memory_space<vmem>>, vector<128x2xf32>
    tpu.vector_store %arg8[%c0_20, %c0_21], %29 {strides = array<i32>} : memref<128x2xf32, #tpu.memory_space<vmem>>, vector<128x2xf32>,
    return
  }
  func.func @transform_0(%arg0: i32) -> (i32, i32) {
    %c0_i32 = arith.constant 0 : i32
    %c0_i32_0 = arith.constant 0 : i32
    return %arg0, %c0_i32 : i32, i32
  }
  func.func @transform_1(%arg0: i32) -> (i32, i32) {
    %c0_i32 = arith.constant 0 : i32
    %c0_i32_0 = arith.constant 0 : i32
    %c0_i32_1 = arith.constant 0 : i32
    return %c0_i32, %c0_i32_0 : i32, i32
  }
  func.func @transform_2(%arg0: i32) -> (i32, i32) {
    %c0_i32 = arith.constant 0 : i32
    %c0_i32_0 = arith.constant 0 : i32
    %c0_i32_1 = arith.constant 0 : i32
    return %c0_i32, %c0_i32_0 : i32, i32
  }
  func.func @transform_3(%arg0: i32) -> (i32, i32) {
    %c0_i32 = arith.constant 0 : i32
    %c0_i32_0 = arith.constant 0 : i32
    %c0_i32_1 = arith.constant 0 : i32
    return %c0_i32, %c0_i32_0 : i32, i32
  }
  func.func @transform_4(%arg0: i32) -> (i32, i32) {
    %c0_i32 = arith.constant 0 : i32
    %c0_i32_0 = arith.constant 0 : i32
    %c0_i32_1 = arith.constant 0 : i32
    return %c0_i32, %c0_i32_0 : i32, i32
  }
  func.func @transform_5(%arg0: i32) -> (i32, i32) {
    %c0_i32 = arith.constant 0 : i32
    %c0_i32_0 = arith.constant 0 : i32
    %c0_i32_1 = arith.constant 0 : i32
    return %c0_i32, %c0_i32_0 : i32, i32
  }
  func.func @transform_6(%arg0: i32) -> (i32, i32) {
    %c0_i32 = arith.constant 0 : i32
    %c0_i32_0 = arith.constant 0 : i32
    %c0_i32_1 = arith.constant 0 : i32
    return %c0_i32, %c0_i32_0 : i32, i32
  }
  func.func @transform_7(%arg0: i32) -> (i32, i32) {
    %c0_i32 = arith.constant 0 : i32
    %c0_i32_0 = arith.constant 0 : i32
    return %arg0, %c0_i32 : i32, i32
  }
}

</mosaic_0001>

<bundles_post_ra>
// kernel: recnet_forward.1
= control target key start
LH: loop header
LB: loop body
LE: loop exit
PB: predicated region body
PF: predicated region fallthrough
CT: control target
= control target key end

     0   :  { %12 = vsyncpa [#allocation3], 0  ;;  %s6250_s0 = inlined_call_operand.vmem [shape: bf16[128,32], index: 0, kind: input, shape index: {}]   ;;  %s6251_s1 = inlined_call_operand.vmem [shape: bf16[32,512], index: 1, kind: input, shape index: {}]   ;;  %s6252_s2 = inlined_call_operand.vmem [shape: f32[1,512], index: 2, kind: input, shape index: {}]   ;;  %s6253_s3 = inlined_call_operand.hbm [shape: bf16[512,1024], index: 3, kind: input, shape index: {}]   ;;  %s6254_s4 = inlined_call_operand.vmem [shape: f32[1,1024], index: 4, kind: input, shape index: {}]   ;;  %s6255_s5 = inlined_call_operand.hbm [shape: bf16[1024,128], index: 5, kind: input, shape index: {}]   ;;  %s6256_s6 = inlined_call_operand.vmem [shape: f32[1,128], index: 6, kind: input, shape index: {}]   ;;  %s6257_s7 = inlined_call_operand.vmem [shape: f32[128,2], index: 7, kind: output, shape index: {}]  }
   0x1   :  { %13 = vsyncpa [#allocation5], 0  ;;  %s5296_s24 = smov [#allocation2]   ;;  %s5248_s28 = scalar_lea.hbm %s6253_s3, 32768 }
   0x2   :  { %s25_s25 = sshll.u32 %s5296_s24, 4  ;;  %p5249_p0 = scmp.ne.s32.totalorder %s6253_s3, %s5248_s28  ;;  %s26_s25 = int_to_ptr.vmem [resolvable:$true] %s25_s25 }
   0x3   :  { %p5252_p1 = scmp.lt.u32.totalorder %s5248_s28, %s6253_s3 }
   0x5   :  { %p5254_p2 = pnand %p5252_p1, %p5249_p0 }
   0x7   :  { %5257 = shalt.err (!%p5254_p2)
}
   0x8   :  { %s5258_s10 = scalar_lea.vmem %s26_s25, 32768  ;;  %p5263_p4 = scmp.lt.s32.totalorder %s26_s25, %s26_s25 }
   0x9   :  { %p5259_p3 = scmp.ne.s32.totalorder %s26_s25, %s5258_s10  ;;  %p5264_p5 = scmp.lt.s32.totalorder %s5258_s10, %s5258_s10 }
   0xb   :  { %p5265_p6 = por %p5264_p5, %p5263_p4 }
   0xd   :  { %p5266_p7 = pnand %p5265_p6, %p5259_p3 }
   0xf   :  { %5269 = shalt.err (!%p5266_p7)
}
  0x10   :  { %s5297_s11 = smov 512   ;;  %s5298_s12 = smov 32  }
  0x11   :  { %31 = dma.hbm_to_vmem [thread:$0]  %s6253_s3, 32768, %s26_s25, [#allocation3], %s5297_s11, %s5297_s11, %s5298_s12  }
  0x12   :  { %s5299_s15 = smov [#allocation4]   ;;  %s5270_s19 = scalar_lea.hbm %s6255_s5, 8192 }
  0x13   :  { %s39_s16 = sshll.u32 %s5299_s15, 4  ;;  %p5271_p8 = scmp.ne.s32.totalorder %s6255_s5, %s5270_s19  ;;  %s40_s16 = int_to_ptr.vmem [resolvable:$true] %s39_s16 }
  0x14   :  { %p5274_p9 = scmp.lt.u32.totalorder %s5270_s19, %s6255_s5 }
  0x16   :  { %p5276_p10 = pnand %p5274_p9, %p5271_p8 }
  0x18   :  { %5279 = shalt.err (!%p5276_p10)
}
  0x19   :  { %s5280_s24 = scalar_lea.vmem %s40_s16, 8192  ;;  %p5285_p12 = scmp.lt.s32.totalorder %s40_s16, %s40_s16 }
  0x1a   :  { %p5281_p11 = scmp.ne.s32.totalorder %s40_s16, %s5280_s24  ;;  %p5286_p13 = scmp.lt.s32.totalorder %s5280_s24, %s5280_s24 }
  0x1c   :  { %p5287_p0 = por %p5286_p13, %p5285_p12 }
  0x1e   :  { %p5288_p1 = pnand %p5287_p0, %p5281_p11 }
  0x20   :  { %5291 = shalt.err (!%p5288_p1)
}
  0x21   :  { %s5300_s3 = smov 64   ;;  %s5301_s25 = smov 4  }
  0x22   :  { %45 = dma.hbm_to_vmem [thread:$0]  %s6255_s5, 8192, %s40_s16, [#allocation5], %s5300_s3, %s5300_s3, %s5301_s25  }
  0x23   :  { %5292 = dma.done.wait [#allocation3], 32768  }
  0x24   :  { %5293 = vsyncadd [#allocation3], 4294934528 }
  0x25   :  { %5294 = dma.done.wait [#allocation5], 8192  }
  0x26   :  { %5295 = vsyncadd [#allocation5], 4294959104  ;;  %v5302_v0 = vmov 0   ;;  %v5100_v1 = vld [vmem:[%s6251_s1 + $0x4] ss:$16 sps:$4 sm:$0xff]   ;;  %vm181_vm0 = vcmask 261120  }
  0x27   :  { %238 = vmatprep.mubr.bf16.mxu0 %v5302_v0  ;;  %351 = vmatprep.mubr.bf16.mxu1 %v5302_v0  ;;  %v5102_v2 = vld [vmem:[%s6251_s1] ss:$16 sps:$4 sm:$0xff]   ;;  %v5103_v3 = vld [vmem:[%s6251_s1 + $0x24] ss:$16 sps:$4 sm:$0xff]   ;;  %v5113_v6 = vld [vmem:[%s6251_s1 + $0xc] ss:$16 sps:$4 sm:$0xff]  }
  0x28   :  { %206 = vmatprep.subr.bf16.mxu0 %v5100_v1  ;;  %v5105_v4 = vld [vmem:[%s6251_s1 + $0x20] ss:$16 sps:$4 sm:$0xff]   ;;  %v5115_v7 = vld [vmem:[%s6251_s1 + $0x8] ss:$16 sps:$4 sm:$0xff]   ;;  %319 = vmatprep.subr.bf16.mxu1 %v5113_v6  ;;  %v5117_v9 = vld [vmem:[%s6251_s1 + $0x2c] ss:$16 sps:$4 sm:$0xff]  }
  0x29   :  { %207 = vmatpush1.bf16.msra.mxu0 %v5102_v2  ;;  %v5106_v5 = vld [vmem:[%s6250_s0] sm:$0xff]   ;;  %v5107_v8 = vld [vmem:[%s6250_s0 + $0x8] sm:$0xff]   ;;  %320 = vmatpush1.bf16.msra.mxu1 %v5115_v7  ;;  %v5108_v34 = vld [vmem:[%s6250_s0 + $0x10] sm:$0xff]   ;;  %vm4205_vm1 = vcmask 15360  }
  0x2a   :  { %208 = vmatprep.subr.bf16.mxu0 %v5103_v3  ;;  %v5119_v10 = vld [vmem:[%s6251_s1 + $0x28] ss:$16 sps:$4 sm:$0xff]   ;;  %v528_v11 = vld [vmem:[#allocation2] sm:$0xff]  ;;  %321 = vmatprep.subr.bf16.mxu1 %v5117_v9 }
  0x2b   :  { %v532_v12 = vld [vmem:[#allocation2 + $0x20] sm:$0xff]  ;;  %v529_v15 = vld [vmem:[#allocation2 + $0x8] sm:$0xff]  ;;  %v5109_v51 = vld [vmem:[%s6250_s0 + $0x18] sm:$0xff]  }
  0x2c   :  { %v4260_v13 = vcombine.low %v528_v11, %v532_v12  ;;  %v4261_v14 = vcombine.high %v528_v11, %v532_v12  ;;  %v533_v16 = vld [vmem:[#allocation2 + $0x28] sm:$0xff]  ;;  %v536_v17 = vld [vmem:[#allocation2 + $0x40] sm:$0xff] }
  0x2d   :  { %209 = vmatpush1.bf16.msra.mxu0 %v5105_v4  ;;  %v4263_v18 = vcombine.high %v529_v15, %v533_v16  ;;  %v540_v19 = vld [vmem:[#allocation2 + $0x60] sm:$0xff]  ;;  %v537_v20 = vld [vmem:[#allocation2 + $0x48] sm:$0xff]  ;;  %322 = vmatpush1.bf16.msra.mxu1 %v5119_v10  ;;  %v4262_v25 = vcombine.low %v529_v15, %v533_v16 }
  0x2e   :  { %v541_v21 = vld [vmem:[#allocation2 + $0x68] sm:$0xff]  ;;  %2106 = vmatprep.subr.bf16.mxu0 %v4261_v14  ;;  %v4269_v22 = vcombine.high %v536_v17, %v540_v19  ;;  %v544_v23 = vld [vmem:[#allocation2 + $0x80] sm:$0xff]  ;;  %v4268_v26 = vcombine.low %v536_v17, %v540_v19 }
  0x2f   :  { %v548_v24 = vld [vmem:[#allocation2 + $0xa0] sm:$0xff]  ;;  %2332 = vmatprep.subr.bf16.mxu1 %v4263_v18  ;;  %v4271_v27 = vcombine.high %v537_v20, %v541_v21  ;;  %v545_v29 = vld [vmem:[#allocation2 + $0x88] sm:$0xff]  ;;  %v4270_v31 = vcombine.low %v537_v20, %v541_v21 }
  0x30   :  { %4244 = vmatmul.mubr.msk.bf16.vlgmr.msra.gmra.mrb[0].mxu0 %vm181_vm0, %v5106_v5  ;;  %v4277_v28 = vcombine.high %v544_v23, %v548_v24  ;;  %v549_v30 = vld [vmem:[#allocation2 + $0xa8] sm:$0xff]  ;;  %4252 = vmatmul.mubr.msk.bf16.vlgmr.msra.gmra.mrb[0].mxu1 %vm181_vm0, %v5106_v5  ;;  %v552_v32 = vld [vmem:[#allocation2 + $0xc0] sm:$0xff]  ;;  %v4276_v36 = vcombine.low %v544_v23, %v548_v24 }
  0x31   :  { %248 = vmatprep.mubr.bf16.mxu0 %v5302_v0  ;;  %2107 = vmatpush1.bf16.msra.mxu0 %v4260_v13  ;;  %v556_v33 = vld [vmem:[#allocation2 + $0xe0] sm:$0xff]  ;;  %v4279_v35 = vcombine.high %v545_v29, %v549_v30  ;;  %v553_v37 = vld [vmem:[#allocation2 + $0xc8] sm:$0xff]  ;;  %v4278_v40 = vcombine.low %v545_v29, %v549_v30 }
  0x32   :  { %2108 = vmatprep.subr.bf16.mxu0 %v4269_v22  ;;  %361 = vmatprep.mubr.bf16.mxu1 %v5302_v0  ;;  %v557_v38 = vld [vmem:[#allocation2 + $0xe8] sm:$0xff]  ;;  %v4285_v39 = vcombine.high %v552_v32, %v556_v33  ;;  %v560_v41 = vld [vmem:[#allocation2 + $0x100] sm:$0xff]  ;;  %v4284_v44 = vcombine.low %v552_v32, %v556_v33 }
  0x33   :  { %2333 = vmatpush1.bf16.msra.mxu1 %v4262_v25  ;;  %v564_v42 = vld [vmem:[#allocation2 + $0x120] sm:$0xff]  ;;  %v4287_v43 = vcombine.high %v553_v37, %v557_v38  ;;  %v561_v45 = vld [vmem:[#allocation2 + $0x108] sm:$0xff]  ;;  %v4286_v48 = vcombine.low %v553_v37, %v557_v38  ;;  %v5112_v37 = vld [vmem:[%s6250_s0 + $0x30] sm:$0xff]  }
  0x34   :  { %2334 = vmatprep.subr.bf16.mxu1 %v4271_v27  ;;  %v565_v46 = vld [vmem:[#allocation2 + $0x128] sm:$0xff]  ;;  %v4293_v47 = vcombine.high %v560_v41, %v564_v42  ;;  %v568_v49 = vld [vmem:[#allocation2 + $0x140] sm:$0xff]  ;;  %v4292_v53 = vcombine.low %v560_v41, %v564_v42 }
  0x35   :  { %2109 = vmatpush1.bf16.msra.mxu0 %v4268_v26  ;;  %v572_v50 = vld [vmem:[#allocation2 + $0x160] sm:$0xff]  ;;  %v4295_v52 = vcombine.high %v561_v45, %v565_v46  ;;  %v569_v54 = vld [vmem:[#allocation2 + $0x148] sm:$0xff]  ;;  %v4294_v59 = vcombine.low %v561_v45, %v565_v46 }
  0x36   :  { %2110 = vmatprep.subr.bf16.mxu0 %v4277_v28  ;;  %v573_v55 = vld [vmem:[#allocation2 + $0x168] sm:$0xff]  ;;  %v576_v56 = vld [vmem:[#allocation2 + $0x180] sm:$0xff]  ;;  %v4301_v57 = vcombine.high %v568_v49, %v572_v50  ;;  %v4300_v63 = vcombine.low %v568_v49, %v572_v50 }
  0x37   :  { %2335 = vmatpush1.bf16.msra.mxu1 %v4270_v31  ;;  %v580_v58 = vld [vmem:[#allocation2 + $0x1a0] sm:$0xff]  ;;  %v577_v60 = vld [vmem:[#allocation2 + $0x188] sm:$0xff]  ;;  %v4303_v62 = vcombine.high %v569_v54, %v573_v55  ;;  %v4302_v5 = vcombine.low %v569_v54, %v573_v55  ;;  %v5116_v54 = vld [vmem:[%s6250_s0 + $0x38] sm:$0xff]  }
  0x38   :  { %4245 = vmatmul.mubr.msk.bf16.gmra.mrb[4].mxu0 %vm181_vm0, %v5107_v8  ;;  %2336 = vmatprep.subr.bf16.mxu1 %v4279_v35  ;;  %v581_v61 = vld [vmem:[#allocation2 + $0x1a8] sm:$0xff]  ;;  %v584_v1 = vld [vmem:[#allocation2 + $0x1c0] sm:$0xff]  ;;  %v4309_v4 = vcombine.high %v576_v56, %v580_v58  ;;  %v4308_v9 = vcombine.low %v576_v56, %v580_v58 }
  0x39   :  { %258 = vmatprep.mubr.bf16.mxu0 %v5302_v0  ;;  %2111 = vmatpush1.bf16.msra.mxu0 %v4276_v36  ;;  %v588_v2 = vld [vmem:[#allocation2 + $0x1e0] sm:$0xff]  ;;  %v585_v6 = vld [vmem:[#allocation2 + $0x1c8] sm:$0xff]  ;;  %v4310_v13 = vcombine.low %v577_v60, %v581_v61 }
  0x3a   :  { %4253 = vmatmul.mubr.msk.bf16.gmra.mrb[4].mxu1 %vm181_vm0, %v5107_v8  ;;  %2112 = vmatprep.subr.bf16.mxu0 %v4285_v39  ;;  %v5110_v3 = vld [vmem:[%s6250_s0 + $0x20] sm:$0xff]   ;;  %v589_v7 = vld [vmem:[#allocation2 + $0x1e8] sm:$0xff]  ;;  %v4311_v8 = vcombine.high %v577_v60, %v581_v61  ;;  %v4317_v12 = vcombine.high %v584_v1, %v588_v2  ;;  %v4316_v17 = vcombine.low %v584_v1, %v588_v2 }
  0x3b   :  { %371 = vmatprep.mubr.bf16.mxu1 %v5302_v0  ;;  %2337 = vmatpush1.bf16.msra.mxu1 %v4278_v40  ;;  %v592_v10 = vld [vmem:[#allocation2 + $0x200] sm:$0xff]  ;;  %v593_v14 = vld [vmem:[#allocation2 + $0x208] sm:$0xff]  ;;  %v4319_v16 = vcombine.high %v585_v6, %v589_v7  ;;  %v4318_v22 = vcombine.low %v585_v6, %v589_v7 }
  0x3c   :  { %2338 = vmatprep.subr.bf16.mxu1 %v4287_v43  ;;  %v596_v11 = vld [vmem:[#allocation2 + $0x220] sm:$0xff]  ;;  %v597_v15 = vld [vmem:[#allocation2 + $0x228] sm:$0xff] }
  0x3d   :  { %2113 = vmatpush1.bf16.msra.mxu0 %v4284_v44  ;;  %v600_v18 = vld [vmem:[#allocation2 + $0x240] sm:$0xff]  ;;  %v5111_v20 = vld [vmem:[%s6250_s0 + $0x28] sm:$0xff]   ;;  %v4325_v21 = vcombine.high %v592_v10, %v596_v11  ;;  %v4327_v25 = vcombine.high %v593_v14, %v597_v15  ;;  %v4324_v26 = vcombine.low %v592_v10, %v596_v11  ;;  %v4326_v30 = vcombine.low %v593_v14, %v597_v15 }
  0x3e   :  { %2114 = vmatprep.subr.bf16.mxu0 %v4293_v47  ;;  %v604_v19 = vld [vmem:[#allocation2 + $0x260] sm:$0xff]  ;;  %v601_v23 = vld [vmem:[#allocation2 + $0x248] sm:$0xff] }
  0x3f   :  { %2339 = vmatpush1.bf16.msra.mxu1 %v4286_v48  ;;  %v605_v24 = vld [vmem:[#allocation2 + $0x268] sm:$0xff]  ;;  %v608_v27 = vld [vmem:[#allocation2 + $0x280] sm:$0xff]  ;;  %v4333_v29 = vcombine.high %v600_v18, %v604_v19 }
  0x40   :  { %4246 = vmatmul.mubr.msk.bf16.gmra.mrb[8].mxu0 %vm181_vm0, %v5108_v34  ;;  %2340 = vmatprep.subr.bf16.mxu1 %v4295_v52  ;;  %v612_v28 = vld [vmem:[#allocation2 + $0x2a0] sm:$0xff]  ;;  %v609_v31 = vld [vmem:[#allocation2 + $0x288] sm:$0xff]  ;;  %v4335_v33 = vcombine.high %v601_v23, %v605_v24  ;;  %v4334_v39 = vcombine.low %v601_v23, %v605_v24 }
  0x41   :  { %268 = vmatprep.mubr.bf16.mxu0 %v5302_v0  ;;  %2115 = vmatpush1.bf16.msra.mxu0 %v4292_v53  ;;  %v613_v32 = vld [vmem:[#allocation2 + $0x2a8] sm:$0xff]  ;;  %v616_v35 = vld [vmem:[#allocation2 + $0x2c0] sm:$0xff]  ;;  %v4341_v38 = vcombine.high %v608_v27, %v612_v28  ;;  %v4340_v43 = vcombine.low %v608_v27, %v612_v28 }
  0x42   :  { %4254 = vmatmul.mubr.msk.bf16.gmra.mrb[8].mxu1 %vm181_vm0, %v5108_v34  ;;  %2116 = vmatprep.subr.bf16.mxu0 %v4301_v57  ;;  %v4332_v34 = vcombine.low %v600_v18, %v604_v19  ;;  %v620_v36 = vld [vmem:[#allocation2 + $0x2e0] sm:$0xff]  ;;  %v617_v40 = vld [vmem:[#allocation2 + $0x2c8] sm:$0xff]  ;;  %v4343_v42 = vcombine.high %v609_v31, %v613_v32  ;;  %v4342_v47 = vcombine.low %v609_v31, %v613_v32 }
  0x43   :  { %381 = vmatprep.mubr.bf16.mxu1 %v5302_v0  ;;  %2341 = vmatpush1.bf16.msra.mxu1 %v4294_v59  ;;  %v621_v41 = vld [vmem:[#allocation2 + $0x2e8] sm:$0xff]  ;;  %v624_v44 = vld [vmem:[#allocation2 + $0x300] sm:$0xff]  ;;  %v4349_v46 = vcombine.high %v616_v35, %v620_v36 }
  0x44   :  { %2342 = vmatprep.subr.bf16.mxu1 %v4303_v62  ;;  %v628_v45 = vld [vmem:[#allocation2 + $0x320] sm:$0xff]  ;;  %v625_v48 = vld [vmem:[#allocation2 + $0x308] sm:$0xff]  ;;  %v4351_v50 = vcombine.high %v617_v40, %v621_v41  ;;  %v4350_v56 = vcombine.low %v617_v40, %v621_v41 }
  0x45   :  { %2117 = vmatpush1.bf16.msra.mxu0 %v4300_v63  ;;  %v629_v49 = vld [vmem:[#allocation2 + $0x328] sm:$0xff]  ;;  %v632_v52 = vld [vmem:[#allocation2 + $0x340] sm:$0xff]  ;;  %v4357_v55 = vcombine.high %v624_v44, %v628_v45  ;;  %v4356_v60 = vcombine.low %v624_v44, %v628_v45 }
  0x46   :  { %2118 = vmatprep.subr.bf16.mxu0 %v4309_v4  ;;  %v636_v53 = vld [vmem:[#allocation2 + $0x360] sm:$0xff]  ;;  %v633_v57 = vld [vmem:[#allocation2 + $0x348] sm:$0xff]  ;;  %v4359_v59 = vcombine.high %v625_v48, %v629_v49  ;;  %v4358_v62 = vcombine.low %v625_v48, %v629_v49 }
  0x47   :  { %2343 = vmatpush1.bf16.msra.mxu1 %v4302_v5  ;;  %v637_v58 = vld [vmem:[#allocation2 + $0x368] sm:$0xff]  ;;  %v4365_v61 = vcombine.high %v632_v52, %v636_v53  ;;  %v4364_v1 = vcombine.low %v632_v52, %v636_v53  ;;  %v644_v4 = vld [vmem:[#allocation2 + $0x3a0] sm:$0xff] }
  0x48   :  { %4247 = vmatmul.mubr.msk.bf16.gmra.mrb[12].mxu0 %vm181_vm0, %v5109_v51  ;;  %2344 = vmatprep.subr.bf16.mxu1 %v4311_v8  ;;  %v4367_v63 = vcombine.high %v633_v57, %v637_v58  ;;  %v4366_v2 = vcombine.low %v633_v57, %v637_v58  ;;  %v641_v5 = vld [vmem:[#allocation2 + $0x388] sm:$0xff]  ;;  %v648_v11 = vld [vmem:[#allocation2 + $0x3c0] sm:$0xff] }
  0x49   :  { %278 = vmatprep.mubr.bf16.mxu0 %v5302_v0  ;;  %2119 = vmatpush1.bf16.msra.mxu0 %v4308_v9  ;;  %v645_v7 = vld [vmem:[#allocation2 + $0x3a8] sm:$0xff]  ;;  %v5447_v18 = vld [vmem:[#allocation2 + $0x400] sm:$0xff] }
  0x4a   :  { %4255 = vmatmul.mubr.msk.bf16.gmra.mrb[12].mxu1 %vm181_vm0, %v5109_v51  ;;  %2120 = vmatprep.subr.bf16.mxu0 %v4317_v12  ;;  %v4348_v51 = vcombine.low %v616_v35, %v620_v36  ;;  %v4374_v9 = vcombine.low %v641_v5, %v645_v7  ;;  %v4375_v10 = vcombine.high %v641_v5, %v645_v7  ;;  %v649_v12 = vld [vmem:[#allocation2 + $0x3c8] sm:$0xff]  ;;  %v5449_v19 = vld [vmem:[#allocation2 + $0x420] sm:$0xff] }
  0x4b   :  { %391 = vmatprep.mubr.bf16.mxu1 %v5302_v0  ;;  %2345 = vmatpush1.bf16.msra.mxu1 %v4310_v13  ;;  %v653_v14 = vld [vmem:[#allocation2 + $0x3e8] sm:$0xff]  ;;  %v4388_v23 = vcombine.low %v5447_v18, %v5449_v19  ;;  %v664_v45 = vld [vmem:[#allocation2 + $0x440] sm:$0xff] }
  0x4c   :  { %2346 = vmatprep.subr.bf16.mxu1 %v4319_v16  ;;  %v4382_v16 = vcombine.low %v649_v12, %v653_v14  ;;  %v668_v48 = vld [vmem:[#allocation2 + $0x460] sm:$0xff]  ;;  %v665_v49 = vld [vmem:[#allocation2 + $0x448] sm:$0xff] }
  0x4d   :  { %2121 = vmatpush1.bf16.msra.mxu0 %v4316_v17  ;;  %v4383_v17 = vcombine.high %v649_v12, %v653_v14 }
  0x4e   :  { %2122 = vmatprep.subr.bf16.mxu0 %v4325_v21  ;;  %v4389_v21 = vcombine.high %v5447_v18, %v5449_v19 }
  0x4f   :  { %2347 = vmatpush1.bf16.msra.mxu1 %v4318_v22  ;;  %v661_v22 = vld [vmem:[#allocation2 + $0x428] sm:$0xff] }
  0x50   :  { %4248 = vmatmul.mubr.msk.bf16.gmra.mrb[16].mxu0 %vm181_vm0, %v5110_v3  ;;  %2348 = vmatprep.subr.bf16.mxu1 %v4327_v25 }
  0x51   :  { %288 = vmatprep.mubr.bf16.mxu0 %v5302_v0  ;;  %2123 = vmatpush1.bf16.msra.mxu0 %v4324_v26  ;;  %v81_v26 = vlaneseq }
  0x52   :  { %4256 = vmatmul.mubr.msk.bf16.gmra.mrb[16].mxu1 %vm181_vm0, %v5110_v3  ;;  %2124 = vmatprep.subr.bf16.mxu0 %v4333_v29  ;;  %v640_v3 = vld [vmem:[#allocation2 + $0x380] sm:$0xff] }
  0x53   :  { %401 = vmatprep.mubr.bf16.mxu1 %v5302_v0  ;;  %2349 = vmatpush1.bf16.msra.mxu1 %v4326_v30  ;;  %v4373_v6 = vcombine.high %v640_v3, %v644_v4  ;;  %v4372_v8 = vcombine.low %v640_v3, %v644_v4  ;;  %v5459_v27 = vshrl.u32 %v81_v26, 7  ;;  %v79_v29 = vld [vmem:[%s6252_s2] sm:$0xf]  ;;  %v4396_v3 = vcombine.low %v664_v45, %v668_v48 }
  0x54   :  { %2350 = vmatprep.subr.bf16.mxu1 %v4335_v33 }
  0x55   :  { %2125 = vmatpush1.bf16.msra.mxu0 %v4332_v34  ;;  %v83_v28 = vsub.s32 0, %v5459_v27  ;;  %v87_v30 = vsub.s32 1, %v5459_v27  ;;  %v91_v40 = vsub.s32 2, %v5459_v27 }
  0x56   :  { %2126 = vmatprep.subr.bf16.mxu0 %v4341_v38 }
  0x57   :  { %2351 = vmatpush1.bf16.msra.mxu1 %v4334_v39  ;;  %v5468_v31 = vrot.slane %v79_v29, %v83_v28  ;;  %v5472_v32 = vrot.slane %v79_v29, %v87_v30  ;;  %v5484_v52 = vrot.slane %v79_v29, %v91_v40 }
  0x58   :  { %4249 = vmatmul.mubr.msk.bf16.gmra.mrb[20].mxu0 %vm181_vm0, %v5111_v20  ;;  %2352 = vmatprep.subr.bf16.mxu1 %v4343_v42  ;;  %v6258_v42 = vsub.s32 3, %v5459_v27 }
  0x59   :  { %298 = vmatprep.mubr.bf16.mxu0 %v5302_v0  ;;  %2127 = vmatpush1.bf16.msra.mxu0 %v4340_v43 }
  0x5a   :  { %4257 = vmatmul.mubr.msk.bf16.gmra.mrb[20].mxu1 %vm181_vm0, %v5111_v20  ;;  %2128 = vmatprep.subr.bf16.mxu0 %v4349_v46  ;;  %v5451_v20 = vld [vmem:[#allocation2 + $0x408] sm:$0xff]  ;;  %v5494_v57 = vrot.slane %v79_v29, %v6258_v42 }
  0x5b   :  { %411 = vmatprep.mubr.bf16.mxu1 %v5302_v0  ;;  %2353 = vmatpush1.bf16.msra.mxu1 %v4342_v47  ;;  %v4390_v24 = vcombine.low %v5451_v20, %v661_v22  ;;  %v4391_v25 = vcombine.high %v5451_v20, %v661_v22 }
  0x5c   :  { %2354 = vmatprep.subr.bf16.mxu1 %v4351_v50  ;;  %v669_v50 = vld [vmem:[#allocation2 + $0x468] sm:$0xff] }
  0x5d   :  { %2129 = vmatpush1.bf16.msra.mxu0 %v4348_v51  ;;  %v4398_v4 = vcombine.low %v665_v49, %v669_v50 }
  0x5e   :  { %2130 = vmatprep.subr.bf16.mxu0 %v4357_v55  ;;  %v5488_v55 = vld [vmem:[#allocation2 + $0x480] sm:$0xff] }
  0x5f   :  { %2355 = vmatpush1.bf16.msra.mxu1 %v4350_v56  ;;  %v5490_v56 = vld [vmem:[#allocation2 + $0x4a0] sm:$0xff] }
  0x60   :  { %4250 = vmatmul.mubr.msk.bf16.gmra.mrb[24].mxu0 %vm181_vm0, %v5112_v37  ;;  %2356 = vmatprep.subr.bf16.mxu1 %v4359_v59 }
  0x61   :  { %308 = vmatprep.mubr.bf16.mxu0 %v5302_v0  ;;  %2131 = vmatpush1.bf16.msra.mxu0 %v4356_v60  ;;  %v4397_v60 = vcombine.high %v664_v45, %v668_v48  ;;  %v5543_v48 = vld [vmem:[#allocation2 + $0x508] sm:$0xff] }
  0x62   :  { %4258 = vmatmul.mubr.msk.bf16.gmra.mrb[24].mxu1 %vm181_vm0, %v5112_v37  ;;  %2132 = vmatprep.subr.bf16.mxu0 %v4365_v61  ;;  %v4399_v61 = vcombine.high %v665_v49, %v669_v50  ;;  %v5545_v49 = vld [vmem:[#allocation2 + $0x528] sm:$0xff] }
  0x63   :  { %421 = vmatprep.mubr.bf16.mxu1 %v5302_v0  ;;  %2357 = vmatpush1.bf16.msra.mxu1 %v4358_v62  ;;  %v652_v0 = vld [vmem:[#allocation2 + $0x3e0] sm:$0xff]  ;;  %v5497_v62 = vld [vmem:[#allocation2 + $0x488] sm:$0xff] }
  0x64   :  { %2358 = vmatprep.subr.bf16.mxu1 %v4367_v63  ;;  %v4381_v13 = vcombine.high %v648_v11, %v652_v0  ;;  %v4380_v15 = vcombine.low %v648_v11, %v652_v0  ;;  %v5499_v63 = vld [vmem:[#allocation2 + $0x4a8] sm:$0xff] }
  0x65   :  { %2133 = vmatpush1.bf16.msra.mxu0 %v4364_v1  ;;  %v4407_v0 = vcombine.high %v5497_v62, %v5499_v63 }
  0x66   :  { %2134 = vmatprep.subr.bf16.mxu0 %v4373_v6 }
  0x67   :  { %2359 = vmatpush1.bf16.msra.mxu1 %v4366_v2 }
  0x68   :  { %4251 = vmatmul.mubr.msk.bf16.gmra.mrb[28].mxu0 %vm181_vm0, %v5116_v54  ;;  %2360 = vmatprep.subr.bf16.mxu1 %v4375_v10 }
  0x69   :  { %2135 = vmatpush1.bf16.msra.mxu0 %v4372_v8  ;;  %v4405_v8 = vcombine.high %v5488_v55, %v5490_v56 }
  0x6a   :  { %4259 = vmatmul.mubr.msk.bf16.gmra.mrb[28].mxu1 %vm181_vm0, %v5116_v54  ;;  %2136 = vmatprep.subr.bf16.mxu0 %v4381_v13 }
  0x6b   :  { %2361 = vmatpush1.bf16.msra.mxu1 %v4374_v9 }
  0x6c   :  { %2362 = vmatprep.subr.bf16.mxu1 %v4383_v17  ;;  %v5516_v17 = vld [vmem:[#allocation2 + $0x4e0] sm:$0xff] }
  0x6d   :  { %2137 = vmatpush1.bf16.msra.mxu0 %v4380_v15 }
  0x6e   :  { %2219 = vmatprep.subr.bf16.mxu0 %v4389_v21 }
  0x6f   :  { %2363 = vmatpush1.bf16.msra.mxu1 %v4382_v16  ;;  %v5514_v16 = vld [vmem:[#allocation2 + $0x4c0] sm:$0xff] }
  0x70   :  { %2445 = vmatprep.subr.bf16.mxu1 %v4391_v25 }
 0x103   :  { %v240_v33 = vpop.f32.mrb[0].mxu0  ;;  %v353_v5 = vpop.f32.mrb[0].mxu1 }
 0x104   :  { %v241_v34 = vadd.f32 %v240_v33, %v5468_v31  ;;  %v242_v35 = vpop.f32.mrb[1].mxu0  ;;  %v354_v9 = vadd.f32 %v353_v5, %v5484_v52  ;;  %v355_v10 = vpop.f32.mrb[1].mxu1  ;;  %v4404_v33 = vcombine.low %v5488_v55, %v5490_v56 }
 0x105   :  { %v243_v36 = vadd.f32 %v242_v35, %v5472_v32  ;;  %v244_v37 = vpop.f32.mrb[2].mxu0  ;;  %v356_v12 = vadd.f32 %v355_v10, %v5494_v57  ;;  %v357_v13 = vpop.f32.mrb[2].mxu1 }
 0x106   :  { %v245_v38 = vadd.f32 %v244_v37, %v5468_v31  ;;  %v246_v39 = vpop.f32.mrb[3].mxu0  ;;  %v432_v43 = vmax.f32 %v241_v34, 0.0  ;;  %v434_v18 = vmax.f32 %v354_v9, 0.0  ;;  %v358_v19 = vadd.f32 %v357_v13, %v5484_v52  ;;  %v359_v20 = vpop.f32.mrb[3].mxu1  ;;  %v5568_v9 = vld [vmem:[#allocation2 + $0x560] sm:$0xff] }
 0x107   :  { %v247_v41 = vadd.f32 %v246_v39, %v5472_v32  ;;  %v433_v46 = vmax.f32 %v243_v36, 0.0  ;;  %v435_v25 = vmax.f32 %v356_v12, 0.0  ;;  %v360_v26 = vadd.f32 %v359_v20, %v5494_v57 }
 0x108   :  { %v436_v44 = vmax.f32 %v245_v38, 0.0  ;;  %v4406_v34 = vcombine.low %v5497_v62, %v5499_v63  ;;  %v438_v35 = vmax.f32 %v358_v19, 0.0  ;;  %v4412_v38 = vcombine.low %v5514_v16, %v5516_v17 }
 0x109   :  { %v437_v47 = vmax.f32 %v247_v41, 0.0  ;;  %v4413_v39 = vcombine.high %v5514_v16, %v5516_v17  ;;  %v5536_v41 = vld [vmem:[#allocation2 + $0x500] sm:$0xff]  ;;  %v4422_v20 = vcombine.low %v5543_v48, %v5545_v49 }
 0x10a   :  { %v5480_v51 = vpack.c.bf16 %v436_v44, %v432_v43  ;;  %v5538_v43 = vld [vmem:[#allocation2 + $0x520] sm:$0xff]  ;;  %v439_v44 = vmax.f32 %v360_v26, 0.0  ;;  %v5547_v50 = vpack.c.bf16 %v438_v35, %v434_v18 }
 0x10b   :  { %v5486_v53 = vpack.c.bf16 %v437_v47, %v433_v46  ;;  %v250_v54 = vpop.f32.mrb[4].mxu0  ;;  %v4421_v62 = vcombine.high %v5536_v41, %v5538_v43  ;;  %v4420_v19 = vcombine.low %v5536_v41, %v5538_v43  ;;  %v5588_v26 = vld [vmem:[#allocation2 + $0x580] sm:$0xff]  ;;  %v5597_v41 = vld [vmem:[#allocation2 + $0x5a8] sm:$0xff] }
 0x10c   :  { %v251_v58 = vadd.f32 %v250_v54, %v5468_v31  ;;  %v252_v59 = vpop.f32.mrb[5].mxu0 }
 0x10d   :  { %v253_v1 = vadd.f32 %v252_v59, %v5472_v32  ;;  %v254_v2 = vpop.f32.mrb[6].mxu0  ;;  %2138 = vmatprep.mubr.bf16.mxu0 %v5486_v53  ;;  %2364 = vmatprep.mubr.bf16.mxu1 %v5486_v53  ;;  %v363_v59 = vpop.f32.mrb[4].mxu1 }
 0x10e   :  { %v255_v6 = vadd.f32 %v254_v2, %v5468_v31  ;;  %v256_v7 = vpop.f32.mrb[7].mxu0  ;;  %2139 = vmatmul.mubr.bf16.vlgmr.msra.gmra.mrb[32].mxu0 %v5480_v51  ;;  %2365 = vmatmul.mubr.bf16.vlgmr.msra.gmra.mrb[32].mxu1 %v5480_v51  ;;  %v440_v14 = vmax.f32 %v251_v58, 0.0  ;;  %v5554_v58 = vpack.c.bf16 %v439_v44, %v435_v25  ;;  %v364_v63 = vadd.f32 %v363_v59, %v5484_v52 }
 0x10f   :  { %v257_v11 = vadd.f32 %v256_v7, %v5472_v32  ;;  %2220 = vmatpush1.bf16.msra.mxu0 %v4388_v23  ;;  %2446 = vmatpush1.bf16.msra.mxu1 %v4390_v24  ;;  %v441_v21 = vmax.f32 %v253_v1, 0.0  ;;  %v5519_v23 = vld [vmem:[#allocation2 + $0x4c8] sm:$0xff]  ;;  %v365_v1 = vpop.f32.mrb[5].mxu1 }
 0x110   :  { %v444_v15 = vmax.f32 %v255_v6, 0.0  ;;  %2221 = vmatprep.subr.bf16.mxu0 %v4397_v60  ;;  %2447 = vmatprep.subr.bf16.mxu1 %v4399_v61  ;;  %v5521_v24 = vld [vmem:[#allocation2 + $0x4e8] sm:$0xff]  ;;  %v367_v5 = vpop.f32.mrb[6].mxu1  ;;  %v442_v10 = vmax.f32 %v364_v63, 0.0 }
 0x111   :  { %v445_v22 = vmax.f32 %v257_v11, 0.0  ;;  %v4415_v47 = vcombine.high %v5519_v23, %v5521_v24  ;;  %v4414_v56 = vcombine.low %v5519_v23, %v5521_v24  ;;  %v368_v11 = vadd.f32 %v367_v5, %v5484_v52 }
 0x112   :  { %v5524_v29 = vpack.c.bf16 %v444_v15, %v440_v14  ;;  %v5571_v14 = vld [vmem:[#allocation2 + $0x548] sm:$0xff] }
 0x113   :  { %v5530_v36 = vpack.c.bf16 %v445_v22, %v441_v21  ;;  %2222 = vmatpush1.bf16.msra.mxu0 %v4396_v3  ;;  %v260_v37 = vpop.f32.mrb[8].mxu0  ;;  %2448 = vmatpush1.bf16.msra.mxu1 %v4398_v4  ;;  %v4423_v3 = vcombine.high %v5543_v48, %v5545_v49  ;;  %v366_v4 = vadd.f32 %v365_v1, %v5494_v57  ;;  %v5573_v15 = vld [vmem:[#allocation2 + $0x568] sm:$0xff]  ;;  %v446_v21 = vmax.f32 %v368_v11, 0.0 }
 0x114   :  { %v261_v45 = vadd.f32 %v260_v37, %v5468_v31  ;;  %v262_v46 = vpop.f32.mrb[9].mxu0  ;;  %2223 = vmatprep.subr.bf16.mxu0 %v4405_v8  ;;  %2449 = vmatprep.subr.bf16.mxu1 %v4407_v0  ;;  %v5566_v8 = vld [vmem:[#allocation2 + $0x540] sm:$0xff]  ;;  %v369_v0 = vpop.f32.mrb[7].mxu1  ;;  %v5625_v11 = vld [vmem:[#allocation2 + $0x5e8] sm:$0xff] }
 0x115   :  { %v263_v54 = vadd.f32 %v262_v46, %v5472_v32  ;;  %v264_v55 = vpop.f32.mrb[10].mxu0  ;;  %2148 = vmatprep.mubr.bf16.mxu0 %v5530_v36  ;;  %2374 = vmatprep.mubr.bf16.mxu1 %v5530_v36  ;;  %v443_v16 = vmax.f32 %v366_v4, 0.0  ;;  %v370_v17 = vadd.f32 %v369_v0, %v5494_v57  ;;  %v4428_v24 = vcombine.low %v5566_v8, %v5568_v9  ;;  %v373_v48 = vpop.f32.mrb[8].mxu1  ;;  %v5620_v4 = vld [vmem:[#allocation2 + $0x5e0] sm:$0xff] }
 0x116   :  { %v265_v60 = vadd.f32 %v264_v55, %v5468_v31  ;;  %v266_v61 = vpop.f32.mrb[11].mxu0  ;;  %2149 = vmatmul.mubr.bf16.gmra.mrb[36].mxu0 %v5524_v29  ;;  %2375 = vmatmul.mubr.bf16.gmra.mrb[36].mxu1 %v5524_v29  ;;  %v448_v6 = vmax.f32 %v261_v45, 0.0  ;;  %v4429_v25 = vcombine.high %v5566_v8, %v5568_v9  ;;  %v5599_v43 = vpack.c.bf16 %v446_v21, %v442_v10  ;;  %v375_v59 = vpop.f32.mrb[9].mxu1  ;;  %v5623_v10 = vld [vmem:[#allocation2 + $0x5c8] sm:$0xff] }
 0x117   :  { %v267_v2 = vadd.f32 %v266_v61, %v5472_v32  ;;  %2224 = vmatpush1.bf16.msra.mxu0 %v4404_v33  ;;  %2450 = vmatpush1.bf16.msra.mxu1 %v4406_v34  ;;  %v449_v12 = vmax.f32 %v263_v54, 0.0  ;;  %v5590_v33 = vld [vmem:[#allocation2 + $0x5a0] sm:$0xff]  ;;  %v447_v34 = vmax.f32 %v370_v17, 0.0  ;;  %v4430_v46 = vcombine.low %v5571_v14, %v5573_v15  ;;  %v377_v63 = vpop.f32.mrb[10].mxu1 }
 0x118   :  { %v452_v7 = vmax.f32 %v265_v60, 0.0  ;;  %2225 = vmatprep.subr.bf16.mxu0 %v4413_v39  ;;  %2451 = vmatprep.subr.bf16.mxu1 %v4415_v47  ;;  %v5595_v39 = vld [vmem:[#allocation2 + $0x588] sm:$0xff]  ;;  %v4437_v55 = vcombine.high %v5588_v26, %v5590_v33 }
 0x119   :  { %v453_v13 = vmax.f32 %v267_v2, 0.0  ;;  %v5606_v47 = vpack.c.bf16 %v447_v34, %v443_v16  ;;  %v4439_v61 = vcombine.high %v5595_v39, %v5597_v41 }
 0x11a   :  { %v5576_v18 = vpack.c.bf16 %v452_v7, %v448_v6  ;;  %v378_v6 = vadd.f32 %v377_v63, %v5484_v52  ;;  %v379_v7 = vpop.f32.mrb[11].mxu1 }
 0x11b   :  { %v5582_v22 = vpack.c.bf16 %v453_v13, %v449_v12  ;;  %2226 = vmatpush1.bf16.msra.mxu0 %v4412_v38  ;;  %v270_v23 = vpop.f32.mrb[12].mxu0  ;;  %2452 = vmatpush1.bf16.msra.mxu1 %v4414_v56  ;;  %v4431_v38 = vcombine.high %v5571_v14, %v5573_v15  ;;  %v374_v56 = vadd.f32 %v373_v48, %v5484_v52 }
 0x11c   :  { %v271_v35 = vadd.f32 %v270_v23, %v5468_v31  ;;  %v272_v37 = vpop.f32.mrb[13].mxu0  ;;  %2227 = vmatprep.subr.bf16.mxu0 %v4421_v62  ;;  %2453 = vmatprep.subr.bf16.mxu1 %v4423_v3  ;;  %v376_v62 = vadd.f32 %v375_v59, %v5494_v57  ;;  %v5618_v3 = vld [vmem:[#allocation2 + $0x5c0] sm:$0xff]  ;;  %v380_v12 = vadd.f32 %v379_v7, %v5494_v57  ;;  %v454_v16 = vmax.f32 %v378_v6, 0.0 }
 0x11d   :  { %v273_v44 = vadd.f32 %v272_v37, %v5472_v32  ;;  %v274_v45 = vpop.f32.mrb[14].mxu0  ;;  %2158 = vmatprep.mubr.bf16.mxu0 %v5582_v22  ;;  %2384 = vmatprep.mubr.bf16.mxu1 %v5582_v22  ;;  %v450_v5 = vmax.f32 %v374_v56, 0.0  ;;  %v4436_v14 = vcombine.low %v5588_v26, %v5590_v33  ;;  %v4438_v15 = vcombine.low %v5595_v39, %v5597_v41  ;;  %v5640_v23 = vld [vmem:[#allocation2 + $0x600] sm:$0xff]  ;;  %v5649_v37 = vld [vmem:[#allocation2 + $0x628] sm:$0xff] }
 0x11e   :  { %v275_v49 = vadd.f32 %v274_v45, %v5468_v31  ;;  %v276_v54 = vpop.f32.mrb[15].mxu0  ;;  %2159 = vmatmul.mubr.bf16.gmra.mrb[40].mxu0 %v5576_v18  ;;  %2385 = vmatmul.mubr.bf16.gmra.mrb[40].mxu1 %v5576_v18  ;;  %v456_v1 = vmax.f32 %v271_v35, 0.0  ;;  %v451_v0 = vmax.f32 %v376_v62, 0.0  ;;  %v4445_v21 = vcombine.high %v5618_v3, %v5620_v4  ;;  %v5647_v35 = vld [vmem:[#allocation2 + $0x608] sm:$0xff] }
 0x11f   :  { %v277_v60 = vadd.f32 %v276_v54, %v5472_v32  ;;  %2228 = vmatpush1.bf16.msra.mxu0 %v4420_v19  ;;  %2454 = vmatpush1.bf16.msra.mxu1 %v4422_v20  ;;  %v457_v8 = vmax.f32 %v273_v44, 0.0  ;;  %v4444_v20 = vcombine.low %v5618_v3, %v5620_v4  ;;  %v455_v26 = vmax.f32 %v380_v12, 0.0  ;;  %v5672_v3 = vld [vmem:[#allocation2 + $0x660] sm:$0xff] }
 0x120   :  { %v460_v2 = vmax.f32 %v275_v49, 0.0  ;;  %2229 = vmatprep.subr.bf16.mxu0 %v4429_v25  ;;  %2455 = vmatprep.subr.bf16.mxu1 %v4431_v38  ;;  %v5642_v25 = vld [vmem:[#allocation2 + $0x620] sm:$0xff]  ;;  %v5651_v38 = vpack.c.bf16 %v454_v16, %v450_v5  ;;  %v4446_v44 = vcombine.low %v5623_v10, %v5625_v11 }
 0x121   :  { %v461_v9 = vmax.f32 %v277_v60, 0.0  ;;  %v5658_v45 = vpack.c.bf16 %v455_v26, %v451_v0  ;;  %v4453_v54 = vcombine.high %v5640_v23, %v5642_v25  ;;  %v4455_v60 = vcombine.high %v5647_v35, %v5649_v37 }
 0x122   :  { %v5628_v13 = vpack.c.bf16 %v460_v2, %v456_v1  ;;  %v5670_v2 = vld [vmem:[#allocation2 + $0x640] sm:$0xff] }
 0x123   :  { %v5634_v17 = vpack.c.bf16 %v461_v9, %v457_v8  ;;  %2230 = vmatpush1.bf16.msra.mxu0 %v4428_v24  ;;  %v280_v19 = vpop.f32.mrb[16].mxu0  ;;  %2456 = vmatpush1.bf16.msra.mxu1 %v4430_v46  ;;  %v4447_v24 = vcombine.high %v5623_v10, %v5625_v11  ;;  %v383_v46 = vpop.f32.mrb[12].mxu1  ;;  %v5675_v9 = vld [vmem:[#allocation2 + $0x648] sm:$0xff]  ;;  %v4460_v26 = vcombine.low %v5670_v2, %v5672_v3 }
 0x124   :  { %v281_v33 = vadd.f32 %v280_v19, %v5468_v31  ;;  %v282_v34 = vpop.f32.mrb[17].mxu0  ;;  %2231 = vmatprep.subr.bf16.mxu0 %v4437_v55  ;;  %2457 = vmatprep.subr.bf16.mxu1 %v4439_v61  ;;  %v384_v55 = vadd.f32 %v383_v46, %v5484_v52  ;;  %v385_v56 = vpop.f32.mrb[13].mxu1  ;;  %v5677_v10 = vld [vmem:[#allocation2 + $0x668] sm:$0xff] }
 0x125   :  { %v283_v39 = vadd.f32 %v282_v34, %v5472_v32  ;;  %v284_v41 = vpop.f32.mrb[18].mxu0  ;;  %2168 = vmatprep.mubr.bf16.mxu0 %v5634_v17  ;;  %2394 = vmatprep.mubr.bf16.mxu1 %v5634_v17  ;;  %v386_v61 = vadd.f32 %v385_v56, %v5494_v57  ;;  %v387_v62 = vpop.f32.mrb[14].mxu1  ;;  %v5692_v34 = vld [vmem:[#allocation2 + $0x680] sm:$0xff] }
 0x126   :  { %v285_v48 = vadd.f32 %v284_v41, %v5468_v31  ;;  %v286_v49 = vpop.f32.mrb[19].mxu0  ;;  %2169 = vmatmul.mubr.bf16.gmra.mrb[44].mxu0 %v5628_v13  ;;  %2395 = vmatmul.mubr.bf16.gmra.mrb[44].mxu1 %v5628_v13  ;;  %v464_v63 = vmax.f32 %v281_v33, 0.0  ;;  %v458_v4 = vmax.f32 %v384_v55, 0.0  ;;  %v388_v5 = vadd.f32 %v387_v62, %v5484_v52  ;;  %v389_v6 = vpop.f32.mrb[15].mxu1 }
 0x127   :  { %v287_v59 = vadd.f32 %v286_v49, %v5472_v32  ;;  %2232 = vmatpush1.bf16.msra.mxu0 %v4436_v14  ;;  %2458 = vmatpush1.bf16.msra.mxu1 %v4438_v15  ;;  %v465_v7 = vmax.f32 %v283_v39, 0.0  ;;  %v459_v11 = vmax.f32 %v386_v61, 0.0  ;;  %v390_v0 = vadd.f32 %v389_v6, %v5494_v57  ;;  %v5701_v39 = vld [vmem:[#allocation2 + $0x6a8] sm:$0xff]  ;;  %v5724_v6 = vld [vmem:[#allocation2 + $0x6e0] sm:$0xff] }
 0x128   :  { %v468_v1 = vmax.f32 %v285_v48, 0.0  ;;  %2233 = vmatprep.subr.bf16.mxu0 %v4445_v21  ;;  %2459 = vmatprep.subr.bf16.mxu1 %v4447_v24  ;;  %v4452_v14 = vcombine.low %v5640_v23, %v5642_v25  ;;  %v4454_v15 = vcombine.low %v5647_v35, %v5649_v37  ;;  %v462_v16 = vmax.f32 %v388_v5, 0.0  ;;  %v5694_v24 = vld [vmem:[#allocation2 + $0x6a0] sm:$0xff]  ;;  %v5699_v37 = vld [vmem:[#allocation2 + $0x688] sm:$0xff] }
 0x129   :  { %v469_v8 = vmax.f32 %v287_v59, 0.0  ;;  %v4461_v33 = vcombine.high %v5670_v2, %v5672_v3  ;;  %v463_v23 = vmax.f32 %v390_v0, 0.0  ;;  %v4462_v48 = vcombine.low %v5675_v9, %v5677_v10  ;;  %v5722_v5 = vld [vmem:[#allocation2 + $0x6c0] sm:$0xff]  ;;  %v5727_v0 = vld [vmem:[#allocation2 + $0x6c8] sm:$0xff] }
 0x12a   :  { %v5680_v12 = vpack.c.bf16 %v468_v1, %v464_v63  ;;  %v5703_v41 = vpack.c.bf16 %v462_v16, %v458_v4  ;;  %v4469_v59 = vcombine.high %v5692_v34, %v5694_v24  ;;  %v4471_v63 = vcombine.high %v5699_v37, %v5701_v39 }
 0x12b   :  { %v5686_v19 = vpack.c.bf16 %v469_v8, %v465_v7  ;;  %2234 = vmatpush1.bf16.msra.mxu0 %v4444_v20  ;;  %v290_v21 = vpop.f32.mrb[20].mxu0  ;;  %2460 = vmatpush1.bf16.msra.mxu1 %v4446_v44  ;;  %v4463_v20 = vcombine.high %v5675_v9, %v5677_v10  ;;  %v5710_v49 = vpack.c.bf16 %v463_v23, %v459_v11 }
 0x12c   :  { %v291_v25 = vadd.f32 %v290_v21, %v5468_v31  ;;  %v292_v35 = vpop.f32.mrb[21].mxu0  ;;  %2235 = vmatprep.subr.bf16.mxu0 %v4453_v54  ;;  %2461 = vmatprep.subr.bf16.mxu1 %v4455_v60  ;;  %v393_v54 = vpop.f32.mrb[16].mxu1  ;;  %v4470_v23 = vcombine.low %v5699_v37, %v5701_v39  ;;  %v5751_v39 = vld [vmem:[#allocation2 + $0x708] sm:$0xff] }
 0x12d   :  { %v293_v44 = vadd.f32 %v292_v35, %v5472_v32  ;;  %v294_v46 = vpop.f32.mrb[22].mxu0  ;;  %2178 = vmatprep.mubr.bf16.mxu0 %v5686_v19  ;;  %2404 = vmatprep.mubr.bf16.mxu1 %v5686_v19  ;;  %v394_v60 = vadd.f32 %v393_v54, %v5484_v52  ;;  %v395_v61 = vpop.f32.mrb[17].mxu1  ;;  %v5744_v54 = vld [vmem:[#allocation2 + $0x700] sm:$0xff] }
 0x12e   :  { %v295_v55 = vadd.f32 %v294_v46, %v5468_v31  ;;  %v296_v56 = vpop.f32.mrb[23].mxu0  ;;  %2179 = vmatmul.mubr.bf16.gmra.mrb[48].mxu0 %v5680_v12  ;;  %2405 = vmatmul.mubr.bf16.gmra.mrb[48].mxu1 %v5680_v12  ;;  %v396_v1 = vadd.f32 %v395_v61, %v5494_v57  ;;  %v397_v2 = vpop.f32.mrb[18].mxu1  ;;  %v472_v3 = vmax.f32 %v291_v25, 0.0  ;;  %v4477_v46 = vcombine.high %v5722_v5, %v5724_v6 }
 0x12f   :  { %v297_v62 = vadd.f32 %v296_v56, %v5472_v32  ;;  %2236 = vmatpush1.bf16.msra.mxu0 %v4452_v14  ;;  %2462 = vmatpush1.bf16.msra.mxu1 %v4454_v15  ;;  %v466_v7 = vmax.f32 %v394_v60, 0.0  ;;  %v398_v8 = vadd.f32 %v397_v2, %v5484_v52  ;;  %v399_v9 = vpop.f32.mrb[19].mxu1  ;;  %v473_v10 = vmax.f32 %v293_v44, 0.0  ;;  %v5729_v14 = vld [vmem:[#allocation2 + $0x6e8] sm:$0xff] }
 0x130   :  { %v476_v4 = vmax.f32 %v295_v55, 0.0  ;;  %2237 = vmatprep.subr.bf16.mxu0 %v4461_v33  ;;  %2463 = vmatprep.subr.bf16.mxu1 %v4463_v20  ;;  %v467_v15 = vmax.f32 %v396_v1, 0.0  ;;  %v400_v16 = vadd.f32 %v399_v9, %v5494_v57  ;;  %v4468_v33 = vcombine.low %v5692_v34, %v5694_v24  ;;  %v5746_v55 = vld [vmem:[#allocation2 + $0x720] sm:$0xff] }
 0x131   :  { %v477_v11 = vmax.f32 %v297_v62, 0.0  ;;  %v470_v25 = vmax.f32 %v398_v8, 0.0  ;;  %v4476_v44 = vcombine.low %v5722_v5, %v5724_v6 }
 0x132   :  { %v5732_v21 = vpack.c.bf16 %v476_v4, %v472_v3  ;;  %v471_v34 = vmax.f32 %v400_v16, 0.0  ;;  %v4485_v3 = vcombine.high %v5744_v54, %v5746_v55 }
 0x133   :  { %v5738_v35 = vpack.c.bf16 %v477_v11, %v473_v10  ;;  %2238 = vmatpush1.bf16.msra.mxu0 %v4460_v26  ;;  %v300_v20 = vpop.f32.mrb[24].mxu0  ;;  %2464 = vmatpush1.bf16.msra.mxu1 %v4462_v48  ;;  %v4479_v26 = vcombine.high %v5727_v0, %v5729_v14  ;;  %v5753_v48 = vld [vmem:[#allocation2 + $0x728] sm:$0xff]  ;;  %v5755_v56 = vpack.c.bf16 %v470_v25, %v466_v7 }
 0x134   :  { %v301_v24 = vadd.f32 %v300_v20, %v5468_v31  ;;  %v302_v37 = vpop.f32.mrb[25].mxu0  ;;  %2239 = vmatprep.subr.bf16.mxu0 %v4469_v59  ;;  %2465 = vmatprep.subr.bf16.mxu1 %v4471_v63  ;;  %v4478_v59 = vcombine.low %v5727_v0, %v5729_v14  ;;  %v5762_v62 = vpack.c.bf16 %v471_v34, %v467_v15  ;;  %v403_v63 = vpop.f32.mrb[20].mxu1  ;;  %v5774_v0 = vld [vmem:[#allocation2 + $0x740] sm:$0xff]  ;;  %v5779_v20 = vld [vmem:[#allocation2 + $0x748] sm:$0xff] }
 0x135   :  { %v303_v60 = vadd.f32 %v302_v37, %v5472_v32  ;;  %v304_v61 = vpop.f32.mrb[26].mxu0  ;;  %2188 = vmatprep.mubr.bf16.mxu0 %v5738_v35  ;;  %2414 = vmatprep.mubr.bf16.mxu1 %v5738_v35  ;;  %v404_v4 = vadd.f32 %v403_v63, %v5484_v52  ;;  %v405_v5 = vpop.f32.mrb[21].mxu1  ;;  %v4487_v7 = vcombine.high %v5751_v39, %v5753_v48  ;;  %v5776_v14 = vld [vmem:[#allocation2 + $0x760] sm:$0xff]  ;;  %v5781_v34 = vld [vmem:[#allocation2 + $0x768] sm:$0xff] }
 0x136   :  { %v305_v1 = vadd.f32 %v304_v61, %v5468_v31  ;;  %v306_v2 = vpop.f32.mrb[27].mxu0  ;;  %2189 = vmatmul.mubr.bf16.gmra.mrb[52].mxu0 %v5732_v21  ;;  %2415 = vmatmul.mubr.bf16.gmra.mrb[52].mxu1 %v5732_v21  ;;  %v406_v8 = vadd.f32 %v405_v5, %v5494_v57  ;;  %v407_v9 = vpop.f32.mrb[22].mxu1  ;;  %v480_v10 = vmax.f32 %v301_v24, 0.0  ;;  %v5796_v5 = vld [vmem:[#allocation2 + $0x780] sm:$0xff] }
 0x137   :  { %v307_v6 = vadd.f32 %v306_v2, %v5472_v32  ;;  %2240 = vmatpush1.bf16.msra.mxu0 %v4468_v33  ;;  %2466 = vmatpush1.bf16.msra.mxu1 %v4470_v23  ;;  %v474_v15 = vmax.f32 %v404_v4, 0.0  ;;  %v408_v16 = vadd.f32 %v407_v9, %v5484_v52  ;;  %v409_v25 = vpop.f32.mrb[23].mxu1  ;;  %v481_v33 = vmax.f32 %v303_v60, 0.0 }
 0x138   :  { %v484_v11 = vmax.f32 %v305_v1, 0.0  ;;  %2241 = vmatprep.subr.bf16.mxu0 %v4477_v46  ;;  %2467 = vmatprep.subr.bf16.mxu1 %v4479_v26  ;;  %v475_v37 = vmax.f32 %v406_v8, 0.0  ;;  %v410_v24 = vadd.f32 %v409_v25, %v5494_v57  ;;  %v4484_v46 = vcombine.low %v5744_v54, %v5746_v55 }
 0x139   :  { %v485_v23 = vmax.f32 %v307_v6, 0.0  ;;  %v4486_v26 = vcombine.low %v5751_v39, %v5753_v48  ;;  %v478_v63 = vmax.f32 %v408_v16, 0.0  ;;  %v4492_v2 = vcombine.low %v5774_v0, %v5776_v14  ;;  %v5798_v6 = vld [vmem:[#allocation2 + $0x7a0] sm:$0xff]  ;;  %v5803_v48 = vld [vmem:[#allocation2 + $0x788] sm:$0xff] }
 0x13a   :  { %v5784_v61 = vpack.c.bf16 %v484_v11, %v480_v10  ;;  %v4493_v4 = vcombine.high %v5774_v0, %v5776_v14  ;;  %v479_v54 = vmax.f32 %v410_v24, 0.0  ;;  %v413_v11 = vpop.f32.mrb[24].mxu1 }
 0x13b   :  { %v5790_v1 = vpack.c.bf16 %v485_v23, %v481_v33  ;;  %2242 = vmatpush1.bf16.msra.mxu0 %v4476_v44  ;;  %v310_v60 = vpop.f32.mrb[28].mxu0  ;;  %2468 = vmatpush1.bf16.msra.mxu1 %v4478_v59  ;;  %v4495_v44 = vcombine.high %v5779_v20, %v5781_v34  ;;  %v5805_v59 = vld [vmem:[#allocation2 + $0x7a8] sm:$0xff]  ;;  %v5807_v8 = vpack.c.bf16 %v478_v63, %v474_v15  ;;  %v415_v25 = vpop.f32.mrb[25].mxu1 }
 0x13c   :  { %v311_v55 = vadd.f32 %v310_v60, %v5468_v31  ;;  %v312_v39 = vpop.f32.mrb[29].mxu0  ;;  %2243 = vmatprep.subr.bf16.mxu0 %v4485_v3  ;;  %2469 = vmatprep.subr.bf16.mxu1 %v4487_v7  ;;  %v4494_v3 = vcombine.low %v5779_v20, %v5781_v34  ;;  %v5814_v7 = vpack.c.bf16 %v479_v54, %v475_v37  ;;  %v417_v20 = vpop.f32.mrb[26].mxu1 }
 0x13d   :  { %v313_v9 = vadd.f32 %v312_v39, %v5472_v32  ;;  %v314_v10 = vpop.f32.mrb[30].mxu0  ;;  %2198 = vmatprep.mubr.bf16.mxu0 %v5790_v1  ;;  %2424 = vmatprep.mubr.bf16.mxu1 %v5790_v1  ;;  %v4501_v15 = vcombine.high %v5796_v5, %v5798_v6  ;;  %v414_v16 = vadd.f32 %v413_v11, %v5484_v52  ;;  %v419_v60 = vpop.f32.mrb[27].mxu1 }
 0x13e   :  { %v315_v0 = vadd.f32 %v314_v10, %v5468_v31  ;;  %v316_v14 = vpop.f32.mrb[31].mxu0  ;;  %2199 = vmatmul.mubr.bf16.gmra.mrb[56].mxu0 %v5784_v61  ;;  %2425 = vmatmul.mubr.bf16.gmra.mrb[56].mxu1 %v5784_v61  ;;  %v4503_v23 = vcombine.high %v5803_v48, %v5805_v59  ;;  %v416_v31 = vadd.f32 %v415_v25, %v5494_v57  ;;  %v488_v34 = vmax.f32 %v311_v55, 0.0  ;;  %v776_v10 = vld [vmem:[#allocation2 + $0x7c0] sm:$0xff]  ;;  %v781_v25 = vld [vmem:[#allocation2 + $0x7e8] sm:$0xff] }
 0x13f   :  { %v317_v33 = vadd.f32 %v316_v14, %v5472_v32  ;;  %2244 = vmatpush1.bf16.msra.mxu0 %v4484_v46  ;;  %2470 = vmatpush1.bf16.msra.mxu1 %v4486_v26  ;;  %v482_v24 = vmax.f32 %v414_v16, 0.0  ;;  %v418_v63 = vadd.f32 %v417_v20, %v5484_v52  ;;  %v489_v54 = vmax.f32 %v313_v9, 0.0  ;;  %v780_v32 = vld [vmem:[#allocation2 + $0x7e0] sm:$0xff]  ;;  %v777_v14 = vld [vmem:[#allocation2 + $0x7c8] sm:$0xff]  ;;  %v530_v16 = vld [vmem:[#allocation2 + $0x10] sm:$0xff] }
 0x140   :  { %v492_v37 = vmax.f32 %v315_v0, 0.0  ;;  %2245 = vmatprep.subr.bf16.mxu0 %v4493_v4  ;;  %2471 = vmatprep.subr.bf16.mxu1 %v4495_v44  ;;  %v483_v46 = vmax.f32 %v416_v31, 0.0  ;;  %v420_v26 = vadd.f32 %v419_v60, %v5494_v57  ;;  %v4500_v4 = vcombine.low %v5796_v5, %v5798_v6  ;;  %v535_v20 = vld [vmem:[#allocation2 + $0x38] sm:$0xff]  ;;  %v423_v5 = vpop.f32.mrb[28].mxu1 }
 0x141   :  { %v493_v39 = vmax.f32 %v317_v33, 0.0  ;;  %v486_v42 = vmax.f32 %v418_v63, 0.0  ;;  %v4502_v44 = vcombine.low %v5803_v48, %v5805_v59  ;;  %v4509_v0 = vcombine.high %v776_v10, %v780_v32  ;;  %v425_v48 = vpop.f32.mrb[29].mxu1 }
 0x142   :  { %v5828_v11 = vpack.c.bf16 %v492_v37, %v488_v34  ;;  %v487_v9 = vmax.f32 %v420_v26, 0.0  ;;  %v4511_v31 = vcombine.high %v777_v14, %v781_v25  ;;  %v424_v6 = vadd.f32 %v423_v5, %v5484_v52 }
 0x143   :  { %v5830_v55 = vpack.c.bf16 %v493_v39, %v489_v54  ;;  %2246 = vmatpush1.bf16.msra.mxu0 %v4492_v2  ;;  %2472 = vmatpush1.bf16.msra.mxu1 %v4494_v3  ;;  %v5836_v33 = vpack.c.bf16 %v486_v42, %v482_v24  ;;  %v534_v2 = vld [vmem:[#allocation2 + $0x30] sm:$0xff]  ;;  %v531_v3 = vld [vmem:[#allocation2 + $0x18] sm:$0xff]  ;;  %v4508_v42 = vcombine.low %v776_v10, %v780_v32 }
 0x144   :  { %2247 = vmatprep.subr.bf16.mxu0 %v4501_v15  ;;  %2473 = vmatprep.subr.bf16.mxu1 %v4503_v23  ;;  %v5840_v34 = vpack.c.bf16 %v487_v9, %v483_v46  ;;  %v4510_v59 = vcombine.low %v777_v14, %v781_v25  ;;  %v426_v15 = vadd.f32 %v425_v48, %v5494_v57  ;;  %v427_v23 = vpop.f32.mrb[30].mxu1  ;;  %v490_v63 = vmax.f32 %v424_v6, 0.0  ;;  %v538_v39 = vld [vmem:[#allocation2 + $0x50] sm:$0xff]  ;;  %v539_v32 = vld [vmem:[#allocation2 + $0x58] sm:$0xff] }
 0x145   :  { %2208 = vmatprep.mubr.bf16.mxu0 %v5830_v55  ;;  %2434 = vmatprep.mubr.bf16.mxu1 %v5830_v55  ;;  %v4265_v37 = vcombine.high %v530_v16, %v534_v2  ;;  %v4267_v24 = vcombine.high %v531_v3, %v535_v20  ;;  %v428_v60 = vadd.f32 %v427_v23, %v5484_v52  ;;  %v429_v54 = vpop.f32.mrb[31].mxu1  ;;  %v542_v46 = vld [vmem:[#allocation2 + $0x70] sm:$0xff]  ;;  %v543_v14 = vld [vmem:[#allocation2 + $0x78] sm:$0xff] }
 0x146   :  { %2209 = vmatmul.mubr.bf16.gmra.mrb[60].mxu0 %v5828_v11  ;;  %2435 = vmatmul.mubr.bf16.gmra.mrb[60].mxu1 %v5828_v11  ;;  %v491_v26 = vmax.f32 %v426_v15, 0.0  ;;  %v430_v10 = vadd.f32 %v429_v54, %v5494_v57  ;;  %v4273_v52 = vcombine.high %v538_v39, %v542_v46  ;;  %v4275_v5 = vcombine.high %v539_v32, %v543_v14  ;;  %v550_v6 = vld [vmem:[#allocation2 + $0xb0] sm:$0xff]  ;;  %v547_v48 = vld [vmem:[#allocation2 + $0x98] sm:$0xff] }
 0x147   :  { %2248 = vmatpush1.bf16.msra.mxu0 %v4500_v4  ;;  %2474 = vmatpush1.bf16.msra.mxu1 %v4502_v44  ;;  %v494_v25 = vmax.f32 %v428_v60, 0.0  ;;  %v4264_v4 = vcombine.low %v530_v16, %v534_v2  ;;  %v4266_v44 = vcombine.low %v531_v3, %v535_v20  ;;  %v551_v15 = vld [vmem:[#allocation2 + $0xb8] sm:$0xff]  ;;  %v4272_v57 = vcombine.low %v538_v39, %v542_v46  ;;  %v554_v20 = vld [vmem:[#allocation2 + $0xd0] sm:$0xff] }
 0x148   :  { %2249 = vmatprep.subr.bf16.mxu0 %v4509_v0  ;;  %2251 = vmatprep.mubr.bf16.mxu0 %v5554_v58  ;;  %v495_v9 = vmax.f32 %v430_v10, 0.0  ;;  %v546_v0 = vld [vmem:[#allocation2 + $0x90] sm:$0xff]  ;;  %v4274_v16 = vcombine.low %v539_v32, %v543_v14  ;;  %v4283_v3 = vcombine.high %v547_v48, %v551_v15  ;;  %v567_v10 = vld [vmem:[#allocation2 + $0x138] sm:$0xff] }
 0x149   :  { %2475 = vmatprep.subr.bf16.mxu1 %v4511_v31  ;;  %2477 = vmatprep.mubr.bf16.mxu1 %v5554_v58  ;;  %v5850_v31 = vpack.c.bf16 %v494_v25, %v490_v63  ;;  %v4281_v2 = vcombine.high %v546_v0, %v550_v6  ;;  %v4282_v63 = vcombine.low %v547_v48, %v551_v15  ;;  %v562_v54 = vld [vmem:[#allocation2 + $0x110] sm:$0xff] }
 0x14a   :  { %v5852_v23 = vpack.c.bf16 %v495_v9, %v491_v26  ;;  %v566_v46 = vld [vmem:[#allocation2 + $0x130] sm:$0xff]  ;;  %v563_v26 = vld [vmem:[#allocation2 + $0x118] sm:$0xff] }
 0x14b   :  { %2250 = vmatpush1.bf16.msra.mxu0 %v4508_v42  ;;  %2476 = vmatpush1.bf16.msra.mxu1 %v4510_v59  ;;  %v558_v42 = vld [vmem:[#allocation2 + $0xf0] sm:$0xff]  ;;  %v555_v59 = vld [vmem:[#allocation2 + $0xd8] sm:$0xff]  ;;  %v4297_v25 = vcombine.high %v562_v54, %v566_v46 }
 0x14c   :  { %2558 = vmatprep.subr.bf16.mxu0 %v4265_v37  ;;  %2784 = vmatprep.subr.bf16.mxu1 %v4267_v24  ;;  %v559_v37 = vld [vmem:[#allocation2 + $0xf8] sm:$0xff]  ;;  %v4280_v24 = vcombine.low %v546_v0, %v550_v6  ;;  %v4289_v60 = vcombine.high %v554_v20, %v558_v42  ;;  %v4288_v32 = vcombine.low %v554_v20, %v558_v42  ;;  %v574_v9 = vld [vmem:[#allocation2 + $0x170] sm:$0xff] }
 0x14d   :  { %v4291_v39 = vcombine.high %v555_v59, %v559_v37  ;;  %v4290_v14 = vcombine.low %v555_v59, %v559_v37  ;;  %v575_v0 = vld [vmem:[#allocation2 + $0x178] sm:$0xff]  ;;  %v4298_v6 = vcombine.low %v563_v26, %v567_v10  ;;  %v578_v15 = vld [vmem:[#allocation2 + $0x190] sm:$0xff] }
 0x14e   :  { %2252 = vmatmul.mubr.bf16.vlgmr.msra.gmra.mrb[32].mxu0 %v5547_v50  ;;  %2478 = vmatmul.mubr.bf16.vlgmr.msra.gmra.mrb[32].mxu1 %v5547_v50 }
 0x14f   :  { %2559 = vmatpush1.bf16.msra.mxu0 %v4264_v4  ;;  %2785 = vmatpush1.bf16.msra.mxu1 %v4266_v44  ;;  %v4299_v4 = vcombine.high %v563_v26, %v567_v10  ;;  %v570_v44 = vld [vmem:[#allocation2 + $0x150] sm:$0xff] }
 0x150   :  { %2560 = vmatprep.subr.bf16.mxu0 %v4273_v52  ;;  %2261 = vmatprep.mubr.bf16.mxu0 %v5606_v47  ;;  %v571_v52 = vld [vmem:[#allocation2 + $0x158] sm:$0xff]  ;;  %v4305_v48 = vcombine.high %v570_v44, %v574_v9  ;;  %v4304_v20 = vcombine.low %v570_v44, %v574_v9  ;;  %v594_v10 = vld [vmem:[#allocation2 + $0x210] sm:$0xff] }
 0x151   :  { %2487 = vmatprep.mubr.bf16.mxu1 %v5606_v47  ;;  %2786 = vmatprep.subr.bf16.mxu1 %v4275_v5  ;;  %v4296_v5 = vcombine.low %v562_v54, %v566_v46  ;;  %v4306_v42 = vcombine.low %v571_v52, %v575_v0  ;;  %v591_v54 = vld [vmem:[#allocation2 + $0x1f8] sm:$0xff] }
 0x153   :  { %2561 = vmatpush1.bf16.msra.mxu0 %v4272_v57  ;;  %2787 = vmatpush1.bf16.msra.mxu1 %v4274_v16  ;;  %v4307_v57 = vcombine.high %v571_v52, %v575_v0  ;;  %v582_v16 = vld [vmem:[#allocation2 + $0x1b0] sm:$0xff] }
 0x154   :  { %2562 = vmatprep.subr.bf16.mxu0 %v4281_v2  ;;  %2788 = vmatprep.subr.bf16.mxu1 %v4283_v3  ;;  %v579_v2 = vld [vmem:[#allocation2 + $0x198] sm:$0xff]  ;;  %v4313_v59 = vcombine.high %v578_v15, %v582_v16 }
 0x155   :  { %v583_v3 = vld [vmem:[#allocation2 + $0x1b8] sm:$0xff] }
 0x156   :  { %2262 = vmatmul.mubr.bf16.gmra.mrb[36].mxu0 %v5599_v43  ;;  %2488 = vmatmul.mubr.bf16.gmra.mrb[36].mxu1 %v5599_v43  ;;  %v4315_v37 = vcombine.high %v579_v2, %v583_v3  ;;  %v4314_v46 = vcombine.low %v579_v2, %v583_v3  ;;  %v610_v3 = vld [vmem:[#allocation2 + $0x290] sm:$0xff] }
 0x157   :  { %2563 = vmatpush1.bf16.msra.mxu0 %v4280_v24  ;;  %2789 = vmatpush1.bf16.msra.mxu1 %v4282_v63  ;;  %v586_v24 = vld [vmem:[#allocation2 + $0x1d0] sm:$0xff] }
 0x158   :  { %2564 = vmatprep.subr.bf16.mxu0 %v4289_v60  ;;  %2271 = vmatprep.mubr.bf16.mxu0 %v5658_v45  ;;  %v590_v63 = vld [vmem:[#allocation2 + $0x1f0] sm:$0xff]  ;;  %v587_v60 = vld [vmem:[#allocation2 + $0x1d8] sm:$0xff] }
 0x159   :  { %2497 = vmatprep.mubr.bf16.mxu1 %v5658_v45  ;;  %2790 = vmatprep.subr.bf16.mxu1 %v4291_v39  ;;  %v4312_v39 = vcombine.low %v578_v15, %v582_v16  ;;  %v4321_v26 = vcombine.high %v586_v24, %v590_v63  ;;  %v4320_v44 = vcombine.low %v586_v24, %v590_v63  ;;  %v607_v15 = vld [vmem:[#allocation2 + $0x278] sm:$0xff] }
 0x15a   :  { %v4322_v9 = vcombine.low %v587_v60, %v591_v54 }
 0x15b   :  { %2565 = vmatpush1.bf16.msra.mxu0 %v4288_v32  ;;  %2791 = vmatpush1.bf16.msra.mxu1 %v4290_v14  ;;  %v4323_v32 = vcombine.high %v587_v60, %v591_v54  ;;  %v598_v14 = vld [vmem:[#allocation2 + $0x230] sm:$0xff] }
 0x15c   :  { %2566 = vmatprep.subr.bf16.mxu0 %v4297_v25  ;;  %2792 = vmatprep.subr.bf16.mxu1 %v4299_v4  ;;  %v595_v25 = vld [vmem:[#allocation2 + $0x218] sm:$0xff]  ;;  %v4329_v52 = vcombine.high %v594_v10, %v598_v14 }
 0x15d   :  { %v599_v4 = vld [vmem:[#allocation2 + $0x238] sm:$0xff] }
 0x15e   :  { %2272 = vmatmul.mubr.bf16.gmra.mrb[40].mxu0 %v5651_v38  ;;  %2498 = vmatmul.mubr.bf16.gmra.mrb[40].mxu1 %v5651_v38  ;;  %v4331_v0 = vcombine.high %v595_v25, %v599_v4  ;;  %v4330_v16 = vcombine.low %v595_v25, %v599_v4  ;;  %v626_v4 = vld [vmem:[#allocation2 + $0x310] sm:$0xff] }
 0x15f   :  { %2567 = vmatpush1.bf16.msra.mxu0 %v4296_v5  ;;  %2793 = vmatpush1.bf16.msra.mxu1 %v4298_v6  ;;  %v602_v5 = vld [vmem:[#allocation2 + $0x250] sm:$0xff] }
 0x160   :  { %2568 = vmatprep.subr.bf16.mxu0 %v4305_v48  ;;  %2281 = vmatprep.mubr.bf16.mxu0 %v5710_v49  ;;  %v606_v6 = vld [vmem:[#allocation2 + $0x270] sm:$0xff]  ;;  %v603_v48 = vld [vmem:[#allocation2 + $0x258] sm:$0xff] }
 0x161   :  { %2507 = vmatprep.mubr.bf16.mxu1 %v5710_v49  ;;  %2794 = vmatprep.subr.bf16.mxu1 %v4307_v57  ;;  %v4328_v57 = vcombine.low %v594_v10, %v598_v14  ;;  %v4337_v2 = vcombine.high %v602_v5, %v606_v6  ;;  %v4336_v24 = vcombine.low %v602_v5, %v606_v6  ;;  %v623_v10 = vld [vmem:[#allocation2 + $0x2f8] sm:$0xff] }
 0x162   :  { %v4338_v63 = vcombine.low %v603_v48, %v607_v15 }
 0x163   :  { %2569 = vmatpush1.bf16.msra.mxu0 %v4304_v20  ;;  %2795 = vmatpush1.bf16.msra.mxu1 %v4306_v42  ;;  %v4339_v20 = vcombine.high %v603_v48, %v607_v15  ;;  %v614_v42 = vld [vmem:[#allocation2 + $0x2b0] sm:$0xff] }
 0x164   :  { %2570 = vmatprep.subr.bf16.mxu0 %v4313_v59  ;;  %2796 = vmatprep.subr.bf16.mxu1 %v4315_v37  ;;  %v611_v59 = vld [vmem:[#allocation2 + $0x298] sm:$0xff]  ;;  %v4345_v60 = vcombine.high %v610_v3, %v614_v42 }
 0x165   :  { %v615_v37 = vld [vmem:[#allocation2 + $0x2b8] sm:$0xff] }
 0x166   :  { %2282 = vmatmul.mubr.bf16.gmra.mrb[44].mxu0 %v5703_v41  ;;  %2508 = vmatmul.mubr.bf16.gmra.mrb[44].mxu1 %v5703_v41  ;;  %v4347_v54 = vcombine.high %v611_v59, %v615_v37  ;;  %v4346_v14 = vcombine.low %v611_v59, %v615_v37  ;;  %v642_v37 = vld [vmem:[#allocation2 + $0x390] sm:$0xff] }
 0x167   :  { %2571 = vmatpush1.bf16.msra.mxu0 %v4312_v39  ;;  %2797 = vmatpush1.bf16.msra.mxu1 %v4314_v46  ;;  %v618_v39 = vld [vmem:[#allocation2 + $0x2d0] sm:$0xff] }
 0x168   :  { %2572 = vmatprep.subr.bf16.mxu0 %v4321_v26  ;;  %2291 = vmatprep.mubr.bf16.mxu0 %v5762_v62  ;;  %v622_v46 = vld [vmem:[#allocation2 + $0x2f0] sm:$0xff]  ;;  %v619_v26 = vld [vmem:[#allocation2 + $0x2d8] sm:$0xff] }
 0x169   :  { %2517 = vmatprep.mubr.bf16.mxu1 %v5762_v62  ;;  %2798 = vmatprep.subr.bf16.mxu1 %v4323_v32  ;;  %v4344_v32 = vcombine.low %v610_v3, %v614_v42  ;;  %v4353_v25 = vcombine.high %v618_v39, %v622_v46  ;;  %v4352_v5 = vcombine.low %v618_v39, %v622_v46  ;;  %v639_v3 = vld [vmem:[#allocation2 + $0x378] sm:$0xff] }
 0x16a   :  { %v4354_v6 = vcombine.low %v619_v26, %v623_v10 }
 0x16b   :  { %2573 = vmatpush1.bf16.msra.mxu0 %v4320_v44  ;;  %2799 = vmatpush1.bf16.msra.mxu1 %v4322_v9  ;;  %v4355_v44 = vcombine.high %v619_v26, %v623_v10  ;;  %v630_v9 = vld [vmem:[#allocation2 + $0x330] sm:$0xff] }
 0x16c   :  { %2574 = vmatprep.subr.bf16.mxu0 %v4329_v52  ;;  %2800 = vmatprep.subr.bf16.mxu1 %v4331_v0  ;;  %v627_v52 = vld [vmem:[#allocation2 + $0x318] sm:$0xff]  ;;  %v4361_v48 = vcombine.high %v626_v4, %v630_v9 }
 0x16d   :  { %v631_v0 = vld [vmem:[#allocation2 + $0x338] sm:$0xff] }
 0x16e   :  { %2292 = vmatmul.mubr.bf16.gmra.mrb[48].mxu0 %v5755_v56  ;;  %2518 = vmatmul.mubr.bf16.gmra.mrb[48].mxu1 %v5755_v56  ;;  %v4363_v15 = vcombine.high %v627_v52, %v631_v0  ;;  %v4362_v42 = vcombine.low %v627_v52, %v631_v0 }
 0x16f   :  { %2575 = vmatpush1.bf16.msra.mxu0 %v4328_v57  ;;  %2801 = vmatpush1.bf16.msra.mxu1 %v4330_v16  ;;  %v634_v57 = vld [vmem:[#allocation2 + $0x350] sm:$0xff] }
 0x170   :  { %2576 = vmatprep.subr.bf16.mxu0 %v4337_v2  ;;  %2301 = vmatprep.mubr.bf16.mxu0 %v5814_v7  ;;  %v638_v16 = vld [vmem:[#allocation2 + $0x370] sm:$0xff]  ;;  %v635_v2 = vld [vmem:[#allocation2 + $0x358] sm:$0xff] }
 0x171   :  { %2527 = vmatprep.mubr.bf16.mxu1 %v5814_v7  ;;  %2802 = vmatprep.subr.bf16.mxu1 %v4339_v20  ;;  %v4360_v20 = vcombine.low %v626_v4, %v630_v9  ;;  %v4369_v59 = vcombine.high %v634_v57, %v638_v16  ;;  %v4368_v39 = vcombine.low %v634_v57, %v638_v16  ;;  %v655_v4 = vld [vmem:[#allocation2 + $0x3f8] sm:$0xff] }
 0x172   :  { %v4370_v46 = vcombine.low %v635_v2, %v639_v3 }
 0x173   :  { %2577 = vmatpush1.bf16.msra.mxu0 %v4336_v24  ;;  %2803 = vmatpush1.bf16.msra.mxu1 %v4338_v63  ;;  %v4371_v24 = vcombine.high %v635_v2, %v639_v3  ;;  %v646_v63 = vld [vmem:[#allocation2 + $0x3b0] sm:$0xff] }
 0x174   :  { %2578 = vmatprep.subr.bf16.mxu0 %v4345_v60  ;;  %2804 = vmatprep.subr.bf16.mxu1 %v4347_v54  ;;  %v643_v60 = vld [vmem:[#allocation2 + $0x398] sm:$0xff]  ;;  %v4377_v26 = vcombine.high %v642_v37, %v646_v63 }
 0x175   :  { %v647_v54 = vld [vmem:[#allocation2 + $0x3b8] sm:$0xff] }
 0x176   :  { %2302 = vmatmul.mubr.bf16.gmra.mrb[52].mxu0 %v5807_v8  ;;  %2528 = vmatmul.mubr.bf16.gmra.mrb[52].mxu1 %v5807_v8  ;;  %v4379_v10 = vcombine.high %v643_v60, %v647_v54  ;;  %v4378_v9 = vcombine.low %v643_v60, %v647_v54  ;;  %v674_v54 = vld [vmem:[#allocation2 + $0x490] sm:$0xff] }
 0x177   :  { %2579 = vmatpush1.bf16.msra.mxu0 %v4344_v32  ;;  %2805 = vmatpush1.bf16.msra.mxu1 %v4346_v14  ;;  %v650_v32 = vld [vmem:[#allocation2 + $0x3d0] sm:$0xff] }
 0x178   :  { %2580 = vmatprep.subr.bf16.mxu0 %v4353_v25  ;;  %2311 = vmatprep.mubr.bf16.mxu0 %v5840_v34  ;;  %v654_v14 = vld [vmem:[#allocation2 + $0x3f0] sm:$0xff]  ;;  %v651_v25 = vld [vmem:[#allocation2 + $0x3d8] sm:$0xff] }
 0x179   :  { %2537 = vmatprep.mubr.bf16.mxu1 %v5840_v34  ;;  %2806 = vmatprep.subr.bf16.mxu1 %v4355_v44  ;;  %v4376_v44 = vcombine.low %v642_v37, %v646_v63  ;;  %v4385_v52 = vcombine.high %v650_v32, %v654_v14  ;;  %v4387_v0 = vcombine.high %v651_v25, %v655_v4  ;;  %v667_v37 = vld [vmem:[#allocation2 + $0x458] sm:$0xff] }
 0x17a   :  { %v4384_v57 = vcombine.low %v650_v32, %v654_v14  ;;  %v4386_v16 = vcombine.low %v651_v25, %v655_v4  ;;  %v682_v4 = vld [vmem:[#allocation2 + $0x4d0] sm:$0xff] }
 0x17b   :  { %2581 = vmatpush1.bf16.msra.mxu0 %v4352_v5  ;;  %2807 = vmatpush1.bf16.msra.mxu1 %v4354_v6  ;;  %v658_v5 = vld [vmem:[#allocation2 + $0x410] sm:$0xff] }
 0x17c   :  { %2582 = vmatprep.subr.bf16.mxu0 %v4361_v48  ;;  %2808 = vmatprep.subr.bf16.mxu1 %v4363_v15  ;;  %v662_v6 = vld [vmem:[#allocation2 + $0x430] sm:$0xff]  ;;  %v659_v48 = vld [vmem:[#allocation2 + $0x418] sm:$0xff] }
 0x17d   :  { %v663_v15 = vld [vmem:[#allocation2 + $0x438] sm:$0xff]  ;;  %v4393_v2 = vcombine.high %v658_v5, %v662_v6 }
 0x17e   :  { %2312 = vmatmul.mubr.bf16.gmra.mrb[56].mxu0 %v5836_v33  ;;  %2538 = vmatmul.mubr.bf16.gmra.mrb[56].mxu1 %v5836_v33  ;;  %v4395_v3 = vcombine.high %v659_v48, %v663_v15  ;;  %v4394_v63 = vcombine.low %v659_v48, %v663_v15  ;;  %v694_v48 = vld [vmem:[#allocation2 + $0x530] sm:$0xff] }
 0x17f   :  { %2583 = vmatpush1.bf16.msra.mxu0 %v4360_v20  ;;  %2809 = vmatpush1.bf16.msra.mxu1 %v4362_v42  ;;  %v666_v20 = vld [vmem:[#allocation2 + $0x450] sm:$0xff] }
 0x180   :  { %2584 = vmatprep.subr.bf16.mxu0 %v4369_v59  ;;  %2321 = vmatprep.mubr.bf16.mxu0 %v5852_v23  ;;  %v670_v42 = vld [vmem:[#allocation2 + $0x470] sm:$0xff]  ;;  %v4392_v59 = vcombine.low %v658_v5, %v662_v6 }
 0x181   :  { %2547 = vmatprep.mubr.bf16.mxu1 %v5852_v23  ;;  %2810 = vmatprep.subr.bf16.mxu1 %v4371_v24  ;;  %v671_v24 = vld [vmem:[#allocation2 + $0x478] sm:$0xff]  ;;  %v4401_v60 = vcombine.high %v666_v20, %v670_v42  ;;  %v690_v6 = vld [vmem:[#allocation2 + $0x510] sm:$0xff] }
 0x182   :  { %v4402_v14 = vcombine.low %v667_v37, %v671_v24 }
 0x183   :  { %2585 = vmatpush1.bf16.msra.mxu0 %v4368_v39  ;;  %2811 = vmatpush1.bf16.msra.mxu1 %v4370_v46  ;;  %v678_v39 = vld [vmem:[#allocation2 + $0x4b0] sm:$0xff]  ;;  %v4400_v46 = vcombine.low %v666_v20, %v670_v42 }
 0x184   :  { %2586 = vmatprep.subr.bf16.mxu0 %v4377_v26  ;;  %2812 = vmatprep.subr.bf16.mxu1 %v4379_v10  ;;  %v675_v26 = vld [vmem:[#allocation2 + $0x498] sm:$0xff]  ;;  %v4409_v32 = vcombine.high %v674_v54, %v678_v39  ;;  %v698_v42 = vld [vmem:[#allocation2 + $0x550] sm:$0xff] }
 0x185   :  { %v679_v10 = vld [vmem:[#allocation2 + $0x4b8] sm:$0xff] }
 0x186   :  { %2322 = vmatmul.mubr.bf16.gmra.mrb[60].mxu0 %v5850_v31  ;;  %2548 = vmatmul.mubr.bf16.gmra.mrb[60].mxu1 %v5850_v31  ;;  %v4411_v25 = vcombine.high %v675_v26, %v679_v10 }
 0x187   :  { %2587 = vmatpush1.bf16.msra.mxu0 %v4376_v44  ;;  %2590 = vmatprep.mubr.bf16.mxu0 %v5486_v53  ;;  %v686_v44 = vld [vmem:[#allocation2 + $0x4f0] sm:$0xff] }
 0x188   :  { %2813 = vmatpush1.bf16.msra.mxu1 %v4378_v9  ;;  %2816 = vmatprep.mubr.bf16.mxu1 %v5486_v53  ;;  %v4403_v53 = vcombine.high %v667_v37, %v671_v24  ;;  %v4408_v9 = vcombine.low %v674_v54, %v678_v39  ;;  %v4417_v5 = vcombine.high %v682_v4, %v686_v44  ;;  %v699_v24 = vld [vmem:[#allocation2 + $0x558] sm:$0xff]  ;;  %v706_v54 = vld [vmem:[#allocation2 + $0x590] sm:$0xff] }
 0x189   :  { %2588 = vmatprep.subr.bf16.mxu0 %v4385_v52  ;;  %2814 = vmatprep.subr.bf16.mxu1 %v4387_v0  ;;  %v683_v52 = vld [vmem:[#allocation2 + $0x4d8] sm:$0xff]  ;;  %v4416_v15 = vcombine.low %v682_v4, %v686_v44  ;;  %v4424_v37 = vcombine.low %v690_v6, %v694_v48  ;;  %v710_v39 = vld [vmem:[#allocation2 + $0x5b0] sm:$0xff] }
 0x18a   :  { %v687_v0 = vld [vmem:[#allocation2 + $0x4f8] sm:$0xff]  ;;  %v718_v4 = vld [vmem:[#allocation2 + $0x5f0] sm:$0xff]  ;;  %v4440_v44 = vcombine.low %v706_v54, %v710_v39 }
 0x18b   :  { %2589 = vmatpush1.bf16.msra.mxu0 %v4384_v57  ;;  %v691_v57 = vld [vmem:[#allocation2 + $0x518] sm:$0xff] }
 0x18c   :  { %2815 = vmatpush1.bf16.msra.mxu1 %v4386_v16  ;;  %2671 = vmatprep.subr.bf16.mxu0 %v4393_v2  ;;  %v695_v16 = vld [vmem:[#allocation2 + $0x538] sm:$0xff]  ;;  %v4425_v2 = vcombine.high %v690_v6, %v694_v48 }
 0x18d   :  { %2897 = vmatprep.subr.bf16.mxu1 %v4395_v3  ;;  %v4418_v3 = vcombine.low %v683_v52, %v687_v0  ;;  %v4427_v20 = vcombine.high %v691_v57, %v695_v16  ;;  %v723_v48 = vld [vmem:[#allocation2 + $0x618] sm:$0xff] }
 0x18e   :  { %2591 = vmatmul.mubr.bf16.vlgmr.msra.gmra.mrb[64].mxu0 %v5480_v51 }
 0x18f   :  { %2672 = vmatpush1.bf16.msra.mxu0 %v4392_v59  ;;  %2817 = vmatmul.mubr.bf16.vlgmr.msra.gmra.mrb[64].mxu1 %v5480_v51  ;;  %v4410_v51 = vcombine.low %v675_v26, %v679_v10  ;;  %v702_v59 = vld [vmem:[#allocation2 + $0x570] sm:$0xff]  ;;  %v711_v26 = vld [vmem:[#allocation2 + $0x5b8] sm:$0xff]  ;;  %v4441_v10 = vcombine.high %v706_v54, %v710_v39 }
 0x190   :  { %2600 = vmatprep.mubr.bf16.mxu0 %v5530_v36  ;;  %2826 = vmatprep.mubr.bf16.mxu1 %v5530_v36  ;;  %v4419_v36 = vcombine.high %v683_v52, %v687_v0  ;;  %v719_v52 = vld [vmem:[#allocation2 + $0x5f8] sm:$0xff] }
 0x191   :  { %2898 = vmatpush1.bf16.msra.mxu1 %v4394_v63  ;;  %2673 = vmatprep.subr.bf16.mxu0 %v4401_v60  ;;  %v703_v63 = vld [vmem:[#allocation2 + $0x578] sm:$0xff]  ;;  %v4433_v60 = vcombine.high %v698_v42, %v702_v59 }
 0x192   :  { %2899 = vmatprep.subr.bf16.mxu1 %v4403_v53  ;;  %v4432_v53 = vcombine.low %v698_v42, %v702_v59  ;;  %v731_v42 = vld [vmem:[#allocation2 + $0x658] sm:$0xff] }
 0x193   :  { %2674 = vmatpush1.bf16.msra.mxu0 %v4400_v46  ;;  %v707_v46 = vld [vmem:[#allocation2 + $0x598] sm:$0xff] }
 0x194   :  { %2675 = vmatprep.subr.bf16.mxu0 %v4409_v32  ;;  %v4434_v32 = vcombine.low %v699_v24, %v703_v63  ;;  %v735_v59 = vld [vmem:[#allocation2 + $0x678] sm:$0xff] }
 0x195   :  { %2900 = vmatpush1.bf16.msra.mxu1 %v4402_v14  ;;  %v4443_v14 = vcombine.high %v707_v46, %v711_v26  ;;  %v743_v54 = vld [vmem:[#allocation2 + $0x6b8] sm:$0xff] }
 0x196   :  { %2601 = vmatmul.mubr.bf16.gmra.mrb[68].mxu0 %v5524_v29  ;;  %2901 = vmatprep.subr.bf16.mxu1 %v4411_v25  ;;  %v714_v25 = vld [vmem:[#allocation2 + $0x5d0] sm:$0xff] }
 0x197   :  { %2676 = vmatpush1.bf16.msra.mxu0 %v4408_v9  ;;  %2827 = vmatmul.mubr.bf16.gmra.mrb[68].mxu1 %v5524_v29  ;;  %v4426_v29 = vcombine.low %v691_v57, %v695_v16  ;;  %v715_v9 = vld [vmem:[#allocation2 + $0x5d8] sm:$0xff]  ;;  %v4449_v0 = vcombine.high %v714_v25, %v718_v4  ;;  %v4448_v6 = vcombine.low %v714_v25, %v718_v4  ;;  %v754_v4 = vld [vmem:[#allocation2 + $0x710] sm:$0xff] }
 0x198   :  { %2610 = vmatprep.mubr.bf16.mxu0 %v5582_v22  ;;  %2836 = vmatprep.mubr.bf16.mxu1 %v5582_v22  ;;  %v4435_v22 = vcombine.high %v699_v24, %v703_v63  ;;  %v4450_v57 = vcombine.low %v715_v9, %v719_v52  ;;  %v738_v24 = vld [vmem:[#allocation2 + $0x690] sm:$0xff] }
 0x199   :  { %2902 = vmatpush1.bf16.msra.mxu1 %v4410_v51  ;;  %2677 = vmatprep.subr.bf16.mxu0 %v4417_v5  ;;  %v722_v51 = vld [vmem:[#allocation2 + $0x610] sm:$0xff] }
 0x19a   :  { %2903 = vmatprep.subr.bf16.mxu1 %v4419_v36  ;;  %v726_v5 = vld [vmem:[#allocation2 + $0x630] sm:$0xff]  ;;  %v727_v36 = vld [vmem:[#allocation2 + $0x638] sm:$0xff] }
 0x19b   :  { %2678 = vmatpush1.bf16.msra.mxu0 %v4416_v15  ;;  %v4457_v15 = vcombine.high %v722_v51, %v726_v5  ;;  %v4459_v16 = vcombine.high %v723_v48, %v727_v36  ;;  %v742_v63 = vld [vmem:[#allocation2 + $0x6b0] sm:$0xff] }
 0x19c   :  { %2679 = vmatprep.subr.bf16.mxu0 %v4425_v2  ;;  %v730_v2 = vld [vmem:[#allocation2 + $0x650] sm:$0xff]  ;;  %v4473_v39 = vcombine.high %v738_v24, %v742_v63 }
 0x19d   :  { %2904 = vmatpush1.bf16.msra.mxu1 %v4418_v3  ;;  %v734_v3 = vld [vmem:[#allocation2 + $0x670] sm:$0xff] }
 0x19e   :  { %2611 = vmatmul.mubr.bf16.gmra.mrb[72].mxu0 %v5576_v18  ;;  %2905 = vmatprep.subr.bf16.mxu1 %v4427_v20  ;;  %v4456_v20 = vcombine.low %v722_v51, %v726_v5 }
 0x19f   :  { %2680 = vmatpush1.bf16.msra.mxu0 %v4424_v37  ;;  %2837 = vmatmul.mubr.bf16.gmra.mrb[72].mxu1 %v5576_v18  ;;  %v4442_v18 = vcombine.low %v707_v46, %v711_v26  ;;  %v4465_v37 = vcombine.high %v730_v2, %v734_v3  ;;  %v746_v46 = vld [vmem:[#allocation2 + $0x6d0] sm:$0xff] }
 0x1a0   :  { %2620 = vmatprep.mubr.bf16.mxu0 %v5634_v17  ;;  %2846 = vmatprep.mubr.bf16.mxu1 %v5634_v17  ;;  %v4451_v17 = vcombine.high %v715_v9, %v719_v52  ;;  %v750_v26 = vld [vmem:[#allocation2 + $0x6f0] sm:$0xff]  ;;  %v755_v52 = vld [vmem:[#allocation2 + $0x718] sm:$0xff] }
 0x1a1   :  { %2906 = vmatpush1.bf16.msra.mxu1 %v4426_v29  ;;  %2681 = vmatprep.subr.bf16.mxu0 %v4433_v60  ;;  %v4464_v29 = vcombine.low %v730_v2, %v734_v3  ;;  %v739_v60 = vld [vmem:[#allocation2 + $0x698] sm:$0xff]  ;;  %v4481_v25 = vcombine.high %v746_v46, %v750_v26  ;;  %v4480_v9 = vcombine.low %v746_v46, %v750_v26  ;;  %v774_v2 = vld [vmem:[#allocation2 + $0x7b0] sm:$0xff]  ;;  %v5121_v46 = vld [vmem:[#allocation4 + $0xc0] sm:$0xff]  }
 0x1a2   :  { %2907 = vmatprep.subr.bf16.mxu1 %v4435_v22  ;;  %v4466_v22 = vcombine.low %v731_v42, %v735_v59  ;;  %v5122_v26 = vld [vmem:[#allocation4] sm:$0xff]  }
 0x1a3   :  { %2682 = vmatpush1.bf16.msra.mxu0 %v4432_v53  ;;  %v4475_v53 = vcombine.high %v739_v60, %v743_v54 }
 0x1a4   :  { %2683 = vmatprep.subr.bf16.mxu0 %v4441_v10  ;;  %v4472_v10 = vcombine.low %v738_v24, %v742_v63  ;;  %v778_v24 = vld [vmem:[#allocation2 + $0x7d0] sm:$0xff] }
 0x1a5   :  { %2908 = vmatpush1.bf16.msra.mxu1 %v4434_v32  ;;  %v747_v32 = vld [vmem:[#allocation2 + $0x6d8] sm:$0xff]  ;;  %v782_v63 = vld [vmem:[#allocation2 + $0x7f0] sm:$0xff] }
 0x1a6   :  { %2621 = vmatmul.mubr.bf16.gmra.mrb[76].mxu0 %v5628_v13  ;;  %2909 = vmatprep.subr.bf16.mxu1 %v4443_v14  ;;  %v751_v14 = vld [vmem:[#allocation2 + $0x6f8] sm:$0xff] }
 0x1a7   :  { %2684 = vmatpush1.bf16.msra.mxu0 %v4440_v44  ;;  %2847 = vmatmul.mubr.bf16.gmra.mrb[76].mxu1 %v5628_v13  ;;  %v4458_v13 = vcombine.low %v723_v48, %v727_v36  ;;  %v758_v44 = vld [vmem:[#allocation2 + $0x730] sm:$0xff]  ;;  %v4482_v51 = vcombine.low %v747_v32, %v751_v14  ;;  %v763_v36 = vld [vmem:[#allocation2 + $0x758] sm:$0xff] }
 0x1a8   :  { %2630 = vmatprep.mubr.bf16.mxu0 %v5686_v19  ;;  %2856 = vmatprep.mubr.bf16.mxu1 %v5686_v19  ;;  %v4467_v19 = vcombine.high %v731_v42, %v735_v59  ;;  %v4488_v48 = vcombine.low %v754_v4, %v758_v44  ;;  %v775_v42 = vld [vmem:[#allocation2 + $0x7b8] sm:$0xff] }
 0x1a9   :  { %2910 = vmatpush1.bf16.msra.mxu1 %v4442_v18  ;;  %2685 = vmatprep.subr.bf16.mxu0 %v4449_v0  ;;  %v759_v18 = vld [vmem:[#allocation2 + $0x738] sm:$0xff]  ;;  %v4489_v0 = vcombine.high %v754_v4, %v758_v44  ;;  %v5130_v4 = vld [vmem:[#allocation4 + $0x10] sm:$0xff]  }
 0x1aa   :  { %2911 = vmatprep.subr.bf16.mxu1 %v4451_v17  ;;  %v4491_v5 = vcombine.high %v755_v52, %v759_v18  ;;  %v762_v17 = vld [vmem:[#allocation2 + $0x750] sm:$0xff]  ;;  %v5132_v44 = vld [vmem:[#allocation4 + $0x58] sm:$0xff]  }
 0x1ab   :  { %2686 = vmatpush1.bf16.msra.mxu0 %v4448_v6  ;;  %v766_v6 = vld [vmem:[#allocation2 + $0x770] sm:$0xff] }
 0x1ac   :  { %2687 = vmatprep.subr.bf16.mxu0 %v4457_v15  ;;  %v767_v15 = vld [vmem:[#allocation2 + $0x778] sm:$0xff]  ;;  %v4496_v3 = vcombine.low %v762_v17, %v766_v6 }
 0x1ad   :  { %2912 = vmatpush1.bf16.msra.mxu1 %v4450_v57  ;;  %v4497_v57 = vcombine.high %v762_v17, %v766_v6  ;;  %v5141_v17 = vld [vmem:[#allocation4 + $0xe8] sm:$0xff]  }
 0x1ae   :  { %2631 = vmatmul.mubr.bf16.gmra.mrb[80].mxu0 %v5680_v12  ;;  %2913 = vmatprep.subr.bf16.mxu1 %v4459_v16  ;;  %v770_v16 = vld [vmem:[#allocation2 + $0x790] sm:$0xff]  ;;  %v5143_v6 = vld [vmem:[#allocation4 + $0xa8] sm:$0xff]  }
 0x1af   :  { %2688 = vmatpush1.bf16.msra.mxu0 %v4456_v20  ;;  %2857 = vmatmul.mubr.bf16.gmra.mrb[80].mxu1 %v5680_v12  ;;  %v4474_v12 = vcombine.low %v739_v60, %v743_v54  ;;  %v771_v20 = vld [vmem:[#allocation2 + $0x798] sm:$0xff]  ;;  %v4505_v59 = vcombine.high %v770_v16, %v774_v2  ;;  %v4513_v54 = vcombine.high %v778_v24, %v782_v63 }
 0x1b0   :  { %2640 = vmatprep.mubr.bf16.mxu0 %v5738_v35  ;;  %2866 = vmatprep.mubr.bf16.mxu1 %v5738_v35  ;;  %v4483_v35 = vcombine.high %v747_v32, %v751_v14  ;;  %v783_v60 = vld [vmem:[#allocation2 + $0x7f8] sm:$0xff]  ;;  %v5123_v32 = vld [vmem:[#allocation4 + $0x80] sm:$0xff]   ;;  %v5128_v14 = vld [vmem:[#allocation4 + $0x50] sm:$0xff]  }
 0x1b1   :  { %2914 = vmatpush1.bf16.msra.mxu1 %v4458_v13  ;;  %2689 = vmatprep.subr.bf16.mxu0 %v4465_v37  ;;  %v4498_v13 = vcombine.low %v763_v36, %v767_v15  ;;  %v4507_v37 = vcombine.high %v771_v20, %v775_v42 }
 0x1b2   :  { %2915 = vmatprep.subr.bf16.mxu1 %v4467_v19  ;;  %v4504_v19 = vcombine.low %v770_v16, %v774_v2  ;;  %v5151_v16 = vld [vmem:[#allocation4 + $0xb8] sm:$0xff]   ;;  %v5154_v2 = vld [vmem:[#allocation4 + $0x1c0] sm:$0xff]  }
 0x1b3   :  { %2690 = vmatpush1.bf16.msra.mxu0 %v4464_v29  ;;  %v779_v29 = vld [vmem:[#allocation2 + $0x7d8] sm:$0xff] }
 0x1b4   :  { %2691 = vmatprep.subr.bf16.mxu0 %v4473_v39  ;;  %v4512_v39 = vcombine.low %v778_v24, %v782_v63 }
 0x1b5   :  { %2916 = vmatpush1.bf16.msra.mxu1 %v4466_v22  ;;  %v5120_v22 = vld [vmem:[#allocation4 + $0x40] sm:$0xff]  }
 0x1b6   :  { %2641 = vmatmul.mubr.bf16.gmra.mrb[84].mxu0 %v5732_v21  ;;  %2917 = vmatprep.subr.bf16.mxu1 %v4475_v53  ;;  %v4514_v53 = vcombine.low %v779_v29, %v783_v60 }
 0x1b7   :  { %2692 = vmatpush1.bf16.msra.mxu0 %v4472_v10  ;;  %2867 = vmatmul.mubr.bf16.gmra.mrb[84].mxu1 %v5732_v21  ;;  %v4490_v21 = vcombine.low %v755_v52, %v759_v18  ;;  %v5124_v10 = vld [vmem:[#allocation4 + $0x48] sm:$0xff]   ;;  %v5135_v52 = vld [vmem:[#allocation4 + $0x98] sm:$0xff]   ;;  %v5137_v18 = vld [vmem:[#allocation4 + $0xe0] sm:$0xff]  }
 0x1b8   :  { %2650 = vmatprep.mubr.bf16.mxu0 %v5790_v1  ;;  %2876 = vmatprep.mubr.bf16.mxu1 %v5790_v1  ;;  %v4499_v1 = vcombine.high %v763_v36, %v767_v15  ;;  %v5146_v36 = vld [vmem:[#allocation4 + $0x30] sm:$0xff]   ;;  %v5148_v15 = vld [vmem:[#allocation4 + $0x78] sm:$0xff]  }
 0x1b9   :  { %2918 = vmatpush1.bf16.msra.mxu1 %v4474_v12  ;;  %2693 = vmatprep.subr.bf16.mxu0 %v4481_v25  ;;  %v5127_v12 = vld [vmem:[#allocation4 + $0x88] sm:$0xff]   ;;  %v5129_v25 = vld [vmem:[#allocation4 + $0xd0] sm:$0xff]  }
 0x1ba   :  { %2919 = vmatprep.subr.bf16.mxu1 %v4483_v35  ;;  %v5131_v35 = vld [vmem:[#allocation4 + $0x90] sm:$0xff]  }
 0x1bb   :  { %2694 = vmatpush1.bf16.msra.mxu0 %v4480_v9  ;;  %v5133_v9 = vld [vmem:[#allocation4 + $0xd8] sm:$0xff]  }
 0x1bc   :  { %2695 = vmatprep.subr.bf16.mxu0 %v4489_v0  ;;  %v5138_v0 = vld [vmem:[#allocation4 + $0x20] sm:$0xff]  }
 0x1bd   :  { %2920 = vmatpush1.bf16.msra.mxu1 %v4482_v51  ;;  %v5140_v51 = vld [vmem:[#allocation4 + $0x68] sm:$0xff]  }
 0x1be   :  { %2651 = vmatmul.mubr.bf16.gmra.mrb[88].mxu0 %v5784_v61  ;;  %2921 = vmatprep.subr.bf16.mxu1 %v4491_v5  ;;  %v5139_v5 = vld [vmem:[#allocation4 + $0xa0] sm:$0xff]  }
 0x1bf   :  { %2696 = vmatpush1.bf16.msra.mxu0 %v4488_v48  ;;  %2877 = vmatmul.mubr.bf16.gmra.mrb[88].mxu1 %v5784_v61  ;;  %v4506_v61 = vcombine.low %v771_v20, %v775_v42  ;;  %v5145_v48 = vld [vmem:[#allocation4 + $0xf0] sm:$0xff]  }
 0x1c0   :  { %2660 = vmatprep.mubr.bf16.mxu0 %v5830_v55  ;;  %2886 = vmatprep.mubr.bf16.mxu1 %v5830_v55  ;;  %v4515_v55 = vcombine.high %v779_v29, %v783_v60 }
 0x1c1   :  { %2922 = vmatpush1.bf16.msra.mxu1 %v4490_v21  ;;  %2697 = vmatprep.subr.bf16.mxu0 %v4497_v57  ;;  %v5147_v21 = vld [vmem:[#allocation4 + $0xb0] sm:$0xff]   ;;  %v5149_v57 = vld [vmem:[#allocation4 + $0xf8] sm:$0xff]  }
 0x1c2   :  { %2923 = vmatprep.subr.bf16.mxu1 %v4499_v1 }
 0x1c3   :  { %2698 = vmatpush1.bf16.msra.mxu0 %v4496_v3 }
 0x1c4   :  { %2699 = vmatprep.subr.bf16.mxu0 %v4505_v59 }
 0x1c5   :  { %2924 = vmatpush1.bf16.msra.mxu1 %v4498_v13 }
 0x1c6   :  { %2661 = vmatmul.mubr.bf16.gmra.mrb[92].mxu0 %v5828_v11  ;;  %2925 = vmatprep.subr.bf16.mxu1 %v4507_v37 }
 0x1c7   :  { %2700 = vmatpush1.bf16.msra.mxu0 %v4504_v19  ;;  %2887 = vmatmul.mubr.bf16.gmra.mrb[92].mxu1 %v5828_v11  ;;  %v5125_v11 = vld [vmem:[#allocation4 + $0xc8] sm:$0xff]  }
 0x1c8   :  { %2703 = vmatprep.mubr.bf16.mxu0 %v5554_v58  ;;  %2929 = vmatprep.mubr.bf16.mxu1 %v5554_v58  ;;  %v5126_v58 = vld [vmem:[#allocation4 + $0x8] sm:$0xff]  }
 0x1c9   :  { %2926 = vmatpush1.bf16.msra.mxu1 %v4506_v61  ;;  %2701 = vmatprep.subr.bf16.mxu0 %v4513_v54 }
 0x1ca   :  { %2927 = vmatprep.subr.bf16.mxu1 %v4515_v55 }
 0x1cb   :  { %2702 = vmatpush1.bf16.msra.mxu0 %v4512_v39 }
 0x1cc   :  { %4581 = vmatprep.subr.bf16.mxu0 %v5120_v22 }
 0x1cd   :  { %2928 = vmatpush1.bf16.msra.mxu1 %v4514_v53 }
 0x1ce   :  { %2704 = vmatmul.mubr.bf16.vlgmr.msra.gmra.mrb[64].mxu0 %v5547_v50  ;;  %4645 = vmatprep.subr.bf16.mxu1 %v5121_v46 }
 0x1cf   :  { %2713 = vmatprep.mubr.bf16.mxu0 %v5606_v47  ;;  %4582 = vmatpush3.bf16.msra.mxu0 %v5122_v26 }
 0x1d0   :  { %2930 = vmatmul.mubr.bf16.vlgmr.msra.gmra.mrb[64].mxu1 %v5547_v50  ;;  %4583 = vmatprep.subr.bf16.mxu0 %v5124_v10  ;;  %v5134_v50 = vld [vmem:[#allocation4 + $0x18] sm:$0xff]  }
 0x1d1   :  { %2939 = vmatprep.mubr.bf16.mxu1 %v5606_v47  ;;  %4646 = vmatpush3.bf16.msra.mxu1 %v5123_v32  ;;  %v5136_v47 = vld [vmem:[#allocation4 + $0x60] sm:$0xff]  }
 0x1d2   :  { %4647 = vmatprep.subr.bf16.mxu1 %v5125_v11 }
 0x1d3   :  { %4584 = vmatpush3.bf16.msra.mxu0 %v5126_v58 }
 0x1d4   :  { %4585 = vmatprep.subr.bf16.mxu0 %v5128_v14  ;;  %v5153_v14 = vld [vmem:[#allocation4 + $0x100] sm:$0xff]  }
 0x1d5   :  { %4648 = vmatpush3.bf16.msra.mxu1 %v5127_v12  ;;  %v5155_v12 = vld [vmem:[#allocation4 + $0x180] sm:$0xff]  }
 0x1d6   :  { %2714 = vmatmul.mubr.bf16.gmra.mrb[68].mxu0 %v5599_v43  ;;  %4649 = vmatprep.subr.bf16.mxu1 %v5129_v25 }
 0x1d7   :  { %2723 = vmatprep.mubr.bf16.mxu0 %v5658_v45  ;;  %4586 = vmatpush3.bf16.msra.mxu0 %v5130_v4 }
 0x1d8   :  { %2940 = vmatmul.mubr.bf16.gmra.mrb[68].mxu1 %v5599_v43  ;;  %4587 = vmatprep.subr.bf16.mxu0 %v5132_v44  ;;  %v5142_v43 = vld [vmem:[#allocation4 + $0x28] sm:$0xff]  }
 0x1d9   :  { %2949 = vmatprep.mubr.bf16.mxu1 %v5658_v45  ;;  %4650 = vmatpush3.bf16.msra.mxu1 %v5131_v35  ;;  %v5144_v45 = vld [vmem:[#allocation4 + $0x70] sm:$0xff]  }
 0x1da   :  { %4651 = vmatprep.subr.bf16.mxu1 %v5133_v9  ;;  %v5156_v9 = vld [vmem:[#allocation4 + $0x148] sm:$0xff]  }
 0x1db   :  { %4588 = vmatpush3.bf16.msra.mxu0 %v5134_v50  ;;  %v5158_v50 = vld [vmem:[#allocation4 + $0x1c8] sm:$0xff]  }
 0x1dc   :  { %4589 = vmatprep.subr.bf16.mxu0 %v5136_v47 }
 0x1dd   :  { %4652 = vmatpush3.bf16.msra.mxu1 %v5135_v52 }
 0x1de   :  { %2724 = vmatmul.mubr.bf16.gmra.mrb[72].mxu0 %v5651_v38  ;;  %4653 = vmatprep.subr.bf16.mxu1 %v5137_v18 }
 0x1df   :  { %2733 = vmatprep.mubr.bf16.mxu0 %v5710_v49  ;;  %4590 = vmatpush3.bf16.msra.mxu0 %v5138_v0 }
 0x1e0   :  { %2950 = vmatmul.mubr.bf16.gmra.mrb[72].mxu1 %v5651_v38  ;;  %4591 = vmatprep.subr.bf16.mxu0 %v5140_v51  ;;  %v5150_v38 = vld [vmem:[#allocation4 + $0x38] sm:$0xff]  }
 0x1e1   :  { %2959 = vmatprep.mubr.bf16.mxu1 %v5710_v49  ;;  %4654 = vmatpush3.bf16.msra.mxu1 %v5139_v5  ;;  %v5152_v49 = vld [vmem:[#allocation4 + $0x140] sm:$0xff]  }
 0x1e2   :  { %4655 = vmatprep.subr.bf16.mxu1 %v5141_v17 }
 0x1e3   :  { %4592 = vmatpush3.bf16.msra.mxu0 %v5142_v43 }
 0x1e4   :  { %4593 = vmatprep.subr.bf16.mxu0 %v5144_v45 }
 0x1e5   :  { %4656 = vmatpush3.bf16.msra.mxu1 %v5143_v6 }
 0x1e6   :  { %2734 = vmatmul.mubr.bf16.gmra.mrb[76].mxu0 %v5703_v41  ;;  %4657 = vmatprep.subr.bf16.mxu1 %v5145_v48  ;;  %v5157_v48 = vld [vmem:[#allocation4 + $0x108] sm:$0xff]  }
 0x1e7   :  { %2743 = vmatprep.mubr.bf16.mxu0 %v5762_v62  ;;  %4594 = vmatpush3.bf16.msra.mxu0 %v5146_v36  ;;  %v5159_v36 = vld [vmem:[#allocation4 + $0x188] sm:$0xff]  }
 0x1e8   :  { %2960 = vmatmul.mubr.bf16.gmra.mrb[76].mxu1 %v5703_v41  ;;  %4595 = vmatprep.subr.bf16.mxu0 %v5148_v15  ;;  %v5951_v41 = vld [vmem:[%s6254_s4] sm:$0xff] }
 0x1e9   :  { %2969 = vmatprep.mubr.bf16.mxu1 %v5762_v62  ;;  %4658 = vmatpush3.bf16.msra.mxu1 %v5147_v21  ;;  %v5961_v62 = vrot.slane %v5951_v41, %v91_v40 }
 0x1ea   :  { %4659 = vmatprep.subr.bf16.mxu1 %v5149_v57 }
 0x1eb   :  { %4596 = vmatpush3.bf16.msra.mxu0 %v5150_v38 }
 0x1ec   :  { %4709 = vmatprep.subr.bf16.mxu0 %v5152_v49  ;;  %v5160_v49 = vld [vmem:[#allocation4 + $0x150] sm:$0xff]  }
 0x1ed   :  { %4660 = vmatpush3.bf16.msra.mxu1 %v5151_v16  ;;  %v5162_v16 = vld [vmem:[#allocation4 + $0x1d0] sm:$0xff]  }
 0x1ee   :  { %2744 = vmatmul.mubr.bf16.gmra.mrb[80].mxu0 %v5755_v56  ;;  %4773 = vmatprep.subr.bf16.mxu1 %v5154_v2 }
 0x1ef   :  { %2753 = vmatprep.mubr.bf16.mxu0 %v5814_v7 }
 0x1f0   :  { %2970 = vmatmul.mubr.bf16.gmra.mrb[80].mxu1 %v5755_v56  ;;  %v5956_v56 = vrot.slane %v5951_v41, %v83_v28 }
 0x1f1   :  { %2979 = vmatprep.mubr.bf16.mxu1 %v5814_v7  ;;  %v6259_v7 = vsub.s32 3, %v5459_v27 }
 0x1f6   :  { %2754 = vmatmul.mubr.bf16.gmra.mrb[84].mxu0 %v5807_v8 }
 0x1f7   :  { %2763 = vmatprep.mubr.bf16.mxu0 %v5840_v34 }
 0x1f8   :  { %2980 = vmatmul.mubr.bf16.gmra.mrb[84].mxu1 %v5807_v8  ;;  %v5966_v8 = vrot.slane %v5951_v41, %v87_v30 }
 0x1f9   :  { %2989 = vmatprep.mubr.bf16.mxu1 %v5840_v34 }
 0x1fe   :  { %2764 = vmatmul.mubr.bf16.gmra.mrb[88].mxu0 %v5836_v33 }
 0x1ff   :  { %2773 = vmatprep.mubr.bf16.mxu0 %v5852_v23 }
 0x200   :  { %2990 = vmatmul.mubr.bf16.gmra.mrb[88].mxu1 %v5836_v33  ;;  %v5971_v33 = vrot.slane %v5951_v41, %v6259_v7 }
 0x201   :  { %2999 = vmatprep.mubr.bf16.mxu1 %v5852_v23 }
 0x206   :  { %2774 = vmatmul.mubr.bf16.gmra.mrb[92].mxu0 %v5850_v31 }
 0x208   :  { %3000 = vmatmul.mubr.bf16.gmra.mrb[92].mxu1 %v5850_v31 }
 0x221   :  { %v2253_v34 = vpop.f32.mrb[32].mxu0  ;;  %v2479_v31 = vpop.f32.mrb[32].mxu1 }
 0x222   :  { %v4837_v28 = vadd.f32 %v2253_v34, %v5956_v56  ;;  %v4869_v23 = vadd.f32 %v2479_v31, %v5961_v62  ;;  %v2255_v1 = vpop.f32.mrb[33].mxu0  ;;  %v2481_v3 = vpop.f32.mrb[33].mxu1 }
 0x223   :  { %v4838_v40 = vadd.f32 %v2255_v1, %v5966_v8  ;;  %v4870_v20 = vadd.f32 %v2481_v3, %v5971_v33  ;;  %v2257_v42 = vpop.f32.mrb[34].mxu0  ;;  %v2483_v30 = vpop.f32.mrb[34].mxu1 }
 0x224   :  { %v4839_v59 = vadd.f32 %v2257_v42, %v5956_v56  ;;  %v4871_v13 = vadd.f32 %v2483_v30, %v5961_v62  ;;  %v2259_v37 = vpop.f32.mrb[35].mxu0  ;;  %v2485_v24 = vpop.f32.mrb[35].mxu1  ;;  %v3010_v29 = vmax.f32 %v4837_v28, 0.0  ;;  %v3012_v60 = vmax.f32 %v4869_v23, 0.0  ;;  %v5161_v42 = vld [vmem:[#allocation4 + $0x110] sm:$0xff]  }
 0x225   :  { %v4840_v63 = vadd.f32 %v2259_v37, %v5966_v8  ;;  %v4872_v19 = vadd.f32 %v2485_v24, %v5971_v33  ;;  %v3011_v55 = vmax.f32 %v4838_v40, 0.0  ;;  %v3013_v39 = vmax.f32 %v4870_v20, 0.0  ;;  %v5163_v30 = vld [vmem:[#allocation4 + $0x190] sm:$0xff]  }
 0x226   :  { %v3018_v61 = vmax.f32 %v4839_v59, 0.0  ;;  %v3020_v54 = vmax.f32 %v4871_v13, 0.0 }
 0x227   :  { %v3019_v22 = vmax.f32 %v4840_v63, 0.0  ;;  %v3021_v53 = vmax.f32 %v4872_v19, 0.0  ;;  %v5164_v63 = vld [vmem:[#allocation4 + $0x158] sm:$0xff]  }
 0x228   :  { %v3138_v46 = vpack.c.bf16 %v3018_v61, %v3010_v29  ;;  %v3140_v26 = vpack.c.bf16 %v3020_v54, %v3012_v60  ;;  %v5166_v19 = vld [vmem:[#allocation4 + $0x1d8] sm:$0xff]  }
 0x229   :  { %v3139_v10 = vpack.c.bf16 %v3019_v22, %v3011_v55  ;;  %v3141_v32 = vpack.c.bf16 %v3021_v53, %v3013_v39  ;;  %v2263_v11 = vpop.f32.mrb[36].mxu0  ;;  %v2489_v58 = vpop.f32.mrb[36].mxu1 }
 0x22a   :  { %v4841_v25 = vadd.f32 %v2263_v11, %v5956_v56  ;;  %v4873_v4 = vadd.f32 %v2489_v58, %v5961_v62  ;;  %v2265_v44 = vpop.f32.mrb[37].mxu0  ;;  %v2491_v35 = vpop.f32.mrb[37].mxu1 }
 0x22b   :  { %v4842_v47 = vadd.f32 %v2265_v44, %v5966_v8  ;;  %v4874_v52 = vadd.f32 %v2491_v35, %v5971_v33  ;;  %v2267_v18 = vpop.f32.mrb[38].mxu0  ;;  %v2493_v0 = vpop.f32.mrb[38].mxu1  ;;  %3753 = vmatprep.mubr.bf16.mxu0 %v3139_v10  ;;  %3850 = vmatprep.mubr.bf16.mxu1 %v3141_v32  ;;  %v5165_v10 = vld [vmem:[#allocation4 + $0x118] sm:$0xff]  }
 0x22c   :  { %v4843_v51 = vadd.f32 %v2267_v18, %v5956_v56  ;;  %v4875_v5 = vadd.f32 %v2493_v0, %v5961_v62  ;;  %v2269_v17 = vpop.f32.mrb[39].mxu0  ;;  %v2495_v43 = vpop.f32.mrb[39].mxu1  ;;  %3754 = vmatmul.mubr.bf16.vlgmr.msra.gmra.mrb[96].mxu0 %v3138_v46  ;;  %3851 = vmatmul.mubr.bf16.vlgmr.msra.gmra.mrb[96].mxu1 %v3140_v26  ;;  %v3026_v15 = vmax.f32 %v4841_v25, 0.0  ;;  %v3028_v21 = vmax.f32 %v4873_v4, 0.0  ;;  %v5167_v32 = vld [vmem:[#allocation4 + $0x198] sm:$0xff]   ;;  %v5168_v25 = vld [vmem:[#allocation4 + $0x160] sm:$0xff]  }
 0x22d   :  { %v4844_v45 = vadd.f32 %v2269_v17, %v5966_v8  ;;  %v4876_v6 = vadd.f32 %v2495_v43, %v5971_v33  ;;  %4710 = vmatpush3.bf16.msra.mxu0 %v5153_v14  ;;  %4774 = vmatpush3.bf16.msra.mxu1 %v5155_v12  ;;  %v3027_v2 = vmax.f32 %v4842_v47, 0.0  ;;  %v3029_v7 = vmax.f32 %v4874_v52, 0.0  ;;  %v5170_v4 = vld [vmem:[#allocation4 + $0x1e0] sm:$0xff]  }
 0x22e   :  { %v3034_v57 = vmax.f32 %v4843_v51, 0.0  ;;  %v3036_v38 = vmax.f32 %v4875_v5, 0.0  ;;  %4711 = vmatprep.subr.bf16.mxu0 %v5156_v9  ;;  %4775 = vmatprep.subr.bf16.mxu1 %v5158_v50  ;;  %v5169_v17 = vld [vmem:[#allocation4 + $0x120] sm:$0xff]  }
 0x22f   :  { %v3035_v34 = vmax.f32 %v4844_v45, 0.0  ;;  %v3037_v31 = vmax.f32 %v4876_v6, 0.0  ;;  %v5171_v43 = vld [vmem:[#allocation4 + $0x1a0] sm:$0xff]  }
 0x230   :  { %v3146_v28 = vpack.c.bf16 %v3034_v57, %v3026_v15  ;;  %v3148_v23 = vpack.c.bf16 %v3036_v38, %v3028_v21  ;;  %v5172_v15 = vld [vmem:[#allocation4 + $0x168] sm:$0xff]  }
 0x231   :  { %v3147_v1 = vpack.c.bf16 %v3035_v34, %v3027_v2  ;;  %v3149_v3 = vpack.c.bf16 %v3037_v31, %v3029_v7  ;;  %v2273_v40 = vpop.f32.mrb[40].mxu0  ;;  %v2499_v20 = vpop.f32.mrb[40].mxu1  ;;  %4712 = vmatpush3.bf16.msra.mxu0 %v5157_v48  ;;  %4776 = vmatpush3.bf16.msra.mxu1 %v5159_v36  ;;  %v5174_v21 = vld [vmem:[#allocation4 + $0x1e8] sm:$0xff]  }
 0x232   :  { %v4845_v59 = vadd.f32 %v2273_v40, %v5956_v56  ;;  %v4877_v13 = vadd.f32 %v2499_v20, %v5961_v62  ;;  %v2275_v37 = vpop.f32.mrb[41].mxu0  ;;  %v2501_v24 = vpop.f32.mrb[41].mxu1  ;;  %4713 = vmatprep.subr.bf16.mxu0 %v5160_v49  ;;  %4777 = vmatprep.subr.bf16.mxu1 %v5162_v16 }
 0x233   :  { %v4846_v29 = vadd.f32 %v2275_v37, %v5966_v8  ;;  %v4878_v60 = vadd.f32 %v2501_v24, %v5971_v33  ;;  %v2277_v61 = vpop.f32.mrb[42].mxu0  ;;  %v2503_v54 = vpop.f32.mrb[42].mxu1  ;;  %3761 = vmatprep.mubr.bf16.mxu0 %v3147_v1  ;;  %3858 = vmatprep.mubr.bf16.mxu1 %v3149_v3  ;;  %v5173_v1 = vld [vmem:[#allocation4 + $0x128] sm:$0xff]  }
 0x234   :  { %v4847_v55 = vadd.f32 %v2277_v61, %v5956_v56  ;;  %v4879_v39 = vadd.f32 %v2503_v54, %v5961_v62  ;;  %v2279_v22 = vpop.f32.mrb[43].mxu0  ;;  %v2505_v53 = vpop.f32.mrb[43].mxu1  ;;  %3762 = vmatmul.mubr.bf16.gmra.mrb[100].mxu0 %v3146_v28  ;;  %3859 = vmatmul.mubr.bf16.gmra.mrb[100].mxu1 %v3148_v23  ;;  %v3042_v11 = vmax.f32 %v4845_v59, 0.0  ;;  %v3044_v58 = vmax.f32 %v4877_v13, 0.0  ;;  %v5175_v3 = vld [vmem:[#allocation4 + $0x1a8] sm:$0xff]   ;;  %v5176_v59 = vld [vmem:[#allocation4 + $0x170] sm:$0xff]  }
 0x235   :  { %v4848_v46 = vadd.f32 %v2279_v22, %v5966_v8  ;;  %v4880_v26 = vadd.f32 %v2505_v53, %v5971_v33  ;;  %4714 = vmatpush3.bf16.msra.mxu0 %v5161_v42  ;;  %4778 = vmatpush3.bf16.msra.mxu1 %v5163_v30  ;;  %v3043_v44 = vmax.f32 %v4846_v29, 0.0  ;;  %v3045_v35 = vmax.f32 %v4878_v60, 0.0  ;;  %v5178_v13 = vld [vmem:[#allocation4 + $0x1f0] sm:$0xff]  }
 0x236   :  { %v3050_v14 = vmax.f32 %v4847_v55, 0.0  ;;  %v3052_v12 = vmax.f32 %v4879_v39, 0.0  ;;  %4715 = vmatprep.subr.bf16.mxu0 %v5164_v63  ;;  %4779 = vmatprep.subr.bf16.mxu1 %v5166_v19  ;;  %v5177_v22 = vld [vmem:[#allocation4 + $0x130] sm:$0xff]  }
 0x237   :  { %v3051_v9 = vmax.f32 %v4848_v46, 0.0  ;;  %v3053_v50 = vmax.f32 %v4880_v26, 0.0  ;;  %v5179_v53 = vld [vmem:[#allocation4 + $0x1b0] sm:$0xff]  }
 0x238   :  { %v3154_v47 = vpack.c.bf16 %v3050_v14, %v3042_v11  ;;  %v3156_v52 = vpack.c.bf16 %v3052_v12, %v3044_v58  ;;  %v5180_v11 = vld [vmem:[#allocation4 + $0x178] sm:$0xff]  }
 0x239   :  { %v3155_v18 = vpack.c.bf16 %v3051_v9, %v3043_v44  ;;  %v3157_v0 = vpack.c.bf16 %v3053_v50, %v3045_v35  ;;  %v2283_v51 = vpop.f32.mrb[44].mxu0  ;;  %v2509_v5 = vpop.f32.mrb[44].mxu1  ;;  %4716 = vmatpush3.bf16.msra.mxu0 %v5165_v10  ;;  %4780 = vmatpush3.bf16.msra.mxu1 %v5167_v32  ;;  %v5182_v58 = vld [vmem:[#allocation4 + $0x1f8] sm:$0xff]  }
 0x23a   :  { %v4849_v45 = vadd.f32 %v2283_v51, %v5956_v56  ;;  %v4881_v6 = vadd.f32 %v2509_v5, %v5961_v62  ;;  %v2285_v48 = vpop.f32.mrb[45].mxu0  ;;  %v2511_v36 = vpop.f32.mrb[45].mxu1  ;;  %4717 = vmatprep.subr.bf16.mxu0 %v5168_v25  ;;  %4781 = vmatprep.subr.bf16.mxu1 %v5170_v4 }
 0x23b   :  { %v4850_v57 = vadd.f32 %v2285_v48, %v5966_v8  ;;  %v4882_v38 = vadd.f32 %v2511_v36, %v5971_v33  ;;  %v2287_v49 = vpop.f32.mrb[46].mxu0  ;;  %v2513_v16 = vpop.f32.mrb[46].mxu1  ;;  %3769 = vmatprep.mubr.bf16.mxu0 %v3155_v18  ;;  %3866 = vmatprep.mubr.bf16.mxu1 %v3157_v0  ;;  %v5181_v18 = vld [vmem:[#allocation4 + $0x138] sm:$0xff]  }
 0x23c   :  { %v4851_v2 = vadd.f32 %v2287_v49, %v5956_v56  ;;  %v4883_v7 = vadd.f32 %v2513_v16, %v5961_v62  ;;  %v2289_v34 = vpop.f32.mrb[47].mxu0  ;;  %v2515_v31 = vpop.f32.mrb[47].mxu1  ;;  %3770 = vmatmul.mubr.bf16.gmra.mrb[104].mxu0 %v3154_v47  ;;  %3867 = vmatmul.mubr.bf16.gmra.mrb[104].mxu1 %v3156_v52  ;;  %v3058_v40 = vmax.f32 %v4849_v45, 0.0  ;;  %v3060_v20 = vmax.f32 %v4881_v6, 0.0  ;;  %v5183_v0 = vld [vmem:[#allocation4 + $0x1b8] sm:$0xff]  }
 0x23d   :  { %v4852_v28 = vadd.f32 %v2289_v34, %v5966_v8  ;;  %v4884_v23 = vadd.f32 %v2515_v31, %v5971_v33  ;;  %4718 = vmatpush3.bf16.msra.mxu0 %v5169_v17  ;;  %4782 = vmatpush3.bf16.msra.mxu1 %v5171_v43  ;;  %v3059_v37 = vmax.f32 %v4850_v57, 0.0  ;;  %v3061_v24 = vmax.f32 %v4882_v38, 0.0 }
 0x23e   :  { %v3066_v42 = vmax.f32 %v4851_v2, 0.0  ;;  %v3068_v30 = vmax.f32 %v4883_v7, 0.0  ;;  %4719 = vmatprep.subr.bf16.mxu0 %v5172_v15  ;;  %4783 = vmatprep.subr.bf16.mxu1 %v5174_v21 }
 0x23f   :  { %v3067_v63 = vmax.f32 %v4852_v28, 0.0  ;;  %v3069_v19 = vmax.f32 %v4884_v23, 0.0 }
 0x240   :  { %v3162_v29 = vpack.c.bf16 %v3066_v42, %v3058_v40  ;;  %v3164_v60 = vpack.c.bf16 %v3068_v30, %v3060_v20 }
 0x241   :  { %v3163_v61 = vpack.c.bf16 %v3067_v63, %v3059_v37  ;;  %v3165_v54 = vpack.c.bf16 %v3069_v19, %v3061_v24  ;;  %v2293_v55 = vpop.f32.mrb[48].mxu0  ;;  %v2519_v39 = vpop.f32.mrb[48].mxu1  ;;  %4720 = vmatpush3.bf16.msra.mxu0 %v5173_v1  ;;  %4784 = vmatpush3.bf16.msra.mxu1 %v5175_v3 }
 0x242   :  { %v4853_v46 = vadd.f32 %v2293_v55, %v5956_v56  ;;  %v4885_v26 = vadd.f32 %v2519_v39, %v5961_v62  ;;  %v2295_v10 = vpop.f32.mrb[49].mxu0  ;;  %v2521_v32 = vpop.f32.mrb[49].mxu1  ;;  %4721 = vmatprep.subr.bf16.mxu0 %v5176_v59  ;;  %4785 = vmatprep.subr.bf16.mxu1 %v5178_v13 }
 0x243   :  { %v4854_v14 = vadd.f32 %v2295_v10, %v5966_v8  ;;  %v4886_v12 = vadd.f32 %v2521_v32, %v5971_v33  ;;  %v2297_v25 = vpop.f32.mrb[50].mxu0  ;;  %v2523_v4 = vpop.f32.mrb[50].mxu1  ;;  %3777 = vmatprep.mubr.bf16.mxu0 %v3163_v61  ;;  %3874 = vmatprep.mubr.bf16.mxu1 %v3165_v54 }
 0x244   :  { %v4855_v44 = vadd.f32 %v2297_v25, %v5956_v56  ;;  %v4887_v35 = vadd.f32 %v2523_v4, %v5961_v62  ;;  %v2299_v9 = vpop.f32.mrb[51].mxu0  ;;  %v2525_v50 = vpop.f32.mrb[51].mxu1  ;;  %3778 = vmatmul.mubr.bf16.gmra.mrb[108].mxu0 %v3162_v29  ;;  %3875 = vmatmul.mubr.bf16.gmra.mrb[108].mxu1 %v3164_v60  ;;  %v3074_v51 = vmax.f32 %v4853_v46, 0.0  ;;  %v3076_v5 = vmax.f32 %v4885_v26, 0.0 }
 0x245   :  { %v4856_v47 = vadd.f32 %v2299_v9, %v5966_v8  ;;  %v4888_v52 = vadd.f32 %v2525_v50, %v5971_v33  ;;  %4722 = vmatpush3.bf16.msra.mxu0 %v5177_v22  ;;  %4786 = vmatpush3.bf16.msra.mxu1 %v5179_v53  ;;  %v3075_v45 = vmax.f32 %v4854_v14, 0.0  ;;  %v3077_v6 = vmax.f32 %v4886_v12, 0.0 }
 0x246   :  { %v3082_v17 = vmax.f32 %v4855_v44, 0.0  ;;  %v3084_v43 = vmax.f32 %v4887_v35, 0.0  ;;  %4723 = vmatprep.subr.bf16.mxu0 %v5180_v11  ;;  %4787 = vmatprep.subr.bf16.mxu1 %v5182_v58 }
 0x247   :  { %v3083_v48 = vmax.f32 %v4856_v47, 0.0  ;;  %v3085_v36 = vmax.f32 %v4888_v52, 0.0 }
 0x248   :  { %v3170_v15 = vpack.c.bf16 %v3082_v17, %v3074_v51  ;;  %v3172_v21 = vpack.c.bf16 %v3084_v43, %v3076_v5 }
 0x249   :  { %v3171_v57 = vpack.c.bf16 %v3083_v48, %v3075_v45  ;;  %v3173_v38 = vpack.c.bf16 %v3085_v36, %v3077_v6  ;;  %v2303_v49 = vpop.f32.mrb[52].mxu0  ;;  %v2529_v16 = vpop.f32.mrb[52].mxu1  ;;  %4724 = vmatpush3.bf16.msra.mxu0 %v5181_v18  ;;  %4788 = vmatpush3.bf16.msra.mxu1 %v5183_v0 }
 0x24a   :  { %v4857_v2 = vadd.f32 %v2303_v49, %v5956_v56  ;;  %v4889_v7 = vadd.f32 %v2529_v16, %v5961_v62  ;;  %v2305_v34 = vpop.f32.mrb[53].mxu0  ;;  %v2531_v31 = vpop.f32.mrb[53].mxu1 }
 0x24b   :  { %v4858_v28 = vadd.f32 %v2305_v34, %v5966_v8  ;;  %v4890_v23 = vadd.f32 %v2531_v31, %v5971_v33  ;;  %v2307_v1 = vpop.f32.mrb[54].mxu0  ;;  %v2533_v3 = vpop.f32.mrb[54].mxu1  ;;  %3785 = vmatprep.mubr.bf16.mxu0 %v3171_v57  ;;  %3882 = vmatprep.mubr.bf16.mxu1 %v3173_v38 }
 0x24c   :  { %v4859_v40 = vadd.f32 %v2307_v1, %v5956_v56  ;;  %v4891_v20 = vadd.f32 %v2533_v3, %v5961_v62  ;;  %v2309_v42 = vpop.f32.mrb[55].mxu0  ;;  %v2535_v30 = vpop.f32.mrb[55].mxu1  ;;  %3786 = vmatmul.mubr.bf16.gmra.mrb[112].mxu0 %v3170_v15  ;;  %3883 = vmatmul.mubr.bf16.gmra.mrb[112].mxu1 %v3172_v21  ;;  %v3090_v37 = vmax.f32 %v4857_v2, 0.0  ;;  %v3092_v24 = vmax.f32 %v4889_v7, 0.0 }
 0x24d   :  { %v4860_v59 = vadd.f32 %v2309_v42, %v5966_v8  ;;  %v4892_v13 = vadd.f32 %v2535_v30, %v5971_v33  ;;  %v3091_v29 = vmax.f32 %v4858_v28, 0.0  ;;  %v3093_v60 = vmax.f32 %v4890_v23, 0.0 }
 0x24e   :  { %v3098_v63 = vmax.f32 %v4859_v40, 0.0  ;;  %v3100_v19 = vmax.f32 %v4891_v20, 0.0 }
 0x24f   :  { %v3099_v61 = vmax.f32 %v4860_v59, 0.0  ;;  %v3101_v54 = vmax.f32 %v4892_v13, 0.0 }
 0x250   :  { %v3178_v55 = vpack.c.bf16 %v3098_v63, %v3090_v37  ;;  %v3180_v39 = vpack.c.bf16 %v3100_v19, %v3092_v24 }
 0x251   :  { %v3179_v22 = vpack.c.bf16 %v3099_v61, %v3091_v29  ;;  %v3181_v53 = vpack.c.bf16 %v3101_v54, %v3093_v60  ;;  %v2313_v46 = vpop.f32.mrb[56].mxu0  ;;  %v2539_v26 = vpop.f32.mrb[56].mxu1 }
 0x252   :  { %v4861_v10 = vadd.f32 %v2313_v46, %v5956_v56  ;;  %v4893_v32 = vadd.f32 %v2539_v26, %v5961_v62  ;;  %v2315_v11 = vpop.f32.mrb[57].mxu0  ;;  %v2541_v58 = vpop.f32.mrb[57].mxu1 }
 0x253   :  { %v4862_v14 = vadd.f32 %v2315_v11, %v5966_v8  ;;  %v4894_v12 = vadd.f32 %v2541_v58, %v5971_v33  ;;  %v2317_v25 = vpop.f32.mrb[58].mxu0  ;;  %v2543_v4 = vpop.f32.mrb[58].mxu1  ;;  %3793 = vmatprep.mubr.bf16.mxu0 %v3179_v22  ;;  %3890 = vmatprep.mubr.bf16.mxu1 %v3181_v53 }
 0x254   :  { %v4863_v44 = vadd.f32 %v2317_v25, %v5956_v56  ;;  %v4895_v35 = vadd.f32 %v2543_v4, %v5961_v62  ;;  %v2319_v9 = vpop.f32.mrb[59].mxu0  ;;  %v2545_v50 = vpop.f32.mrb[59].mxu1  ;;  %3794 = vmatmul.mubr.bf16.gmra.mrb[116].mxu0 %v3178_v55  ;;  %3891 = vmatmul.mubr.bf16.gmra.mrb[116].mxu1 %v3180_v39  ;;  %v3106_v18 = vmax.f32 %v4861_v10, 0.0  ;;  %v3108_v0 = vmax.f32 %v4893_v32, 0.0 }
 0x255   :  { %v4864_v47 = vadd.f32 %v2319_v9, %v5966_v8  ;;  %v4896_v52 = vadd.f32 %v2545_v50, %v5971_v33  ;;  %v3107_v17 = vmax.f32 %v4862_v14, 0.0  ;;  %v3109_v43 = vmax.f32 %v4894_v12, 0.0 }
 0x256   :  { %v3114_v51 = vmax.f32 %v4863_v44, 0.0  ;;  %v3116_v5 = vmax.f32 %v4895_v35, 0.0  ;;  %v812_v55 = vsub.s32 6, %v5459_v27  ;;  %v816_v39 = vsub.s32 7, %v5459_v27 }
 0x257   :  { %v3115_v45 = vmax.f32 %v4864_v47, 0.0  ;;  %v3117_v6 = vmax.f32 %v4896_v52, 0.0 }
 0x258   :  { %v3186_v48 = vpack.c.bf16 %v3114_v51, %v3106_v18  ;;  %v3188_v36 = vpack.c.bf16 %v3116_v5, %v3108_v0  ;;  %v6048_v46 = vrot.slane %v5951_v41, %v812_v55  ;;  %v6051_v10 = vrot.slane %v5951_v41, %v816_v39 }
 0x259   :  { %v3187_v15 = vpack.c.bf16 %v3115_v45, %v3107_v17  ;;  %v3189_v21 = vpack.c.bf16 %v3117_v6, %v3109_v43  ;;  %v2323_v57 = vpop.f32.mrb[60].mxu0  ;;  %v2549_v38 = vpop.f32.mrb[60].mxu1 }
 0x25a   :  { %v4865_v49 = vadd.f32 %v2323_v57, %v5956_v56  ;;  %v4897_v16 = vadd.f32 %v2549_v38, %v5961_v62  ;;  %v2325_v2 = vpop.f32.mrb[61].mxu0  ;;  %v2551_v7 = vpop.f32.mrb[61].mxu1 }
 0x25b   :  { %v4866_v34 = vadd.f32 %v2325_v2, %v5966_v8  ;;  %v4898_v31 = vadd.f32 %v2551_v7, %v5971_v33  ;;  %v2327_v28 = vpop.f32.mrb[62].mxu0  ;;  %v2553_v23 = vpop.f32.mrb[62].mxu1  ;;  %3801 = vmatprep.mubr.bf16.mxu0 %v3187_v15  ;;  %3898 = vmatprep.mubr.bf16.mxu1 %v3189_v21 }
 0x25c   :  { %v4867_v1 = vadd.f32 %v2327_v28, %v5956_v56  ;;  %v4899_v3 = vadd.f32 %v2553_v23, %v5961_v62  ;;  %v2329_v40 = vpop.f32.mrb[63].mxu0  ;;  %v2555_v20 = vpop.f32.mrb[63].mxu1  ;;  %3802 = vmatmul.mubr.bf16.gmra.mrb[120].mxu0 %v3186_v48  ;;  %3899 = vmatmul.mubr.bf16.gmra.mrb[120].mxu1 %v3188_v36  ;;  %v3122_v59 = vmax.f32 %v4865_v49, 0.0  ;;  %v3124_v13 = vmax.f32 %v4897_v16, 0.0 }
 0x25d   :  { %v4868_v42 = vadd.f32 %v2329_v40, %v5966_v8  ;;  %v4900_v30 = vadd.f32 %v2555_v20, %v5971_v33  ;;  %v3123_v63 = vmax.f32 %v4866_v34, 0.0  ;;  %v3125_v19 = vmax.f32 %v4898_v31, 0.0 }
 0x25e   :  { %v3130_v37 = vmax.f32 %v4867_v1, 0.0  ;;  %v3132_v24 = vmax.f32 %v4899_v3, 0.0  ;;  %v804_v8 = vsub.s32 4, %v5459_v27  ;;  %v808_v33 = vsub.s32 5, %v5459_v27 }
 0x25f   :  { %v3131_v29 = vmax.f32 %v4868_v42, 0.0  ;;  %v3133_v60 = vmax.f32 %v4900_v30, 0.0 }
 0x260   :  { %v3194_v61 = vpack.c.bf16 %v3130_v37, %v3122_v59  ;;  %v3196_v56 = vpack.c.bf16 %v3132_v24, %v3124_v13  ;;  %v6042_v22 = vrot.slane %v5951_v41, %v804_v8  ;;  %v6045_v53 = vrot.slane %v5951_v41, %v808_v33 }
 0x261   :  { %v3195_v54 = vpack.c.bf16 %v3131_v29, %v3123_v63  ;;  %v3197_v62 = vpack.c.bf16 %v3133_v60, %v3125_v19 }
 0x263   :  { %3809 = vmatprep.mubr.bf16.mxu0 %v3195_v54  ;;  %3906 = vmatprep.mubr.bf16.mxu1 %v3197_v62 }
 0x264   :  { %3810 = vmatmul.mubr.bf16.gmra.mrb[124].mxu0 %v3194_v61  ;;  %3907 = vmatmul.mubr.bf16.gmra.mrb[124].mxu1 %v3196_v56 }
 0x2a1   :  { %v2705_v26 = vpop.f32.mrb[64].mxu0 }
 0x2a2   :  { %v4901_v32 = vadd.f32 %v2705_v26, %v6042_v22  ;;  %v2707_v11 = vpop.f32.mrb[65].mxu0 }
 0x2a3   :  { %v2931_v58 = vpop.f32.mrb[64].mxu1  ;;  %v4902_v14 = vadd.f32 %v2707_v11, %v6045_v53  ;;  %v2709_v27 = vpop.f32.mrb[66].mxu0 }
 0x2a4   :  { %v4933_v12 = vadd.f32 %v2931_v58, %v6048_v46  ;;  %v2933_v25 = vpop.f32.mrb[65].mxu1  ;;  %v4903_v4 = vadd.f32 %v2709_v27, %v6042_v22  ;;  %v2711_v44 = vpop.f32.mrb[67].mxu0  ;;  %v3014_v41 = vmax.f32 %v4901_v32, 0.0 }
 0x2a5   :  { %v4934_v35 = vadd.f32 %v2933_v25, %v6051_v10  ;;  %v2935_v9 = vpop.f32.mrb[66].mxu1  ;;  %v4904_v50 = vadd.f32 %v2711_v44, %v6045_v53  ;;  %v3015_v0 = vmax.f32 %v4902_v14, 0.0 }
 0x2a6   :  { %v3022_v47 = vmax.f32 %v4903_v4, 0.0  ;;  %v4935_v52 = vadd.f32 %v2935_v9, %v6048_v46  ;;  %v2937_v18 = vpop.f32.mrb[67].mxu1  ;;  %v3016_v17 = vmax.f32 %v4933_v12, 0.0 }
 0x2a7   :  { %v3023_v51 = vmax.f32 %v4904_v50, 0.0  ;;  %v4936_v5 = vadd.f32 %v2937_v18, %v6051_v10  ;;  %v3017_v6 = vmax.f32 %v4934_v35, 0.0 }
 0x2a8   :  { %v3142_v43 = vpack.c.bf16 %v3022_v47, %v3014_v41  ;;  %v3024_v45 = vmax.f32 %v4935_v52, 0.0 }
 0x2a9   :  { %v3143_v48 = vpack.c.bf16 %v3023_v51, %v3015_v0  ;;  %v3025_v36 = vmax.f32 %v4936_v5, 0.0  ;;  %v2715_v15 = vpop.f32.mrb[68].mxu0 }
 0x2aa   :  { %v3144_v21 = vpack.c.bf16 %v3024_v45, %v3016_v17  ;;  %v4905_v57 = vadd.f32 %v2715_v15, %v6042_v22  ;;  %v2717_v38 = vpop.f32.mrb[69].mxu0 }
 0x2ab   :  { %v3145_v49 = vpack.c.bf16 %v3025_v36, %v3017_v6  ;;  %v2941_v16 = vpop.f32.mrb[68].mxu1  ;;  %v4906_v2 = vadd.f32 %v2717_v38, %v6045_v53  ;;  %v2719_v7 = vpop.f32.mrb[70].mxu0  ;;  %3947 = vmatprep.mubr.bf16.mxu0 %v3143_v48 }
 0x2ac   :  { %v4937_v34 = vadd.f32 %v2941_v16, %v6048_v46  ;;  %v2943_v31 = vpop.f32.mrb[69].mxu1  ;;  %v4907_v28 = vadd.f32 %v2719_v7, %v6042_v22  ;;  %v2721_v23 = vpop.f32.mrb[71].mxu0  ;;  %3948 = vmatmul.mubr.bf16.vlgmr.msra.gmra.mrb[128].mxu0 %v3142_v43  ;;  %v3030_v20 = vmax.f32 %v4905_v57, 0.0 }
 0x2ad   :  { %v4938_v1 = vadd.f32 %v2943_v31, %v6051_v10  ;;  %v2945_v3 = vpop.f32.mrb[70].mxu1  ;;  %4044 = vmatprep.mubr.bf16.mxu1 %v3145_v49  ;;  %v4908_v40 = vadd.f32 %v2721_v23, %v6045_v53  ;;  %v3031_v13 = vmax.f32 %v4906_v2, 0.0 }
 0x2ae   :  { %v3038_v42 = vmax.f32 %v4907_v28, 0.0  ;;  %v4939_v30 = vadd.f32 %v2945_v3, %v6048_v46  ;;  %v2947_v59 = vpop.f32.mrb[71].mxu1  ;;  %4045 = vmatmul.mubr.bf16.vlgmr.msra.gmra.mrb[128].mxu1 %v3144_v21  ;;  %v3032_v63 = vmax.f32 %v4937_v34, 0.0 }
 0x2af   :  { %v3039_v37 = vmax.f32 %v4908_v40, 0.0  ;;  %v4940_v24 = vadd.f32 %v2947_v59, %v6051_v10  ;;  %v3033_v60 = vmax.f32 %v4938_v1, 0.0 }
 0x2b0   :  { %v3150_v19 = vpack.c.bf16 %v3038_v42, %v3030_v20  ;;  %v3040_v29 = vmax.f32 %v4939_v30, 0.0 }
 0x2b1   :  { %v3151_v61 = vpack.c.bf16 %v3039_v37, %v3031_v13  ;;  %v3041_v56 = vmax.f32 %v4940_v24, 0.0  ;;  %v2725_v54 = vpop.f32.mrb[72].mxu0 }
 0x2b2   :  { %v3152_v62 = vpack.c.bf16 %v3040_v29, %v3032_v63  ;;  %v4909_v8 = vadd.f32 %v2725_v54, %v6042_v22  ;;  %v2727_v33 = vpop.f32.mrb[73].mxu0 }
 0x2b3   :  { %v3153_v55 = vpack.c.bf16 %v3041_v56, %v3033_v60  ;;  %v2951_v39 = vpop.f32.mrb[72].mxu1  ;;  %v4910_v26 = vadd.f32 %v2727_v33, %v6045_v53  ;;  %v2729_v32 = vpop.f32.mrb[74].mxu0  ;;  %3955 = vmatprep.mubr.bf16.mxu0 %v3151_v61 }
 0x2b4   :  { %v4941_v11 = vadd.f32 %v2951_v39, %v6048_v46  ;;  %v2953_v58 = vpop.f32.mrb[73].mxu1  ;;  %v4911_v14 = vadd.f32 %v2729_v32, %v6042_v22  ;;  %v2731_v27 = vpop.f32.mrb[75].mxu0  ;;  %3956 = vmatmul.mubr.bf16.gmra.mrb[132].mxu0 %v3150_v19  ;;  %v3046_v44 = vmax.f32 %v4909_v8, 0.0 }
 0x2b5   :  { %v4942_v12 = vadd.f32 %v2953_v58, %v6051_v10  ;;  %v2955_v25 = vpop.f32.mrb[74].mxu1  ;;  %4052 = vmatprep.mubr.bf16.mxu1 %v3153_v55  ;;  %v4912_v4 = vadd.f32 %v2731_v27, %v6045_v53  ;;  %v3047_v41 = vmax.f32 %v4910_v26, 0.0 }
 0x2b6   :  { %v3054_v35 = vmax.f32 %v4911_v14, 0.0  ;;  %v4943_v9 = vadd.f32 %v2955_v25, %v6048_v46  ;;  %v2957_v50 = vpop.f32.mrb[75].mxu1  ;;  %4053 = vmatmul.mubr.bf16.gmra.mrb[132].mxu1 %v3152_v62  ;;  %v3048_v18 = vmax.f32 %v4941_v11, 0.0 }
 0x2b7   :  { %v3055_v47 = vmax.f32 %v4912_v4, 0.0  ;;  %v4944_v52 = vadd.f32 %v2957_v50, %v6051_v10  ;;  %v3049_v5 = vmax.f32 %v4942_v12, 0.0 }
 0x2b8   :  { %v3158_v0 = vpack.c.bf16 %v3054_v35, %v3046_v44  ;;  %v3056_v51 = vmax.f32 %v4943_v9, 0.0 }
 0x2b9   :  { %v3159_v17 = vpack.c.bf16 %v3055_v47, %v3047_v41  ;;  %v3057_v43 = vmax.f32 %v4944_v52, 0.0  ;;  %v2735_v45 = vpop.f32.mrb[76].mxu0 }
 0x2ba   :  { %v3160_v6 = vpack.c.bf16 %v3056_v51, %v3048_v18  ;;  %v4913_v48 = vadd.f32 %v2735_v45, %v6042_v22  ;;  %v2737_v36 = vpop.f32.mrb[77].mxu0 }
 0x2bb   :  { %v3161_v15 = vpack.c.bf16 %v3057_v43, %v3049_v5  ;;  %v2961_v21 = vpop.f32.mrb[76].mxu1  ;;  %v4914_v57 = vadd.f32 %v2737_v36, %v6045_v53  ;;  %v2739_v38 = vpop.f32.mrb[78].mxu0  ;;  %3963 = vmatprep.mubr.bf16.mxu0 %v3159_v17 }
 0x2bc   :  { %v4945_v49 = vadd.f32 %v2961_v21, %v6048_v46  ;;  %v2963_v16 = vpop.f32.mrb[77].mxu1  ;;  %v4915_v2 = vadd.f32 %v2739_v38, %v6042_v22  ;;  %v2741_v7 = vpop.f32.mrb[79].mxu0  ;;  %3964 = vmatmul.mubr.bf16.gmra.mrb[136].mxu0 %v3158_v0  ;;  %v3062_v23 = vmax.f32 %v4913_v48, 0.0 }
 0x2bd   :  { %v4946_v34 = vadd.f32 %v2963_v16, %v6051_v10  ;;  %v2965_v31 = vpop.f32.mrb[78].mxu1  ;;  %4060 = vmatprep.mubr.bf16.mxu1 %v3161_v15  ;;  %v4916_v28 = vadd.f32 %v2741_v7, %v6045_v53  ;;  %v3063_v20 = vmax.f32 %v4914_v57, 0.0 }
 0x2be   :  { %v3070_v1 = vmax.f32 %v4915_v2, 0.0  ;;  %v4947_v3 = vadd.f32 %v2965_v31, %v6048_v46  ;;  %v2967_v40 = vpop.f32.mrb[79].mxu1  ;;  %4061 = vmatmul.mubr.bf16.gmra.mrb[136].mxu1 %v3160_v6  ;;  %v3064_v59 = vmax.f32 %v4945_v49, 0.0 }
 0x2bf   :  { %v3071_v42 = vmax.f32 %v4916_v28, 0.0  ;;  %v4948_v30 = vadd.f32 %v2967_v40, %v6051_v10  ;;  %v3065_v24 = vmax.f32 %v4946_v34, 0.0 }
 0x2c0   :  { %v3166_v13 = vpack.c.bf16 %v3070_v1, %v3062_v23  ;;  %v3072_v37 = vmax.f32 %v4947_v3, 0.0 }
 0x2c1   :  { %v3167_v63 = vpack.c.bf16 %v3071_v42, %v3063_v20  ;;  %v3073_v19 = vmax.f32 %v4948_v30, 0.0  ;;  %v2745_v29 = vpop.f32.mrb[80].mxu0 }
 0x2c2   :  { %v3168_v60 = vpack.c.bf16 %v3072_v37, %v3064_v59  ;;  %v4917_v61 = vadd.f32 %v2745_v29, %v6042_v22  ;;  %v2747_v56 = vpop.f32.mrb[81].mxu0 }
 0x2c3   :  { %v3169_v54 = vpack.c.bf16 %v3073_v19, %v3065_v24  ;;  %v2971_v62 = vpop.f32.mrb[80].mxu1  ;;  %v4918_v8 = vadd.f32 %v2747_v56, %v6045_v53  ;;  %v2749_v33 = vpop.f32.mrb[82].mxu0  ;;  %3971 = vmatprep.mubr.bf16.mxu0 %v3167_v63 }
 0x2c4   :  { %v4949_v55 = vadd.f32 %v2971_v62, %v6048_v46  ;;  %v2973_v39 = vpop.f32.mrb[81].mxu1  ;;  %v4919_v26 = vadd.f32 %v2749_v33, %v6042_v22  ;;  %v2751_v32 = vpop.f32.mrb[83].mxu0  ;;  %3972 = vmatmul.mubr.bf16.gmra.mrb[140].mxu0 %v3166_v13  ;;  %v3078_v27 = vmax.f32 %v4917_v61, 0.0 }
 0x2c5   :  { %v4950_v11 = vadd.f32 %v2973_v39, %v6051_v10  ;;  %v2975_v58 = vpop.f32.mrb[82].mxu1  ;;  %4068 = vmatprep.mubr.bf16.mxu1 %v3169_v54  ;;  %v4920_v14 = vadd.f32 %v2751_v32, %v6045_v53  ;;  %v3079_v44 = vmax.f32 %v4918_v8, 0.0 }
 0x2c6   :  { %v3086_v12 = vmax.f32 %v4919_v26, 0.0  ;;  %v4951_v25 = vadd.f32 %v2975_v58, %v6048_v46  ;;  %v2977_v4 = vpop.f32.mrb[83].mxu1  ;;  %4069 = vmatmul.mubr.bf16.gmra.mrb[140].mxu1 %v3168_v60  ;;  %v3080_v50 = vmax.f32 %v4949_v55, 0.0 }
 0x2c7   :  { %v3087_v35 = vmax.f32 %v4920_v14, 0.0  ;;  %v4952_v9 = vadd.f32 %v2977_v4, %v6051_v10  ;;  %v3081_v52 = vmax.f32 %v4950_v11, 0.0 }
 0x2c8   :  { %v3174_v41 = vpack.c.bf16 %v3086_v12, %v3078_v27  ;;  %v3088_v47 = vmax.f32 %v4951_v25, 0.0 }
 0x2c9   :  { %v3175_v18 = vpack.c.bf16 %v3087_v35, %v3079_v44  ;;  %v3089_v0 = vmax.f32 %v4952_v9, 0.0  ;;  %v2755_v51 = vpop.f32.mrb[84].mxu0 }
 0x2ca   :  { %v3176_v5 = vpack.c.bf16 %v3088_v47, %v3080_v50  ;;  %v4921_v17 = vadd.f32 %v2755_v51, %v6042_v22  ;;  %v2757_v43 = vpop.f32.mrb[85].mxu0 }
 0x2cb   :  { %v3177_v45 = vpack.c.bf16 %v3089_v0, %v3081_v52  ;;  %v2981_v6 = vpop.f32.mrb[84].mxu1  ;;  %v4922_v48 = vadd.f32 %v2757_v43, %v6045_v53  ;;  %v2759_v36 = vpop.f32.mrb[86].mxu0  ;;  %3979 = vmatprep.mubr.bf16.mxu0 %v3175_v18 }
 0x2cc   :  { %v4953_v15 = vadd.f32 %v2981_v6, %v6048_v46  ;;  %v2983_v21 = vpop.f32.mrb[85].mxu1  ;;  %v4923_v57 = vadd.f32 %v2759_v36, %v6042_v22  ;;  %v2761_v38 = vpop.f32.mrb[87].mxu0  ;;  %3980 = vmatmul.mubr.bf16.gmra.mrb[144].mxu0 %v3174_v41  ;;  %v3094_v7 = vmax.f32 %v4921_v17, 0.0 }
 0x2cd   :  { %v4954_v49 = vadd.f32 %v2983_v21, %v6051_v10  ;;  %v2985_v16 = vpop.f32.mrb[86].mxu1  ;;  %4076 = vmatprep.mubr.bf16.mxu1 %v3177_v45  ;;  %v4924_v2 = vadd.f32 %v2761_v38, %v6045_v53  ;;  %v3095_v23 = vmax.f32 %v4922_v48, 0.0 }
 0x2ce   :  { %v3102_v34 = vmax.f32 %v4923_v57, 0.0  ;;  %v4955_v31 = vadd.f32 %v2985_v16, %v6048_v46  ;;  %v2987_v28 = vpop.f32.mrb[87].mxu1  ;;  %4077 = vmatmul.mubr.bf16.gmra.mrb[144].mxu1 %v3176_v5  ;;  %v3096_v40 = vmax.f32 %v4953_v15, 0.0 }
 0x2cf   :  { %v3103_v1 = vmax.f32 %v4924_v2, 0.0  ;;  %v4956_v3 = vadd.f32 %v2987_v28, %v6051_v10  ;;  %v3097_v30 = vmax.f32 %v4954_v49, 0.0 }
 0x2d0   :  { %v3182_v20 = vpack.c.bf16 %v3102_v34, %v3094_v7  ;;  %v3104_v42 = vmax.f32 %v4955_v31, 0.0 }
 0x2d1   :  { %v3183_v59 = vpack.c.bf16 %v3103_v1, %v3095_v23  ;;  %v3105_v13 = vmax.f32 %v4956_v3, 0.0  ;;  %v2765_v37 = vpop.f32.mrb[88].mxu0 }
 0x2d2   :  { %v3184_v24 = vpack.c.bf16 %v3104_v42, %v3096_v40  ;;  %v4925_v63 = vadd.f32 %v2765_v37, %v6042_v22  ;;  %v2767_v19 = vpop.f32.mrb[89].mxu0 }
 0x2d3   :  { %v3185_v29 = vpack.c.bf16 %v3105_v13, %v3097_v30  ;;  %v2991_v60 = vpop.f32.mrb[88].mxu1  ;;  %v4926_v61 = vadd.f32 %v2767_v19, %v6045_v53  ;;  %v2769_v56 = vpop.f32.mrb[90].mxu0  ;;  %3987 = vmatprep.mubr.bf16.mxu0 %v3183_v59  ;;  %v6120_v30 = vld [vmem:[%s6256_s6] ss:$0 sm:$0xff] }
 0x2d4   :  { %v4957_v54 = vadd.f32 %v2991_v60, %v6048_v46  ;;  %v2993_v62 = vpop.f32.mrb[89].mxu1  ;;  %v4927_v8 = vadd.f32 %v2769_v56, %v6042_v22  ;;  %v2771_v33 = vpop.f32.mrb[91].mxu0  ;;  %3988 = vmatmul.mubr.bf16.gmra.mrb[148].mxu0 %v3182_v20  ;;  %v3110_v32 = vmax.f32 %v4925_v63, 0.0 }
 0x2d5   :  { %v4958_v55 = vadd.f32 %v2993_v62, %v6051_v10  ;;  %v2995_v39 = vpop.f32.mrb[90].mxu1  ;;  %4084 = vmatprep.mubr.bf16.mxu1 %v3185_v29  ;;  %v4928_v26 = vadd.f32 %v2771_v33, %v6045_v53  ;;  %v3111_v27 = vmax.f32 %v4926_v61, 0.0 }
 0x2d6   :  { %v3118_v11 = vmax.f32 %v4927_v8, 0.0  ;;  %v4959_v58 = vadd.f32 %v2995_v39, %v6048_v46  ;;  %v2997_v14 = vpop.f32.mrb[91].mxu1  ;;  %4085 = vmatmul.mubr.bf16.gmra.mrb[148].mxu1 %v3184_v24  ;;  %v3112_v4 = vmax.f32 %v4957_v54, 0.0 }
 0x2d7   :  { %v3119_v12 = vmax.f32 %v4928_v26, 0.0  ;;  %v4960_v25 = vadd.f32 %v2997_v14, %v6051_v10  ;;  %v3113_v9 = vmax.f32 %v4958_v55, 0.0 }
 0x2d8   :  { %v3190_v44 = vpack.c.bf16 %v3118_v11, %v3110_v32  ;;  %v3120_v35 = vmax.f32 %v4959_v58, 0.0 }
 0x2d9   :  { %v3191_v50 = vpack.c.bf16 %v3119_v12, %v3111_v27  ;;  %v3121_v41 = vmax.f32 %v4960_v25, 0.0  ;;  %v2775_v47 = vpop.f32.mrb[92].mxu0 }
 0x2da   :  { %v3192_v52 = vpack.c.bf16 %v3120_v35, %v3112_v4  ;;  %v4929_v18 = vadd.f32 %v2775_v47, %v6042_v22  ;;  %v2777_v0 = vpop.f32.mrb[93].mxu0 }
 0x2db   :  { %v3193_v51 = vpack.c.bf16 %v3121_v41, %v3113_v9  ;;  %v3001_v5 = vpop.f32.mrb[92].mxu1  ;;  %v4930_v17 = vadd.f32 %v2777_v0, %v6045_v53  ;;  %v2779_v43 = vpop.f32.mrb[94].mxu0  ;;  %3995 = vmatprep.mubr.bf16.mxu0 %v3191_v50 }
 0x2dc   :  { %v4961_v45 = vadd.f32 %v3001_v5, %v6048_v46  ;;  %v3003_v6 = vpop.f32.mrb[93].mxu1  ;;  %v4931_v48 = vadd.f32 %v2779_v43, %v6042_v22  ;;  %v2781_v36 = vpop.f32.mrb[95].mxu0  ;;  %3996 = vmatmul.mubr.bf16.gmra.mrb[152].mxu0 %v3190_v44  ;;  %v3126_v38 = vmax.f32 %v4929_v18, 0.0 }
 0x2dd   :  { %v4962_v15 = vadd.f32 %v3003_v6, %v6051_v10  ;;  %v3005_v21 = vpop.f32.mrb[94].mxu1  ;;  %4092 = vmatprep.mubr.bf16.mxu1 %v3193_v51  ;;  %v4932_v57 = vadd.f32 %v2781_v36, %v6045_v53  ;;  %v3127_v7 = vmax.f32 %v4930_v17, 0.0 }
 0x2de   :  { %v3134_v49 = vmax.f32 %v4931_v48, 0.0  ;;  %v4963_v16 = vadd.f32 %v3005_v21, %v6048_v46  ;;  %v3007_v2 = vpop.f32.mrb[95].mxu1  ;;  %4093 = vmatmul.mubr.bf16.gmra.mrb[152].mxu1 %v3192_v52  ;;  %v3128_v28 = vmax.f32 %v4961_v45, 0.0 }
 0x2df   :  { %v3135_v34 = vmax.f32 %v4932_v57, 0.0  ;;  %v4964_v31 = vadd.f32 %v3007_v2, %v6051_v10  ;;  %v3129_v1 = vmax.f32 %v4962_v15, 0.0 }
 0x2e0   :  { %v3198_v22 = vpack.c.bf16 %v3134_v49, %v3126_v38  ;;  %v3136_v23 = vmax.f32 %v4963_v16, 0.0 }
 0x2e1   :  { %v3199_v3 = vpack.c.bf16 %v3135_v34, %v3127_v7  ;;  %v3137_v40 = vmax.f32 %v4964_v31, 0.0 }
 0x2e2   :  { %v3200_v20 = vpack.c.bf16 %v3136_v23, %v3128_v28 }
 0x2e3   :  { %v3201_v42 = vpack.c.bf16 %v3137_v40, %v3129_v1  ;;  %4003 = vmatprep.mubr.bf16.mxu0 %v3199_v3 }
 0x2e4   :  { %4004 = vmatmul.mubr.bf16.gmra.mrb[156].mxu0 %v3198_v22 }
 0x2e5   :  { %4100 = vmatprep.mubr.bf16.mxu1 %v3201_v42 }
 0x2e6   :  { %4101 = vmatmul.mubr.bf16.gmra.mrb[156].mxu1 %v3200_v20 }
 0x2ff   :  { %v4597_v53 = vpop.f32.mrb[96].mxu0  ;;  %v4661_v46 = vpop.f32.mrb[96].mxu1 }
 0x300   :  { %v4598_v10 = vpop.f32.mrb[97].mxu0  ;;  %v4662_v59 = vpop.f32.mrb[97].mxu1 }
 0x301   :  { %v4599_v13 = vadd.f32 %v4598_v10, %v4597_v53  ;;  %v4663_v37 = vadd.f32 %v4662_v59, %v4661_v46  ;;  %v4600_v24 = vpop.f32.mrb[98].mxu0  ;;  %v4664_v63 = vpop.f32.mrb[98].mxu1 }
 0x302   :  { %v4601_v19 = vpop.f32.mrb[99].mxu0  ;;  %v4665_v29 = vpop.f32.mrb[99].mxu1 }
 0x303   :  { %v3756_v60 = vadd.f32 %v4599_v13, %v6120_v30  ;;  %v4602_v61 = vadd.f32 %v4601_v19, %v4600_v24  ;;  %v4666_v56 = vadd.f32 %v4665_v29, %v4664_v63 }
 0x305   :  { %v6123_v54 = vadd.f32 %v4663_v37, %v3756_v60  ;;  %v3759_v62 = vadd.f32 %v4602_v61, %v6120_v30 }
 0x307   :  { %v6126_v8 = vadd.f32 %v4666_v56, %v3759_v62  ;;  %v4603_v33 = vpop.f32.mrb[100].mxu0  ;;  %v4667_v55 = vpop.f32.mrb[100].mxu1 }
 0x308   :  { %v4604_v39 = vpop.f32.mrb[101].mxu0  ;;  %v4668_v26 = vpop.f32.mrb[101].mxu1 }
 0x309   :  { %v4605_v32 = vadd.f32 %v4604_v39, %v4603_v33  ;;  %v4669_v11 = vadd.f32 %v4668_v26, %v4667_v55  ;;  %v4606_v58 = vpop.f32.mrb[102].mxu0  ;;  %v4670_v14 = vpop.f32.mrb[102].mxu1 }
 0x30a   :  { %v4607_v27 = vpop.f32.mrb[103].mxu0  ;;  %v4671_v12 = vpop.f32.mrb[103].mxu1 }
 0x30b   :  { %v3764_v25 = vadd.f32 %v4605_v32, %v6120_v30  ;;  %v4608_v4 = vadd.f32 %v4607_v27, %v4606_v58  ;;  %v4672_v44 = vadd.f32 %v4671_v12, %v4670_v14 }
 0x30d   :  { %v6129_v35 = vadd.f32 %v4669_v11, %v3764_v25  ;;  %v3767_v9 = vadd.f32 %v4608_v4, %v6120_v30 }
 0x30f   :  { %v6132_v50 = vadd.f32 %v4672_v44, %v3767_v9  ;;  %v4609_v41 = vpop.f32.mrb[104].mxu0  ;;  %v4673_v47 = vpop.f32.mrb[104].mxu1 }
 0x310   :  { %v4610_v52 = vpop.f32.mrb[105].mxu0  ;;  %v4674_v18 = vpop.f32.mrb[105].mxu1 }
 0x311   :  { %v4611_v0 = vadd.f32 %v4610_v52, %v4609_v41  ;;  %v4675_v51 = vadd.f32 %v4674_v18, %v4673_v47  ;;  %v4612_v5 = vpop.f32.mrb[106].mxu0  ;;  %v4676_v17 = vpop.f32.mrb[106].mxu1 }
 0x312   :  { %v4613_v43 = vpop.f32.mrb[107].mxu0  ;;  %v4677_v45 = vpop.f32.mrb[107].mxu1 }
 0x313   :  { %v3772_v6 = vadd.f32 %v4611_v0, %v6120_v30  ;;  %v4614_v48 = vadd.f32 %v4613_v43, %v4612_v5  ;;  %v4678_v36 = vadd.f32 %v4677_v45, %v4676_v17 }
 0x315   :  { %v6135_v15 = vadd.f32 %v4675_v51, %v3772_v6  ;;  %v3775_v21 = vadd.f32 %v4614_v48, %v6120_v30 }
 0x317   :  { %v6138_v57 = vadd.f32 %v4678_v36, %v3775_v21  ;;  %v4615_v38 = vpop.f32.mrb[108].mxu0  ;;  %v4679_v49 = vpop.f32.mrb[108].mxu1 }
 0x318   :  { %v4616_v16 = vpop.f32.mrb[109].mxu0  ;;  %v4680_v2 = vpop.f32.mrb[109].mxu1 }
 0x319   :  { %v4617_v7 = vadd.f32 %v4616_v16, %v4615_v38  ;;  %v4681_v34 = vadd.f32 %v4680_v2, %v4679_v49  ;;  %v4618_v31 = vpop.f32.mrb[110].mxu0  ;;  %v4682_v28 = vpop.f32.mrb[110].mxu1 }
 0x31a   :  { %v4619_v22 = vpop.f32.mrb[111].mxu0  ;;  %v4683_v23 = vpop.f32.mrb[111].mxu1 }
 0x31b   :  { %v3780_v1 = vadd.f32 %v4617_v7, %v6120_v30  ;;  %v4620_v3 = vadd.f32 %v4619_v22, %v4618_v31  ;;  %v4684_v40 = vadd.f32 %v4683_v23, %v4682_v28 }
 0x31d   :  { %v6141_v20 = vadd.f32 %v4681_v34, %v3780_v1  ;;  %v3783_v42 = vadd.f32 %v4620_v3, %v6120_v30 }
 0x31f   :  { %v6144_v53 = vadd.f32 %v4684_v40, %v3783_v42  ;;  %v4621_v46 = vpop.f32.mrb[112].mxu0  ;;  %v4685_v10 = vpop.f32.mrb[112].mxu1 }
 0x320   :  { %v4622_v59 = vpop.f32.mrb[113].mxu0  ;;  %v4686_v13 = vpop.f32.mrb[113].mxu1 }
 0x321   :  { %v4623_v37 = vadd.f32 %v4622_v59, %v4621_v46  ;;  %v4687_v24 = vadd.f32 %v4686_v13, %v4685_v10  ;;  %v4624_v63 = vpop.f32.mrb[114].mxu0  ;;  %v4688_v19 = vpop.f32.mrb[114].mxu1 }
 0x322   :  { %v4625_v29 = vpop.f32.mrb[115].mxu0  ;;  %v4689_v60 = vpop.f32.mrb[115].mxu1 }
 0x323   :  { %v3788_v61 = vadd.f32 %v4623_v37, %v6120_v30  ;;  %v4626_v56 = vadd.f32 %v4625_v29, %v4624_v63  ;;  %v4690_v62 = vadd.f32 %v4689_v60, %v4688_v19 }
 0x325   :  { %v6147_v33 = vadd.f32 %v4687_v24, %v3788_v61  ;;  %v3791_v55 = vadd.f32 %v4626_v56, %v6120_v30 }
 0x327   :  { %v6150_v39 = vadd.f32 %v4690_v62, %v3791_v55  ;;  %v4627_v26 = vpop.f32.mrb[116].mxu0  ;;  %v4691_v32 = vpop.f32.mrb[116].mxu1 }
 0x328   :  { %v4628_v11 = vpop.f32.mrb[117].mxu0  ;;  %v4692_v58 = vpop.f32.mrb[117].mxu1 }
 0x329   :  { %v4629_v14 = vadd.f32 %v4628_v11, %v4627_v26  ;;  %v4693_v27 = vadd.f32 %v4692_v58, %v4691_v32  ;;  %v4630_v12 = vpop.f32.mrb[118].mxu0  ;;  %v4694_v25 = vpop.f32.mrb[118].mxu1 }
 0x32a   :  { %v4631_v4 = vpop.f32.mrb[119].mxu0  ;;  %v4695_v44 = vpop.f32.mrb[119].mxu1 }
 0x32b   :  { %v3796_v9 = vadd.f32 %v4629_v14, %v6120_v30  ;;  %v4632_v41 = vadd.f32 %v4631_v4, %v4630_v12  ;;  %v4696_v47 = vadd.f32 %v4695_v44, %v4694_v25 }
 0x32d   :  { %v6153_v52 = vadd.f32 %v4693_v27, %v3796_v9  ;;  %v3799_v18 = vadd.f32 %v4632_v41, %v6120_v30 }
 0x32f   :  { %v6156_v0 = vadd.f32 %v4696_v47, %v3799_v18  ;;  %v4633_v51 = vpop.f32.mrb[120].mxu0  ;;  %v4697_v5 = vpop.f32.mrb[120].mxu1 }
 0x330   :  { %v4634_v17 = vpop.f32.mrb[121].mxu0  ;;  %v4698_v43 = vpop.f32.mrb[121].mxu1 }
 0x331   :  { %v4635_v45 = vadd.f32 %v4634_v17, %v4633_v51  ;;  %v4699_v6 = vadd.f32 %v4698_v43, %v4697_v5  ;;  %v4636_v48 = vpop.f32.mrb[122].mxu0  ;;  %v4700_v36 = vpop.f32.mrb[122].mxu1 }
 0x332   :  { %v4637_v21 = vpop.f32.mrb[123].mxu0  ;;  %v4701_v38 = vpop.f32.mrb[123].mxu1 }
 0x333   :  { %v3804_v49 = vadd.f32 %v4635_v45, %v6120_v30  ;;  %v4638_v16 = vadd.f32 %v4637_v21, %v4636_v48  ;;  %v4702_v2 = vadd.f32 %v4701_v38, %v4700_v36 }
 0x335   :  { %v6159_v7 = vadd.f32 %v4699_v6, %v3804_v49  ;;  %v3807_v34 = vadd.f32 %v4638_v16, %v6120_v30 }
 0x337   :  { %v6162_v31 = vadd.f32 %v4702_v2, %v3807_v34  ;;  %v4639_v28 = vpop.f32.mrb[124].mxu0  ;;  %v4703_v22 = vpop.f32.mrb[124].mxu1 }
 0x338   :  { %v4640_v23 = vpop.f32.mrb[125].mxu0  ;;  %v4704_v1 = vpop.f32.mrb[125].mxu1 }
 0x339   :  { %v4641_v3 = vadd.f32 %v4640_v23, %v4639_v28  ;;  %v4705_v40 = vadd.f32 %v4704_v1, %v4703_v22  ;;  %v4642_v42 = vpop.f32.mrb[126].mxu0  ;;  %v4706_v46 = vpop.f32.mrb[126].mxu1 }
 0x33a   :  { %v4643_v10 = vpop.f32.mrb[127].mxu0  ;;  %v4707_v59 = vpop.f32.mrb[127].mxu1 }
 0x33b   :  { %v3812_v13 = vadd.f32 %v4641_v3, %v6120_v30  ;;  %v4644_v37 = vadd.f32 %v4643_v10, %v4642_v42  ;;  %v4708_v24 = vadd.f32 %v4707_v59, %v4706_v46 }
 0x33d   :  { %v6165_v63 = vadd.f32 %v4705_v40, %v3812_v13  ;;  %v3815_v19 = vadd.f32 %v4644_v37, %v6120_v30 }
 0x33f   :  { %v6168_v29 = vadd.f32 %v4708_v24, %v3815_v19 }
 0x37f   :  { %v4725_v60 = vpop.f32.mrb[128].mxu0 }
 0x380   :  { %v4726_v61 = vpop.f32.mrb[129].mxu0 }
 0x381   :  { %v4789_v56 = vpop.f32.mrb[128].mxu1  ;;  %v4727_v62 = vadd.f32 %v4726_v61, %v4725_v60  ;;  %v4728_v55 = vpop.f32.mrb[130].mxu0 }
 0x382   :  { %v4790_v26 = vpop.f32.mrb[129].mxu1  ;;  %v4729_v32 = vpop.f32.mrb[131].mxu0 }
 0x383   :  { %v3950_v11 = vadd.f32 %v4727_v62, %v6123_v54  ;;  %v4791_v58 = vadd.f32 %v4790_v26, %v4789_v56  ;;  %v4792_v14 = vpop.f32.mrb[130].mxu1  ;;  %v4730_v27 = vadd.f32 %v4729_v32, %v4728_v55 }
 0x384   :  { %v4793_v12 = vpop.f32.mrb[131].mxu1 }
 0x385   :  { %v4047_v25 = vadd.f32 %v4791_v58, %v3950_v11  ;;  %v3953_v4 = vadd.f32 %v4730_v27, %v6126_v8  ;;  %v4794_v44 = vadd.f32 %v4793_v12, %v4792_v14 }
 0x387   :  { %v4109_v30 = vsub.f32 0.0, %v4047_v25  ;;  %v4050_v9 = vadd.f32 %v4794_v44, %v3953_v4  ;;  %v4731_v41 = vpop.f32.mrb[132].mxu0 }
 0x388   :  { %v4732_v47 = vpop.f32.mrb[133].mxu0 }
 0x389   :  { %v4125_v18 = vmul.f32 1.442695, %v4109_v30  ;;  %v4110_v51 = vsub.f32 0.0, %v4050_v9  ;;  %v4795_v5 = vpop.f32.mrb[132].mxu1  ;;  %v4733_v17 = vadd.f32 %v4732_v47, %v4731_v41  ;;  %v4734_v43 = vpop.f32.mrb[134].mxu0 }
 0x38a   :  { %v4796_v45 = vpop.f32.mrb[133].mxu1  ;;  %v4735_v6 = vpop.f32.mrb[135].mxu0 }
 0x38b   :  { %5184 = vpow2.f32 %v4125_v18  ;;  %v4127_v54 = vmul.f32 1.442695, %v4110_v51  ;;  %v3958_v48 = vadd.f32 %v4733_v17, %v6129_v35  ;;  %v4797_v36 = vadd.f32 %v4796_v45, %v4795_v5  ;;  %v4798_v21 = vpop.f32.mrb[134].mxu1 }
 0x38c   :  { %v4736_v38 = vadd.f32 %v4735_v6, %v4734_v43  ;;  %v4799_v8 = vpop.f32.mrb[135].mxu1 }
 0x38d   :  { %5186 = vpow2.f32 %v4127_v54  ;;  %v4055_v49 = vadd.f32 %v4797_v36, %v3958_v48  ;;  %v4800_v16 = vadd.f32 %v4799_v8, %v4798_v21 }
 0x38e   :  { %v3961_v2 = vadd.f32 %v4736_v38, %v6132_v50 }
 0x38f   :  { %v4111_v34 = vsub.f32 0.0, %v4055_v49  ;;  %v4737_v28 = vpop.f32.mrb[136].mxu0 }
 0x390   :  { %v4058_v22 = vadd.f32 %v4800_v16, %v3961_v2  ;;  %v4738_v23 = vpop.f32.mrb[137].mxu0 }
 0x391   :  { %v4129_v1 = vmul.f32 1.442695, %v4111_v34  ;;  %v4801_v3 = vpop.f32.mrb[136].mxu1  ;;  %v4739_v40 = vadd.f32 %v4738_v23, %v4737_v28  ;;  %v4740_v42 = vpop.f32.mrb[138].mxu0 }
 0x392   :  { %v4112_v46 = vsub.f32 0.0, %v4058_v22  ;;  %v4802_v10 = vpop.f32.mrb[137].mxu1  ;;  %v4741_v35 = vpop.f32.mrb[139].mxu0 }
 0x393   :  { %5188 = vpow2.f32 %v4129_v1  ;;  %v3966_v59 = vadd.f32 %v4739_v40, %v6135_v15  ;;  %v4803_v13 = vadd.f32 %v4802_v10, %v4801_v3  ;;  %v4804_v37 = vpop.f32.mrb[138].mxu1  ;;  %v4742_v24 = vadd.f32 %v4741_v35, %v4740_v42 }
 0x394   :  { %v4131_v19 = vmul.f32 1.442695, %v4112_v46  ;;  %v4805_v60 = vpop.f32.mrb[139].mxu1 }
 0x395   :  { %v5185_v50 = vpop.eup %5184  ;;  %v4063_v61 = vadd.f32 %v4803_v13, %v3966_v59  ;;  %v3969_v56 = vadd.f32 %v4742_v24, %v6138_v57  ;;  %v4806_v62 = vadd.f32 %v4805_v60, %v4804_v37 }
 0x396   :  { %v4157_v55 = vadd.f32 1.0, %v5185_v50  ;;  %5190 = vpow2.f32 %v4131_v19 }
 0x397   :  { %v5187_v26 = vpop.eup %5186  ;;  %v4113_v32 = vsub.f32 0.0, %v4063_v61  ;;  %v4066_v11 = vadd.f32 %v4806_v62, %v3969_v56  ;;  %v4743_v58 = vpop.f32.mrb[140].mxu0 }
 0x398   :  { %5192 = vrcp.f32 %v4157_v55  ;;  %v4158_v14 = vadd.f32 1.0, %v5187_v26  ;;  %v4744_v27 = vpop.f32.mrb[141].mxu0 }
 0x399   :  { %v4133_v15 = vmul.f32 1.442695, %v4113_v32  ;;  %v4114_v12 = vsub.f32 0.0, %v4066_v11  ;;  %v4807_v25 = vpop.f32.mrb[140].mxu1  ;;  %v4745_v4 = vadd.f32 %v4744_v27, %v4743_v58  ;;  %v4746_v44 = vpop.f32.mrb[142].mxu0 }
 0x39a   :  { %5194 = vrcp.f32 %v4158_v14  ;;  %v4808_v30 = vpop.f32.mrb[141].mxu1  ;;  %v4747_v9 = vpop.f32.mrb[143].mxu0 }
 0x39b   :  { %5196 = vpow2.f32 %v4133_v15  ;;  %v4135_v57 = vmul.f32 1.442695, %v4114_v12  ;;  %v3974_v41 = vadd.f32 %v4745_v4, %v6141_v20  ;;  %v4809_v47 = vadd.f32 %v4808_v30, %v4807_v25  ;;  %v4810_v18 = vpop.f32.mrb[142].mxu1 }
 0x39c   :  { %v4748_v51 = vadd.f32 %v4747_v9, %v4746_v44  ;;  %v4811_v5 = vpop.f32.mrb[143].mxu1 }
 0x39d   :  { %v5189_v17 = vpop.eup %5188  ;;  %5198 = vpow2.f32 %v4135_v57  ;;  %v4071_v43 = vadd.f32 %v4809_v47, %v3974_v41  ;;  %v4812_v45 = vadd.f32 %v4811_v5, %v4810_v18 }
 0x39e   :  { %v4159_v6 = vadd.f32 1.0, %v5189_v17  ;;  %v3977_v54 = vadd.f32 %v4748_v51, %v6144_v53 }
 0x39f   :  { %v4115_v48 = vsub.f32 0.0, %v4071_v43  ;;  %v4749_v36 = vpop.f32.mrb[144].mxu0 }
 0x3a0   :  { %v5191_v21 = vpop.eup %5190  ;;  %5200 = vrcp.f32 %v4159_v6  ;;  %v4074_v38 = vadd.f32 %v4812_v45, %v3977_v54  ;;  %v4750_v8 = vpop.f32.mrb[145].mxu0 }
 0x3a1   :  { %v4160_v49 = vadd.f32 1.0, %v5191_v21  ;;  %v4137_v20 = vmul.f32 1.442695, %v4115_v48  ;;  %v4813_v16 = vpop.f32.mrb[144].mxu1  ;;  %v4751_v2 = vadd.f32 %v4750_v8, %v4749_v36  ;;  %v4752_v34 = vpop.f32.mrb[146].mxu0 }
 0x3a2   :  { %v5193_v28 = vpop.eup %5192  ;;  %v4116_v22 = vsub.f32 0.0, %v4074_v38  ;;  %v4814_v23 = vpop.f32.mrb[145].mxu1 }
 0x3a3   :  { %v4753_v1 = vpop.f32.mrb[147].mxu0  ;;  %4206 = vst.msk [vmem:[%s6257_s7] sm:$0xff] %vm4205_vm1, %v5193_v28  ;;  %5202 = vrcp.f32 %v4160_v49  ;;  %v3982_v53 = vadd.f32 %v4751_v2, %v6147_v33  ;;  %v4815_v3 = vadd.f32 %v4814_v23, %v4813_v16  ;;  %v4816_v40 = vpop.f32.mrb[146].mxu1 }
 0x3a4   :  { %v4754_v42 = vadd.f32 %v4753_v1, %v4752_v34  ;;  %v5195_v46 = vpop.eup %5194  ;;  %5204 = vpow2.f32 %v4137_v20  ;;  %v4139_v10 = vmul.f32 1.442695, %v4116_v22  ;;  %v4817_v35 = vpop.f32.mrb[147].mxu1 }
 0x3a5   :  { %v5197_v59 = vpop.eup %5196  ;;  %4207 = vst.msk [vmem:[%s6257_s7 + $0x8] sm:$0xff] %vm4205_vm1, %v5195_v46  ;;  %v4079_v13 = vadd.f32 %v4815_v3, %v3982_v53  ;;  %v4818_v24 = vadd.f32 %v4817_v35, %v4816_v40 }
 0x3a6   :  { %v3985_v37 = vadd.f32 %v4754_v42, %v6150_v39  ;;  %v4161_v19 = vadd.f32 1.0, %v5197_v59  ;;  %5206 = vpow2.f32 %v4139_v10 }
 0x3a7   :  { %v5199_v33 = vpop.eup %5198  ;;  %v4117_v60 = vsub.f32 0.0, %v4079_v13  ;;  %v4755_v61 = vpop.f32.mrb[148].mxu0 }
 0x3a8   :  { %v4082_v50 = vadd.f32 %v4818_v24, %v3985_v37  ;;  %5208 = vrcp.f32 %v4161_v19  ;;  %v4162_v56 = vadd.f32 1.0, %v5199_v33  ;;  %v4756_v62 = vpop.f32.mrb[149].mxu0 }
 0x3a9   :  { %v4141_v55 = vmul.f32 1.442695, %v4117_v60  ;;  %v4819_v32 = vpop.f32.mrb[148].mxu1  ;;  %v4757_v11 = vadd.f32 %v4756_v62, %v4755_v61  ;;  %v4758_v58 = vpop.f32.mrb[150].mxu0 }
 0x3aa   :  { %v4118_v26 = vsub.f32 0.0, %v4082_v50  ;;  %v5201_v14 = vpop.eup %5200  ;;  %5210 = vrcp.f32 %v4162_v56  ;;  %v4820_v27 = vpop.f32.mrb[149].mxu1 }
 0x3ab   :  { %v4759_v15 = vpop.f32.mrb[151].mxu0  ;;  %4208 = vst.msk [vmem:[%s6257_s7 + $0x10] sm:$0xff] %vm4205_vm1, %v5201_v14  ;;  %5212 = vpow2.f32 %v4141_v55  ;;  %v3990_v12 = vadd.f32 %v4757_v11, %v6153_v52  ;;  %v4821_v25 = vadd.f32 %v4820_v27, %v4819_v32  ;;  %v4822_v4 = vpop.f32.mrb[150].mxu1 }
 0x3ac   :  { %v4143_v39 = vmul.f32 1.442695, %v4118_v26  ;;  %v4760_v44 = vadd.f32 %v4759_v15, %v4758_v58  ;;  %v4823_v30 = vpop.f32.mrb[151].mxu1 }
 0x3ad   :  { %v5203_v9 = vpop.eup %5202  ;;  %v4087_v57 = vadd.f32 %v4821_v25, %v3990_v12  ;;  %v4824_v41 = vadd.f32 %v4823_v30, %v4822_v4 }
 0x3ae   :  { %5214 = vpow2.f32 %v4143_v39  ;;  %v5205_v47 = vpop.eup %5204  ;;  %4209 = vst.msk [vmem:[%s6257_s7 + $0x18] sm:$0xff] %vm4205_vm1, %v5203_v9  ;;  %v3993_v18 = vadd.f32 %v4760_v44, %v6156_v0 }
 0x3af   :  { %v4163_v51 = vadd.f32 1.0, %v5205_v47  ;;  %v4119_v5 = vsub.f32 0.0, %v4087_v57  ;;  %v4761_v17 = vpop.f32.mrb[152].mxu0 }
 0x3b0   :  { %v5207_v52 = vpop.eup %5206  ;;  %v4090_v43 = vadd.f32 %v4824_v41, %v3993_v18  ;;  %v4762_v45 = vpop.f32.mrb[153].mxu0 }
 0x3b1   :  { %5216 = vrcp.f32 %v4163_v51  ;;  %v4164_v6 = vadd.f32 1.0, %v5207_v52  ;;  %v4145_v54 = vmul.f32 1.442695, %v4119_v5  ;;  %v4825_v48 = vpop.f32.mrb[152].mxu1  ;;  %v4763_v36 = vadd.f32 %v4762_v45, %v4761_v17  ;;  %v4764_v21 = vpop.f32.mrb[154].mxu0 }
 0x3b2   :  { %v5209_v38 = vpop.eup %5208  ;;  %v4120_v8 = vsub.f32 0.0, %v4090_v43  ;;  %v4826_v49 = vpop.f32.mrb[153].mxu1 }
 0x3b3   :  { %v4765_v20 = vpop.f32.mrb[155].mxu0  ;;  %4210 = vst.msk [vmem:[%s6257_s7 + $0x20] sm:$0xff] %vm4205_vm1, %v5209_v38  ;;  %5218 = vrcp.f32 %v4164_v6  ;;  %v3998_v0 = vadd.f32 %v4763_v36, %v6159_v7  ;;  %v4827_v16 = vadd.f32 %v4826_v49, %v4825_v48  ;;  %v4828_v2 = vpop.f32.mrb[154].mxu1 }
 0x3b4   :  { %v4766_v34 = vadd.f32 %v4765_v20, %v4764_v21  ;;  %v5211_v28 = vpop.eup %5210  ;;  %5220 = vpow2.f32 %v4145_v54  ;;  %v4147_v22 = vmul.f32 1.442695, %v4120_v8  ;;  %v4829_v23 = vpop.f32.mrb[155].mxu1 }
 0x3b5   :  { %v5213_v1 = vpop.eup %5212  ;;  %4211 = vst.msk [vmem:[%s6257_s7 + $0x28] sm:$0xff] %vm4205_vm1, %v5211_v28  ;;  %v4095_v53 = vadd.f32 %v4827_v16, %v3998_v0  ;;  %v4830_v40 = vadd.f32 %v4829_v23, %v4828_v2 }
 0x3b6   :  { %v4001_v3 = vadd.f32 %v4766_v34, %v6162_v31  ;;  %v4165_v42 = vadd.f32 1.0, %v5213_v1  ;;  %5222 = vpow2.f32 %v4147_v22 }
 0x3b7   :  { %v4121_v46 = vsub.f32 0.0, %v4095_v53  ;;  %v4767_v35 = vpop.f32.mrb[156].mxu0 }
 0x3b8   :  { %v5215_v7 = vpop.eup %5214  ;;  %v4098_v10 = vadd.f32 %v4830_v40, %v4001_v3  ;;  %5224 = vrcp.f32 %v4165_v42  ;;  %v4768_v13 = vpop.f32.mrb[157].mxu0 }
 0x3b9   :  { %v4166_v59 = vadd.f32 1.0, %v5215_v7  ;;  %v4149_v37 = vmul.f32 1.442695, %v4121_v46  ;;  %v4831_v19 = vpop.f32.mrb[156].mxu1  ;;  %v4769_v33 = vadd.f32 %v4768_v13, %v4767_v35  ;;  %v4770_v60 = vpop.f32.mrb[158].mxu0 }
 0x3ba   :  { %v4122_v24 = vsub.f32 0.0, %v4098_v10  ;;  %v4832_v50 = vpop.f32.mrb[157].mxu1  ;;  %v4771_v61 = vpop.f32.mrb[159].mxu0 }
 0x3bb   :  { %5226 = vrcp.f32 %v4166_v59  ;;  %v5217_v56 = vpop.eup %5216  ;;  %v4006_v62 = vadd.f32 %v4769_v33, %v6165_v63  ;;  %v4833_v55 = vadd.f32 %v4832_v50, %v4831_v19  ;;  %v4834_v26 = vpop.f32.mrb[158].mxu1  ;;  %v4772_v32 = vadd.f32 %v4771_v61, %v4770_v60 }
 0x3bc   :  { %5228 = vpow2.f32 %v4149_v37  ;;  %v4151_v31 = vmul.f32 1.442695, %v4122_v24  ;;  %4212 = vst.msk [vmem:[%s6257_s7 + $0x30] sm:$0xff] %vm4205_vm1, %v5217_v56  ;;  %v4835_v11 = vpop.f32.mrb[159].mxu1 }
 0x3bd   :  { %v5219_v58 = vpop.eup %5218  ;;  %v4103_v14 = vadd.f32 %v4833_v55, %v4006_v62  ;;  %v4836_v27 = vadd.f32 %v4835_v11, %v4834_v26  ;;  %v4009_v63 = vadd.f32 %v4772_v32, %v6168_v29 }
 0x3be   :  { %5230 = vpow2.f32 %v4151_v31  ;;  %v5221_v15 = vpop.eup %5220  ;;  %4213 = vst.msk [vmem:[%s6257_s7 + $0x38] sm:$0xff] %vm4205_vm1, %v5219_v58 }
 0x3bf   :  { %v4167_v39 = vadd.f32 1.0, %v5221_v15  ;;  %v4123_v12 = vsub.f32 0.0, %v4103_v14  ;;  %v4106_v4 = vadd.f32 %v4836_v27, %v4009_v63 }
 0x3c0   :  { %v5223_v25 = vpop.eup %5222 }
 0x3c1   :  { %5232 = vrcp.f32 %v4167_v39  ;;  %v4168_v44 = vadd.f32 1.0, %v5223_v25  ;;  %v4153_v30 = vmul.f32 1.442695, %v4123_v12  ;;  %v4124_v57 = vsub.f32 0.0, %v4106_v4 }
 0x3c2   :  { %v5225_v9 = vpop.eup %5224 }
 0x3c3   :  { %4214 = vst.msk [vmem:[%s6257_s7 + $0x40] sm:$0xff] %vm4205_vm1, %v5225_v9  ;;  %5234 = vrcp.f32 %v4168_v44  ;;  %v4155_v47 = vmul.f32 1.442695, %v4124_v57 }
 0x3c4   :  { %5236 = vpow2.f32 %v4153_v30 }
 0x3c5   :  { %v5227_v41 = vpop.eup %5226  ;;  %5238 = vpow2.f32 %v4155_v47 }
 0x3c6   :  { %v5229_v18 = vpop.eup %5228  ;;  %4215 = vst.msk [vmem:[%s6257_s7 + $0x48] sm:$0xff] %vm4205_vm1, %v5227_v41 }
 0x3c7   :  { %v4169_v29 = vadd.f32 1.0, %v5229_v18 }
 0x3c8   :  { %v5231_v51 = vpop.eup %5230 }
 0x3c9   :  { %5240 = vrcp.f32 %v4169_v29  ;;  %v4170_v5 = vadd.f32 1.0, %v5231_v51 }
 0x3cb   :  { %5242 = vrcp.f32 %v4170_v5  ;;  %v5233_v17 = vpop.eup %5232 }
 0x3cc   :  { %4216 = vst.msk [vmem:[%s6257_s7 + $0x50] sm:$0xff] %vm4205_vm1, %v5233_v17 }
 0x3cd   :  { %v5235_v52 = vpop.eup %5234 }
 0x3ce   :  { %v5237_v43 = vpop.eup %5236  ;;  %4217 = vst.msk [vmem:[%s6257_s7 + $0x58] sm:$0xff] %vm4205_vm1, %v5235_v52 }
 0x3cf   :  { %v4171_v45 = vadd.f32 1.0, %v5237_v43  ;;  %v5239_v6 = vpop.eup %5238 }
 0x3d0   :  { %v4172_v54 = vadd.f32 1.0, %v5239_v6 }
 0x3d1   :  { %5244 = vrcp.f32 %v4171_v45 }
 0x3d2   :  { %5246 = vrcp.f32 %v4172_v54 }
 0x3d3   :  { %v5241_v48 = vpop.eup %5240 }
 0x3d4   :  { %4218 = vst.msk [vmem:[%s6257_s7 + $0x60] sm:$0xff] %vm4205_vm1, %v5241_v48 }
 0x3d5   :  { %v5243_v36 = vpop.eup %5242 }
 0x3d6   :  { %4219 = vst.msk [vmem:[%s6257_s7 + $0x68] sm:$0xff] %vm4205_vm1, %v5243_v36 }
 0x3db   :  { %v5245_v21 = vpop.eup %5244 }
 0x3dc   :  { %4220 = vst.msk [vmem:[%s6257_s7 + $0x70] sm:$0xff] %vm4205_vm1, %v5245_v21  ;;  %v5247_v38 = vpop.eup %5246 }
 0x3dd   :  { %4221 = vst.msk [vmem:[%s6257_s7 + $0x78] sm:$0xff] %vm4205_vm1, %v5247_v38 }
 0x3de   :  { %4226 = vsyncpa [#allocation3], 1 }
 0x3df   :  { %4227 = vsyncpa [#allocation5], 1 }

</bundles_post_ra>
